<compile_context>
chip_gen: v6e
topology: v6e:2x2x1
jax: 0.10.0
libtpu: 0.0.40
codegen_flags: <defaults>
</compile_context>

<pallas_src>
import math

import jax
import jax.numpy as jnp
from jax.experimental import pallas as pl
from jax.experimental.pallas import tpu as pltpu


LANES = 128             # lane width of the batch layout
MAX_BLOCK_ROWS = 256    # 256 * 128 = 32768 batch elements per grid step


def _mek_kernel(gamma_ref, beta_ref, xt_ref, yt_ref, fidx_ref, yk_ref, o_ref):
    """gamma_ref: SMEM (C*C,) fused alphas*beta table; beta_ref: SMEM (C,).

    xt/yt: VMEM (rows, 128) f32 times; fidx/yk: VMEM (rows, 128) int32
    (flat_idx = x_type*C + y_type, and y_type).  o_ref: VMEM (rows, 128) f32.
    """
    n_class = beta_ref.shape[0]
    n_flat = gamma_ref.shape[0]

    x_t = xt_ref[...]                      # (tr, 128) f32
    y_t = yt_ref[...]                      # (tr, 128) f32
    flat_idx = fidx_ref[...]               # (tr, 128) int32
    y_type = yk_ref[...]                   # (tr, 128) int32

    # beta[y_type]: O(C) select-chain on the VPU, batch on lanes.
    beta_hist = jnp.zeros(y_type.shape, jnp.float32)
    for j in range(n_class):
        beta_hist = jnp.where(y_type == j, beta_ref[j], beta_hist)

    # gamma[x_type, y_type] = alphas[x,y] * beta[y]: flat-index gather as two
    # independent partial select-chains (ILP on the 4 VALU slots), combined
    # with a single add.  Exactly one index matches, so the sum is exact;
    # out-of-range indices keep the 0.0 init.
    half = (n_flat + 1) // 2
    acc0 = jnp.zeros(flat_idx.shape, jnp.float32)
    acc1 = jnp.zeros(flat_idx.shape, jnp.float32)
    for k in range(half):
        acc0 = jnp.where(flat_idx == k, gamma_ref[k], acc0)
    for k in range(half, n_flat):
        acc1 = jnp.where(flat_idx == k, gamma_ref[k], acc1)
    gamma_hist = acc0 + acc1

    # Where-based masking: keeps exp from overflowing when x_t <= 0 and skips
    # the bool->f32 convert + one mask multiply.  exp rides the EUP slot.
    mask_b = x_t > 0.0
    tds = jnp.where(mask_b, x_t - y_t, 0.0)
    o_ref[...] = jnp.where(mask_b, gamma_hist * jnp.exp(-beta_hist * tds), 0.0)


def _pick_tiling(batch):
    """Return (rows_padded, block_rows) for the lane-dense (rows, 128) layout."""
    rows = math.ceil(batch / LANES)
    if rows < 2:
        # batch <= 128: a single full-array block (nothing worth splitting).
        return rows, rows
    # >= 2 "parallel" grid steps (v7x megacore) with 8-row-aligned blocks,
    # each block at most MAX_BLOCK_ROWS rows.
    half = math.ceil(rows / 2)
    block_rows = min(MAX_BLOCK_ROWS, 8 * math.ceil(half / 8))
    rows_padded = block_rows * max(2, math.ceil(rows / block_rows))
    return rows_padded, block_rows


def multivariate_exponential_kernel(x, y, alphas, beta):
    """x, y: [batch, 2] (t, type); alphas: [C, C]; beta: [C].  Returns [batch]."""
    batch = x.shape[0]
    n_class = alphas.shape[0]

    rows_padded, block_rows = _pick_tiling(batch)
    padded = rows_padded * LANES
    pad = padded - batch

    def prep(col, dtype):
        # Zero padding is safe: padded x_t == 0 -> mask == False -> output == 0.
        col = col.astype(dtype)
        if pad:
            col = jnp.pad(col, (0, pad))
        return col.reshape(rows_padded, LANES)

    x_type = x[:, 1].astype(jnp.int32)     # matches .long() truncation
    y_type = y[:, 1].astype(jnp.int32)

    x_t = prep(x[:, 0], jnp.float32)
    y_t = prep(y[:, 0], jnp.float32)
    flat_idx = prep(x_type * n_class + y_type, jnp.int32)
    y_k = prep(y_type, jnp.int32)

    # Fused table gamma[i, j] = alphas[i, j] * beta[j]  (one 16x16 XLA mul).
    gamma_flat = (alphas.astype(jnp.float32)
                  * beta.astype(jnp.float32)[None, :]).reshape(-1)   # (C*C,)
    beta_flat = beta.astype(jnp.float32).reshape(-1)                  # (C,)

    grid = (rows_padded // block_rows,)
    # index_maps receive the scalar-prefetch refs as trailing positional args.
    lane_spec = pl.BlockSpec((block_rows, LANES), lambda i, g, b: (i, 0))

    out = pl.pallas_call(
        _mek_kernel,
        out_shape=jax.ShapeDtypeStruct((rows_padded, LANES), jnp.float32),
        grid_spec=pltpu.PrefetchScalarGridSpec(
            num_scalar_prefetch=2,        # gamma_flat, beta_flat -> SMEM once
            grid=grid,
            in_specs=[
                lane_spec,    # x_t      (rows, 128) f32
                lane_spec,    # y_t      (rows, 128) f32
                lane_spec,    # flat_idx (rows, 128) int32
                lane_spec,    # y_type   (rows, 128) int32
            ],
            out_specs=lane_spec,
        ),
        compiler_params=pltpu.CompilerParams(
            dimension_semantics=("parallel",)),
    )(gamma_flat, beta_flat, x_t, y_t, flat_idx, y_k)

    return out.reshape(-1)[:batch]


def _reference(x, y, alphas, beta):
    x_type = x[:, 1].astype(jnp.int32)
    y_type = y[:, 1].astype(jnp.int32)
    alphas_hist = alphas[x_type, y_type]
    beta_hist = beta[y_type]
    mask = (x[:, 0] > 0).astype(jnp.float32)
    tds = (x[:, 0] - y[:, 0]) * mask
    return alphas_hist * beta_hist * jnp.exp(-beta_hist * tds) * mask


if __name__ == "__main__":
    key = jax.random.PRNGKey(0)
    batch, n_class = 300, 16   # batch deliberately not a multiple of 128

    k1, k2, k3, k4, k5, k6 = jax.random.split(key, 6)

    # Module "parameters" (__init__ takes alphas [C, C], beta [C]).
    alphas = jax.random.uniform(k1, (n_class, n_class), jnp.float32, 0.0, 1.0)
    beta = jax.random.uniform(k2, (n_class,), jnp.float32, 0.1, 2.0)

    # Inputs: (t, type) pairs; some x_t <= 0 to exercise the mask.
    x_t = jax.random.uniform(k3, (batch,), jnp.float32, -1.0, 5.0)
    y_t = jax.random.uniform(k4, (batch,), jnp.float32, 0.0, 4.0)
    x_type = jax.random.randint(k5, (batch,), 0, n_class).astype(jnp.float32)
    y_type = jax.random.randint(k6, (batch,), 0, n_class).astype(jnp.float32)
    x = jnp.stack([x_t, x_type], axis=1)   # [batch, 2]
    y = jnp.stack([y_t, y_type], axis=1)   # [batch, 2]

    out = multivariate_exponential_kernel(x, y, alphas, beta)
    out = jax.block_until_ready(out)

    ref = _reference(x, y, alphas, beta)
    assert out.shape == (batch,)
    assert jnp.allclose(out, ref, atol=1e-5, rtol=1e-5), "mismatch vs reference"

    print("KERNEL_OK")
</pallas_src>

<mosaic_0001>
module attributes {stable_mosaic.version = 11 : i64} {
  func.func @_mek_kernel(%arg0: i32, %arg1: memref<256xf32, #tpu.memory_space<smem>>, %arg2: memref<16xf32, #tpu.memory_space<smem>>, %arg3: memref<8x128xf32, #tpu.memory_space<vmem>>, %arg4: memref<8x128xf32, #tpu.memory_space<vmem>>, %arg5: memref<8x128xi32, #tpu.memory_space<vmem>>, %arg6: memref<8x128xi32, #tpu.memory_space<vmem>>, %arg7: memref<8x128xf32, #tpu.memory_space<vmem>>) attributes {dimension_semantics = [#tpu.dimension_semantics<parallel>], iteration_bounds = array<i64: 2>, scalar_prefetch = 2 : i64, scratch_operands = 0 : i64, tpu.core_type = #tpu.core_type<tc>, window_params = [{transform_indices = @transform_0, window_bounds = array<i64: 8, 128>}, {transform_indices = @transform_1, window_bounds = array<i64: 8, 128>}, {transform_indices = @transform_2, window_bounds = array<i64: 8, 128>}, {transform_indices = @transform_3, window_bounds = array<i64: 8, 128>}, {transform_indices = @transform_4, window_bounds = array<i64: 8, 128>}]} {
    %c0 = arith.constant 0 : index
    %c0_0 = arith.constant 0 : index
    %0 = vector.load %arg3[%c0, %c0_0] : memref<8x128xf32, #tpu.memory_space<vmem>>, vector<8x128xf32>
    %c0_1 = arith.constant 0 : index
    %c0_2 = arith.constant 0 : index
    %1 = vector.load %arg4[%c0_1, %c0_2] : memref<8x128xf32, #tpu.memory_space<vmem>>, vector<8x128xf32>
    %c0_3 = arith.constant 0 : index
    %c0_4 = arith.constant 0 : index
    %2 = vector.load %arg5[%c0_3, %c0_4] : memref<8x128xi32, #tpu.memory_space<vmem>>, vector<8x128xi32>
    %c0_5 = arith.constant 0 : index
    %c0_6 = arith.constant 0 : index
    %3 = vector.load %arg6[%c0_5, %c0_6] : memref<8x128xi32, #tpu.memory_space<vmem>>, vector<8x128xi32>
    %cst = arith.constant 0.000000e+00 : f32
    %4 = vector.broadcast %cst : f32 to vector<8x128xf32>
    %c0_i32 = arith.constant 0 : i32
    %5 = vector.broadcast %c0_i32 : i32 to vector<8x128xi32>
    %6 = arith.cmpi eq, %3, %5 : vector<8x128xi32>
    %c0_7 = arith.constant 0 : index
    %7 = memref.load %arg2[%c0_7] : memref<16xf32, #tpu.memory_space<smem>>
    %8 = vector.broadcast %7 : f32 to vector<8x128xf32>
    %9 = arith.select %6, %8, %4 : vector<8x128xi1>, vector<8x128xf32>
    %c1_i32 = arith.constant 1 : i32
    %10 = vector.broadcast %c1_i32 : i32 to vector<8x128xi32>
    %11 = arith.cmpi eq, %3, %10 : vector<8x128xi32>
    %c1 = arith.constant 1 : index
    %12 = memref.load %arg2[%c1] : memref<16xf32, #tpu.memory_space<smem>>
    %13 = vector.broadcast %12 : f32 to vector<8x128xf32>
    %14 = arith.select %11, %13, %9 : vector<8x128xi1>, vector<8x128xf32>
    %c2_i32 = arith.constant 2 : i32
    %15 = vector.broadcast %c2_i32 : i32 to vector<8x128xi32>
    %16 = arith.cmpi eq, %3, %15 : vector<8x128xi32>
    %c2 = arith.constant 2 : index
    %17 = memref.load %arg2[%c2] : memref<16xf32, #tpu.memory_space<smem>>
    %18 = vector.broadcast %17 : f32 to vector<8x128xf32>
    %19 = arith.select %16, %18, %14 : vector<8x128xi1>, vector<8x128xf32>
    %c3_i32 = arith.constant 3 : i32
    %20 = vector.broadcast %c3_i32 : i32 to vector<8x128xi32>
    %21 = arith.cmpi eq, %3, %20 : vector<8x128xi32>
    %c3 = arith.constant 3 : index
    %22 = memref.load %arg2[%c3] : memref<16xf32, #tpu.memory_space<smem>>
    %23 = vector.broadcast %22 : f32 to vector<8x128xf32>
    %24 = arith.select %21, %23, %19 : vector<8x128xi1>, vector<8x128xf32>
    %c4_i32 = arith.constant 4 : i32
    %25 = vector.broadcast %c4_i32 : i32 to vector<8x128xi32>
    %26 = arith.cmpi eq, %3, %25 : vector<8x128xi32>
    %c4 = arith.constant 4 : index
    %27 = memref.load %arg2[%c4] : memref<16xf32, #tpu.memory_space<smem>>
    %28 = vector.broadcast %27 : f32 to vector<8x128xf32>
    %29 = arith.select %26, %28, %24 : vector<8x128xi1>, vector<8x128xf32>
    %c5_i32 = arith.constant 5 : i32
    %30 = vector.broadcast %c5_i32 : i32 to vector<8x128xi32>
    %31 = arith.cmpi eq, %3, %30 : vector<8x128xi32>
    %c5 = arith.constant 5 : index
    %32 = memref.load %arg2[%c5] : memref<16xf32, #tpu.memory_space<smem>>
    %33 = vector.broadcast %32 : f32 to vector<8x128xf32>
    %34 = arith.select %31, %33, %29 : vector<8x128xi1>, vector<8x128xf32>
    %c6_i32 = arith.constant 6 : i32
    %35 = vector.broadcast %c6_i32 : i32 to vector<8x128xi32>
    %36 = arith.cmpi eq, %3, %35 : vector<8x128xi32>
    %c6 = arith.constant 6 : index
    %37 = memref.load %arg2[%c6] : memref<16xf32, #tpu.memory_space<smem>>
    %38 = vector.broadcast %37 : f32 to vector<8x128xf32>
    %39 = arith.select %36, %38, %34 : vector<8x128xi1>, vector<8x128xf32>
    %c7_i32 = arith.constant 7 : i32
    %40 = vector.broadcast %c7_i32 : i32 to vector<8x128xi32>
    %41 = arith.cmpi eq, %3, %40 : vector<8x128xi32>
    %c7 = arith.constant 7 : index
    %42 = memref.load %arg2[%c7] : memref<16xf32, #tpu.memory_space<smem>>
    %43 = vector.broadcast %42 : f32 to vector<8x128xf32>
    %44 = arith.select %41, %43, %39 : vector<8x128xi1>, vector<8x128xf32>
    %c8_i32 = arith.constant 8 : i32
    %45 = vector.broadcast %c8_i32 : i32 to vector<8x128xi32>
    %46 = arith.cmpi eq, %3, %45 : vector<8x128xi32>
    %c8 = arith.constant 8 : index
    %47 = memref.load %arg2[%c8] : memref<16xf32, #tpu.memory_space<smem>>
    %48 = vector.broadcast %47 : f32 to vector<8x128xf32>
    %49 = arith.select %46, %48, %44 : vector<8x128xi1>, vector<8x128xf32>
    %c9_i32 = arith.constant 9 : i32
    %50 = vector.broadcast %c9_i32 : i32 to vector<8x128xi32>
    %51 = arith.cmpi eq, %3, %50 : vector<8x128xi32>
    %c9 = arith.constant 9 : index
    %52 = memref.load %arg2[%c9] : memref<16xf32, #tpu.memory_space<smem>>
    %53 = vector.broadcast %52 : f32 to vector<8x128xf32>
    %54 = arith.select %51, %53, %49 : vector<8x128xi1>, vector<8x128xf32>
    %c10_i32 = arith.constant 10 : i32
    %55 = vector.broadcast %c10_i32 : i32 to vector<8x128xi32>
    %56 = arith.cmpi eq, %3, %55 : vector<8x128xi32>
    %c10 = arith.constant 10 : index
    %57 = memref.load %arg2[%c10] : memref<16xf32, #tpu.memory_space<smem>>
    %58 = vector.broadcast %57 : f32 to vector<8x128xf32>
    %59 = arith.select %56, %58, %54 : vector<8x128xi1>, vector<8x128xf32>
    %c11_i32 = arith.constant 11 : i32
    %60 = vector.broadcast %c11_i32 : i32 to vector<8x128xi32>
    %61 = arith.cmpi eq, %3, %60 : vector<8x128xi32>
    %c11 = arith.constant 11 : index
    %62 = memref.load %arg2[%c11] : memref<16xf32, #tpu.memory_space<smem>>
    %63 = vector.broadcast %62 : f32 to vector<8x128xf32>
    %64 = arith.select %61, %63, %59 : vector<8x128xi1>, vector<8x128xf32>
    %c12_i32 = arith.constant 12 : i32
    %65 = vector.broadcast %c12_i32 : i32 to vector<8x128xi32>
    %66 = arith.cmpi eq, %3, %65 : vector<8x128xi32>
    %c12 = arith.constant 12 : index
    %67 = memref.load %arg2[%c12] : memref<16xf32, #tpu.memory_space<smem>>
    %68 = vector.broadcast %67 : f32 to vector<8x128xf32>
    %69 = arith.select %66, %68, %64 : vector<8x128xi1>, vector<8x128xf32>
    %c13_i32 = arith.constant 13 : i32
    %70 = vector.broadcast %c13_i32 : i32 to vector<8x128xi32>
    %71 = arith.cmpi eq, %3, %70 : vector<8x128xi32>
    %c13 = arith.constant 13 : index
    %72 = memref.load %arg2[%c13] : memref<16xf32, #tpu.memory_space<smem>>
    %73 = vector.broadcast %72 : f32 to vector<8x128xf32>
    %74 = arith.select %71, %73, %69 : vector<8x128xi1>, vector<8x128xf32>
    %c14_i32 = arith.constant 14 : i32
    %75 = vector.broadcast %c14_i32 : i32 to vector<8x128xi32>
    %76 = arith.cmpi eq, %3, %75 : vector<8x128xi32>
    %c14 = arith.constant 14 : index
    %77 = memref.load %arg2[%c14] : memref<16xf32, #tpu.memory_space<smem>>
    %78 = vector.broadcast %77 : f32 to vector<8x128xf32>
    %79 = arith.select %76, %78, %74 : vector<8x128xi1>, vector<8x128xf32>
    %c15_i32 = arith.constant 15 : i32
    %80 = vector.broadcast %c15_i32 : i32 to vector<8x128xi32>
    %81 = arith.cmpi eq, %3, %80 : vector<8x128xi32>
    %c15 = arith.constant 15 : index
    %82 = memref.load %arg2[%c15] : memref<16xf32, #tpu.memory_space<smem>>
    %83 = vector.broadcast %82 : f32 to vector<8x128xf32>
    %84 = arith.select %81, %83, %79 : vector<8x128xi1>, vector<8x128xf32>
    %cst_8 = arith.constant 0.000000e+00 : f32
    %85 = vector.broadcast %cst_8 : f32 to vector<8x128xf32>
    %cst_9 = arith.constant 0.000000e+00 : f32
    %86 = vector.broadcast %cst_9 : f32 to vector<8x128xf32>
    %c0_i32_10 = arith.constant 0 : i32
    %87 = vector.broadcast %c0_i32_10 : i32 to vector<8x128xi32>
    %88 = arith.cmpi eq, %2, %87 : vector<8x128xi32>
    %c0_11 = arith.constant 0 : index
    %89 = memref.load %arg1[%c0_11] : memref<256xf32, #tpu.memory_space<smem>>
    %90 = vector.broadcast %89 : f32 to vector<8x128xf32>
    %91 = arith.select %88, %90, %85 : vector<8x128xi1>, vector<8x128xf32>
    %c1_i32_12 = arith.constant 1 : i32
    %92 = vector.broadcast %c1_i32_12 : i32 to vector<8x128xi32>
    %93 = arith.cmpi eq, %2, %92 : vector<8x128xi32>
    %c1_13 = arith.constant 1 : index
    %94 = memref.load %arg1[%c1_13] : memref<256xf32, #tpu.memory_space<smem>>
    %95 = vector.broadcast %94 : f32 to vector<8x128xf32>
    %96 = arith.select %93, %95, %91 : vector<8x128xi1>, vector<8x128xf32>
    %c2_i32_14 = arith.constant 2 : i32
    %97 = vector.broadcast %c2_i32_14 : i32 to vector<8x128xi32>
    %98 = arith.cmpi eq, %2, %97 : vector<8x128xi32>
    %c2_15 = arith.constant 2 : index
    %99 = memref.load %arg1[%c2_15] : memref<256xf32, #tpu.memory_space<smem>>
    %100 = vector.broadcast %99 : f32 to vector<8x128xf32>
    %101 = arith.select %98, %100, %96 : vector<8x128xi1>, vector<8x128xf32>
    %c3_i32_16 = arith.constant 3 : i32
    %102 = vector.broadcast %c3_i32_16 : i32 to vector<8x128xi32>
    %103 = arith.cmpi eq, %2, %102 : vector<8x128xi32>
    %c3_17 = arith.constant 3 : index
    %104 = memref.load %arg1[%c3_17] : memref<256xf32, #tpu.memory_space<smem>>
    %105 = vector.broadcast %104 : f32 to vector<8x128xf32>
    %106 = arith.select %103, %105, %101 : vector<8x128xi1>, vector<8x128xf32>
    %c4_i32_18 = arith.constant 4 : i32
    %107 = vector.broadcast %c4_i32_18 : i32 to vector<8x128xi32>
    %108 = arith.cmpi eq, %2, %107 : vector<8x128xi32>
    %c4_19 = arith.constant 4 : index
    %109 = memref.load %arg1[%c4_19] : memref<256xf32, #tpu.memory_space<smem>>
    %110 = vector.broadcast %109 : f32 to vector<8x128xf32>
    %111 = arith.select %108, %110, %106 : vector<8x128xi1>, vector<8x128xf32>
    %c5_i32_20 = arith.constant 5 : i32
    %112 = vector.broadcast %c5_i32_20 : i32 to vector<8x128xi32>
    %113 = arith.cmpi eq, %2, %112 : vector<8x128xi32>
    %c5_21 = arith.constant 5 : index
    %114 = memref.load %arg1[%c5_21] : memref<256xf32, #tpu.memory_space<smem>>
    %115 = vector.broadcast %114 : f32 to vector<8x128xf32>
    %116 = arith.select %113, %115, %111 : vector<8x128xi1>, vector<8x128xf32>
    %c6_i32_22 = arith.constant 6 : i32
    %117 = vector.broadcast %c6_i32_22 : i32 to vector<8x128xi32>
    %118 = arith.cmpi eq, %2, %117 : vector<8x128xi32>
    %c6_23 = arith.constant 6 : index
    %119 = memref.load %arg1[%c6_23] : memref<256xf32, #tpu.memory_space<smem>>
    %120 = vector.broadcast %119 : f32 to vector<8x128xf32>
    %121 = arith.select %118, %120, %116 : vector<8x128xi1>, vector<8x128xf32>
    %c7_i32_24 = arith.constant 7 : i32
    %122 = vector.broadcast %c7_i32_24 : i32 to vector<8x128xi32>
    %123 = arith.cmpi eq, %2, %122 : vector<8x128xi32>
    %c7_25 = arith.constant 7 : index
    %124 = memref.load %arg1[%c7_25] : memref<256xf32, #tpu.memory_space<smem>>
    %125 = vector.broadcast %124 : f32 to vector<8x128xf32>
    %126 = arith.select %123, %125, %121 : vector<8x128xi1>, vector<8x128xf32>
    %c8_i32_26 = arith.constant 8 : i32
    %127 = vector.broadcast %c8_i32_26 : i32 to vector<8x128xi32>
    %128 = arith.cmpi eq, %2, %127 : vector<8x128xi32>
    %c8_27 = arith.constant 8 : index
    %129 = memref.load %arg1[%c8_27] : memref<256xf32, #tpu.memory_space<smem>>
    %130 = vector.broadcast %129 : f32 to vector<8x128xf32>
    %131 = arith.select %128, %130, %126 : vector<8x128xi1>, vector<8x128xf32>
    %c9_i32_28 = arith.constant 9 : i32
    %132 = vector.broadcast %c9_i32_28 : i32 to vector<8x128xi32>
    %133 = arith.cmpi eq, %2, %132 : vector<8x128xi32>
    %c9_29 = arith.constant 9 : index
    %134 = memref.load %arg1[%c9_29] : memref<256xf32, #tpu.memory_space<smem>>
    %135 = vector.broadcast %134 : f32 to vector<8x128xf32>
    %136 = arith.select %133, %135, %131 : vector<8x128xi1>, vector<8x128xf32>
    %c10_i32_30 = arith.constant 10 : i32
    %137 = vector.broadcast %c10_i32_30 : i32 to vector<8x128xi32>
    %138 = arith.cmpi eq, %2, %137 : vector<8x128xi32>
    %c10_31 = arith.constant 10 : index
    %139 = memref.load %arg1[%c10_31] : memref<256xf32, #tpu.memory_space<smem>>
    %140 = vector.broadcast %139 : f32 to vector<8x128xf32>
    %141 = arith.select %138, %140, %136 : vector<8x128xi1>, vector<8x128xf32>
    %c11_i32_32 = arith.constant 11 : i32
    %142 = vector.broadcast %c11_i32_32 : i32 to vector<8x128xi32>
    %143 = arith.cmpi eq, %2, %142 : vector<8x128xi32>
    %c11_33 = arith.constant 11 : index
    %144 = memref.load %arg1[%c11_33] : memref<256xf32, #tpu.memory_space<smem>>
    %145 = vector.broadcast %144 : f32 to vector<8x128xf32>
    %146 = arith.select %143, %145, %141 : vector<8x128xi1>, vector<8x128xf32>
    %c12_i32_34 = arith.constant 12 : i32
    %147 = vector.broadcast %c12_i32_34 : i32 to vector<8x128xi32>
    %148 = arith.cmpi eq, %2, %147 : vector<8x128xi32>
    %c12_35 = arith.constant 12 : index
    %149 = memref.load %arg1[%c12_35] : memref<256xf32, #tpu.memory_space<smem>>
    %150 = vector.broadcast %149 : f32 to vector<8x128xf32>
    %151 = arith.select %148, %150, %146 : vector<8x128xi1>, vector<8x128xf32>
    %c13_i32_36 = arith.constant 13 : i32
    %152 = vector.broadcast %c13_i32_36 : i32 to vector<8x128xi32>
    %153 = arith.cmpi eq, %2, %152 : vector<8x128xi32>
    %c13_37 = arith.constant 13 : index
    %154 = memref.load %arg1[%c13_37] : memref<256xf32, #tpu.memory_space<smem>>
    %155 = vector.broadcast %154 : f32 to vector<8x128xf32>
    %156 = arith.select %153, %155, %151 : vector<8x128xi1>, vector<8x128xf32>
    %c14_i32_38 = arith.constant 14 : i32
    %157 = vector.broadcast %c14_i32_38 : i32 to vector<8x128xi32>
    %158 = arith.cmpi eq, %2, %157 : vector<8x128xi32>
    %c14_39 = arith.constant 14 : index
    %159 = memref.load %arg1[%c14_39] : memref<256xf32, #tpu.memory_space<smem>>
    %160 = vector.broadcast %159 : f32 to vector<8x128xf32>
    %161 = arith.select %158, %160, %156 : vector<8x128xi1>, vector<8x128xf32>
    %c15_i32_40 = arith.constant 15 : i32
    %162 = vector.broadcast %c15_i32_40 : i32 to vector<8x128xi32>
    %163 = arith.cmpi eq, %2, %162 : vector<8x128xi32>
    %c15_41 = arith.constant 15 : index
    %164 = memref.load %arg1[%c15_41] : memref<256xf32, #tpu.memory_space<smem>>
    %165 = vector.broadcast %164 : f32 to vector<8x128xf32>
    %166 = arith.select %163, %165, %161 : vector<8x128xi1>, vector<8x128xf32>
    %c16_i32 = arith.constant 16 : i32
    %167 = vector.broadcast %c16_i32 : i32 to vector<8x128xi32>
    %168 = arith.cmpi eq, %2, %167 : vector<8x128xi32>
    %c16 = arith.constant 16 : index
    %169 = memref.load %arg1[%c16] : memref<256xf32, #tpu.memory_space<smem>>
    %170 = vector.broadcast %169 : f32 to vector<8x128xf32>
    %171 = arith.select %168, %170, %166 : vector<8x128xi1>, vector<8x128xf32>
    %c17_i32 = arith.constant 17 : i32
    %172 = vector.broadcast %c17_i32 : i32 to vector<8x128xi32>
    %173 = arith.cmpi eq, %2, %172 : vector<8x128xi32>
    %c17 = arith.constant 17 : index
    %174 = memref.load %arg1[%c17] : memref<256xf32, #tpu.memory_space<smem>>
    %175 = vector.broadcast %174 : f32 to vector<8x128xf32>
    %176 = arith.select %173, %175, %171 : vector<8x128xi1>, vector<8x128xf32>
    %c18_i32 = arith.constant 18 : i32
    %177 = vector.broadcast %c18_i32 : i32 to vector<8x128xi32>
    %178 = arith.cmpi eq, %2, %177 : vector<8x128xi32>
    %c18 = arith.constant 18 : index
    %179 = memref.load %arg1[%c18] : memref<256xf32, #tpu.memory_space<smem>>
    %180 = vector.broadcast %179 : f32 to vector<8x128xf32>
    %181 = arith.select %178, %180, %176 : vector<8x128xi1>, vector<8x128xf32>
    %c19_i32 = arith.constant 19 : i32
    %182 = vector.broadcast %c19_i32 : i32 to vector<8x128xi32>
    %183 = arith.cmpi eq, %2, %182 : vector<8x128xi32>
    %c19 = arith.constant 19 : index
    %184 = memref.load %arg1[%c19] : memref<256xf32, #tpu.memory_space<smem>>
    %185 = vector.broadcast %184 : f32 to vector<8x128xf32>
    %186 = arith.select %183, %185, %181 : vector<8x128xi1>, vector<8x128xf32>
    %c20_i32 = arith.constant 20 : i32
    %187 = vector.broadcast %c20_i32 : i32 to vector<8x128xi32>
    %188 = arith.cmpi eq, %2, %187 : vector<8x128xi32>
    %c20 = arith.constant 20 : index
    %189 = memref.load %arg1[%c20] : memref<256xf32, #tpu.memory_space<smem>>
    %190 = vector.broadcast %189 : f32 to vector<8x128xf32>
    %191 = arith.select %188, %190, %186 : vector<8x128xi1>, vector<8x128xf32>
    %c21_i32 = arith.constant 21 : i32
    %192 = vector.broadcast %c21_i32 : i32 to vector<8x128xi32>
    %193 = arith.cmpi eq, %2, %192 : vector<8x128xi32>
    %c21 = arith.constant 21 : index
    %194 = memref.load %arg1[%c21] : memref<256xf32, #tpu.memory_space<smem>>
    %195 = vector.broadcast %194 : f32 to vector<8x128xf32>
    %196 = arith.select %193, %195, %191 : vector<8x128xi1>, vector<8x128xf32>
    %c22_i32 = arith.constant 22 : i32
    %197 = vector.broadcast %c22_i32 : i32 to vector<8x128xi32>
    %198 = arith.cmpi eq, %2, %197 : vector<8x128xi32>
    %c22 = arith.constant 22 : index
    %199 = memref.load %arg1[%c22] : memref<256xf32, #tpu.memory_space<smem>>
    %200 = vector.broadcast %199 : f32 to vector<8x128xf32>
    %201 = arith.select %198, %200, %196 : vector<8x128xi1>, vector<8x128xf32>
    %c23_i32 = arith.constant 23 : i32
    %202 = vector.broadcast %c23_i32 : i32 to vector<8x128xi32>
    %203 = arith.cmpi eq, %2, %202 : vector<8x128xi32>
    %c23 = arith.constant 23 : index
    %204 = memref.load %arg1[%c23] : memref<256xf32, #tpu.memory_space<smem>>
    %205 = vector.broadcast %204 : f32 to vector<8x128xf32>
    %206 = arith.select %203, %205, %201 : vector<8x128xi1>, vector<8x128xf32>
    %c24_i32 = arith.constant 24 : i32
    %207 = vector.broadcast %c24_i32 : i32 to vector<8x128xi32>
    %208 = arith.cmpi eq, %2, %207 : vector<8x128xi32>
    %c24 = arith.constant 24 : index
    %209 = memref.load %arg1[%c24] : memref<256xf32, #tpu.memory_space<smem>>
    %210 = vector.broadcast %209 : f32 to vector<8x128xf32>
    %211 = arith.select %208, %210, %206 : vector<8x128xi1>, vector<8x128xf32>
    %c25_i32 = arith.constant 25 : i32
    %212 = vector.broadcast %c25_i32 : i32 to vector<8x128xi32>
    %213 = arith.cmpi eq, %2, %212 : vector<8x128xi32>
    %c25 = arith.constant 25 : index
    %214 = memref.load %arg1[%c25] : memref<256xf32, #tpu.memory_space<smem>>
    %215 = vector.broadcast %214 : f32 to vector<8x128xf32>
    %216 = arith.select %213, %215, %211 : vector<8x128xi1>, vector<8x128xf32>
    %c26_i32 = arith.constant 26 : i32
    %217 = vector.broadcast %c26_i32 : i32 to vector<8x128xi32>
    %218 = arith.cmpi eq, %2, %217 : vector<8x128xi32>
    %c26 = arith.constant 26 : index
    %219 = memref.load %arg1[%c26] : memref<256xf32, #tpu.memory_space<smem>>
    %220 = vector.broadcast %219 : f32 to vector<8x128xf32>
    %221 = arith.select %218, %220, %216 : vector<8x128xi1>, vector<8x128xf32>
    %c27_i32 = arith.constant 27 : i32
    %222 = vector.broadcast %c27_i32 : i32 to vector<8x128xi32>
    %223 = arith.cmpi eq, %2, %222 : vector<8x128xi32>
    %c27 = arith.constant 27 : index
    %224 = memref.load %arg1[%c27] : memref<256xf32, #tpu.memory_space<smem>>
    %225 = vector.broadcast %224 : f32 to vector<8x128xf32>
    %226 = arith.select %223, %225, %221 : vector<8x128xi1>, vector<8x128xf32>
    %c28_i32 = arith.constant 28 : i32
    %227 = vector.broadcast %c28_i32 : i32 to vector<8x128xi32>
    %228 = arith.cmpi eq, %2, %227 : vector<8x128xi32>
    %c28 = arith.constant 28 : index
    %229 = memref.load %arg1[%c28] : memref<256xf32, #tpu.memory_space<smem>>
    %230 = vector.broadcast %229 : f32 to vector<8x128xf32>
    %231 = arith.select %228, %230, %226 : vector<8x128xi1>, vector<8x128xf32>
    %c29_i32 = arith.constant 29 : i32
    %232 = vector.broadcast %c29_i32 : i32 to vector<8x128xi32>
    %233 = arith.cmpi eq, %2, %232 : vector<8x128xi32>
    %c29 = arith.constant 29 : index
    %234 = memref.load %arg1[%c29] : memref<256xf32, #tpu.memory_space<smem>>
    %235 = vector.broadcast %234 : f32 to vector<8x128xf32>
    %236 = arith.select %233, %235, %231 : vector<8x128xi1>, vector<8x128xf32>
    %c30_i32 = arith.constant 30 : i32
    %237 = vector.broadcast %c30_i32 : i32 to vector<8x128xi32>
    %238 = arith.cmpi eq, %2, %237 : vector<8x128xi32>
    %c30 = arith.constant 30 : index
    %239 = memref.load %arg1[%c30] : memref<256xf32, #tpu.memory_space<smem>>
    %240 = vector.broadcast %239 : f32 to vector<8x128xf32>
    %241 = arith.select %238, %240, %236 : vector<8x128xi1>, vector<8x128xf32>
    %c31_i32 = arith.constant 31 : i32
    %242 = vector.broadcast %c31_i32 : i32 to vector<8x128xi32>
    %243 = arith.cmpi eq, %2, %242 : vector<8x128xi32>
    %c31 = arith.constant 31 : index
    %244 = memref.load %arg1[%c31] : memref<256xf32, #tpu.memory_space<smem>>
    %245 = vector.broadcast %244 : f32 to vector<8x128xf32>
    %246 = arith.select %243, %245, %241 : vector<8x128xi1>, vector<8x128xf32>
    %c32_i32 = arith.constant 32 : i32
    %247 = vector.broadcast %c32_i32 : i32 to vector<8x128xi32>
    %248 = arith.cmpi eq, %2, %247 : vector<8x128xi32>
    %c32 = arith.constant 32 : index
    %249 = memref.load %arg1[%c32] : memref<256xf32, #tpu.memory_space<smem>>
    %250 = vector.broadcast %249 : f32 to vector<8x128xf32>
    %251 = arith.select %248, %250, %246 : vector<8x128xi1>, vector<8x128xf32>
    %c33_i32 = arith.constant 33 : i32
    %252 = vector.broadcast %c33_i32 : i32 to vector<8x128xi32>
    %253 = arith.cmpi eq, %2, %252 : vector<8x128xi32>
    %c33 = arith.constant 33 : index
    %254 = memref.load %arg1[%c33] : memref<256xf32, #tpu.memory_space<smem>>
    %255 = vector.broadcast %254 : f32 to vector<8x128xf32>
    %256 = arith.select %253, %255, %251 : vector<8x128xi1>, vector<8x128xf32>
    %c34_i32 = arith.constant 34 : i32
    %257 = vector.broadcast %c34_i32 : i32 to vector<8x128xi32>
    %258 = arith.cmpi eq, %2, %257 : vector<8x128xi32>
    %c34 = arith.constant 34 : index
    %259 = memref.load %arg1[%c34] : memref<256xf32, #tpu.memory_space<smem>>
    %260 = vector.broadcast %259 : f32 to vector<8x128xf32>
    %261 = arith.select %258, %260, %256 : vector<8x128xi1>, vector<8x128xf32>
    %c35_i32 = arith.constant 35 : i32
    %262 = vector.broadcast %c35_i32 : i32 to vector<8x128xi32>
    %263 = arith.cmpi eq, %2, %262 : vector<8x128xi32>
    %c35 = arith.constant 35 : index
    %264 = memref.load %arg1[%c35] : memref<256xf32, #tpu.memory_space<smem>>
    %265 = vector.broadcast %264 : f32 to vector<8x128xf32>
    %266 = arith.select %263, %265, %261 : vector<8x128xi1>, vector<8x128xf32>
    %c36_i32 = arith.constant 36 : i32
    %267 = vector.broadcast %c36_i32 : i32 to vector<8x128xi32>
    %268 = arith.cmpi eq, %2, %267 : vector<8x128xi32>
    %c36 = arith.constant 36 : index
    %269 = memref.load %arg1[%c36] : memref<256xf32, #tpu.memory_space<smem>>
    %270 = vector.broadcast %269 : f32 to vector<8x128xf32>
    %271 = arith.select %268, %270, %266 : vector<8x128xi1>, vector<8x128xf32>
    %c37_i32 = arith.constant 37 : i32
    %272 = vector.broadcast %c37_i32 : i32 to vector<8x128xi32>
    %273 = arith.cmpi eq, %2, %272 : vector<8x128xi32>
    %c37 = arith.constant 37 : index
    %274 = memref.load %arg1[%c37] : memref<256xf32, #tpu.memory_space<smem>>
    %275 = vector.broadcast %274 : f32 to vector<8x128xf32>
    %276 = arith.select %273, %275, %271 : vector<8x128xi1>, vector<8x128xf32>
    %c38_i32 = arith.constant 38 : i32
    %277 = vector.broadcast %c38_i32 : i32 to vector<8x128xi32>
    %278 = arith.cmpi eq, %2, %277 : vector<8x128xi32>
    %c38 = arith.constant 38 : index
    %279 = memref.load %arg1[%c38] : memref<256xf32, #tpu.memory_space<smem>>
    %280 = vector.broadcast %279 : f32 to vector<8x128xf32>
    %281 = arith.select %278, %280, %276 : vector<8x128xi1>, vector<8x128xf32>
    %c39_i32 = arith.constant 39 : i32
    %282 = vector.broadcast %c39_i32 : i32 to vector<8x128xi32>
    %283 = arith.cmpi eq, %2, %282 : vector<8x128xi32>
    %c39 = arith.constant 39 : index
    %284 = memref.load %arg1[%c39] : memref<256xf32, #tpu.memory_space<smem>>
    %285 = vector.broadcast %284 : f32 to vector<8x128xf32>
    %286 = arith.select %283, %285, %281 : vector<8x128xi1>, vector<8x128xf32>
    %c40_i32 = arith.constant 40 : i32
    %287 = vector.broadcast %c40_i32 : i32 to vector<8x128xi32>
    %288 = arith.cmpi eq, %2, %287 : vector<8x128xi32>
    %c40 = arith.constant 40 : index
    %289 = memref.load %arg1[%c40] : memref<256xf32, #tpu.memory_space<smem>>
    %290 = vector.broadcast %289 : f32 to vector<8x128xf32>
    %291 = arith.select %288, %290, %286 : vector<8x128xi1>, vector<8x128xf32>
    %c41_i32 = arith.constant 41 : i32
    %292 = vector.broadcast %c41_i32 : i32 to vector<8x128xi32>
    %293 = arith.cmpi eq, %2, %292 : vector<8x128xi32>
    %c41 = arith.constant 41 : index
    %294 = memref.load %arg1[%c41] : memref<256xf32, #tpu.memory_space<smem>>
    %295 = vector.broadcast %294 : f32 to vector<8x128xf32>
    %296 = arith.select %293, %295, %291 : vector<8x128xi1>, vector<8x128xf32>
    %c42_i32 = arith.constant 42 : i32
    %297 = vector.broadcast %c42_i32 : i32 to vector<8x128xi32>
    %298 = arith.cmpi eq, %2, %297 : vector<8x128xi32>
    %c42 = arith.constant 42 : index
    %299 = memref.load %arg1[%c42] : memref<256xf32, #tpu.memory_space<smem>>
    %300 = vector.broadcast %299 : f32 to vector<8x128xf32>
    %301 = arith.select %298, %300, %296 : vector<8x128xi1>, vector<8x128xf32>
    %c43_i32 = arith.constant 43 : i32
    %302 = vector.broadcast %c43_i32 : i32 to vector<8x128xi32>
    %303 = arith.cmpi eq, %2, %302 : vector<8x128xi32>
    %c43 = arith.constant 43 : index
    %304 = memref.load %arg1[%c43] : memref<256xf32, #tpu.memory_space<smem>>
    %305 = vector.broadcast %304 : f32 to vector<8x128xf32>
    %306 = arith.select %303, %305, %301 : vector<8x128xi1>, vector<8x128xf32>
    %c44_i32 = arith.constant 44 : i32
    %307 = vector.broadcast %c44_i32 : i32 to vector<8x128xi32>
    %308 = arith.cmpi eq, %2, %307 : vector<8x128xi32>
    %c44 = arith.constant 44 : index
    %309 = memref.load %arg1[%c44] : memref<256xf32, #tpu.memory_space<smem>>
    %310 = vector.broadcast %309 : f32 to vector<8x128xf32>
    %311 = arith.select %308, %310, %306 : vector<8x128xi1>, vector<8x128xf32>
    %c45_i32 = arith.constant 45 : i32
    %312 = vector.broadcast %c45_i32 : i32 to vector<8x128xi32>
    %313 = arith.cmpi eq, %2, %312 : vector<8x128xi32>
    %c45 = arith.constant 45 : index
    %314 = memref.load %arg1[%c45] : memref<256xf32, #tpu.memory_space<smem>>
    %315 = vector.broadcast %314 : f32 to vector<8x128xf32>
    %316 = arith.select %313, %315, %311 : vector<8x128xi1>, vector<8x128xf32>
    %c46_i32 = arith.constant 46 : i32
    %317 = vector.broadcast %c46_i32 : i32 to vector<8x128xi32>
    %318 = arith.cmpi eq, %2, %317 : vector<8x128xi32>
    %c46 = arith.constant 46 : index
    %319 = memref.load %arg1[%c46] : memref<256xf32, #tpu.memory_space<smem>>
    %320 = vector.broadcast %319 : f32 to vector<8x128xf32>
    %321 = arith.select %318, %320, %316 : vector<8x128xi1>, vector<8x128xf32>
    %c47_i32 = arith.constant 47 : i32
    %322 = vector.broadcast %c47_i32 : i32 to vector<8x128xi32>
    %323 = arith.cmpi eq, %2, %322 : vector<8x128xi32>
    %c47 = arith.constant 47 : index
    %324 = memref.load %arg1[%c47] : memref<256xf32, #tpu.memory_space<smem>>
    %325 = vector.broadcast %324 : f32 to vector<8x128xf32>
    %326 = arith.select %323, %325, %321 : vector<8x128xi1>, vector<8x128xf32>
    %c48_i32 = arith.constant 48 : i32
    %327 = vector.broadcast %c48_i32 : i32 to vector<8x128xi32>
    %328 = arith.cmpi eq, %2, %327 : vector<8x128xi32>
    %c48 = arith.constant 48 : index
    %329 = memref.load %arg1[%c48] : memref<256xf32, #tpu.memory_space<smem>>
    %330 = vector.broadcast %329 : f32 to vector<8x128xf32>
    %331 = arith.select %328, %330, %326 : vector<8x128xi1>, vector<8x128xf32>
    %c49_i32 = arith.constant 49 : i32
    %332 = vector.broadcast %c49_i32 : i32 to vector<8x128xi32>
    %333 = arith.cmpi eq, %2, %332 : vector<8x128xi32>
    %c49 = arith.constant 49 : index
    %334 = memref.load %arg1[%c49] : memref<256xf32, #tpu.memory_space<smem>>
    %335 = vector.broadcast %334 : f32 to vector<8x128xf32>
    %336 = arith.select %333, %335, %331 : vector<8x128xi1>, vector<8x128xf32>
    %c50_i32 = arith.constant 50 : i32
    %337 = vector.broadcast %c50_i32 : i32 to vector<8x128xi32>
    %338 = arith.cmpi eq, %2, %337 : vector<8x128xi32>
    %c50 = arith.constant 50 : index
    %339 = memref.load %arg1[%c50] : memref<256xf32, #tpu.memory_space<smem>>
    %340 = vector.broadcast %339 : f32 to vector<8x128xf32>
    %341 = arith.select %338, %340, %336 : vector<8x128xi1>, vector<8x128xf32>
    %c51_i32 = arith.constant 51 : i32
    %342 = vector.broadcast %c51_i32 : i32 to vector<8x128xi32>
    %343 = arith.cmpi eq, %2, %342 : vector<8x128xi32>
    %c51 = arith.constant 51 : index
    %344 = memref.load %arg1[%c51] : memref<256xf32, #tpu.memory_space<smem>>
    %345 = vector.broadcast %344 : f32 to vector<8x128xf32>
    %346 = arith.select %343, %345, %341 : vector<8x128xi1>, vector<8x128xf32>
    %c52_i32 = arith.constant 52 : i32
    %347 = vector.broadcast %c52_i32 : i32 to vector<8x128xi32>
    %348 = arith.cmpi eq, %2, %347 : vector<8x128xi32>
    %c52 = arith.constant 52 : index
    %349 = memref.load %arg1[%c52] : memref<256xf32, #tpu.memory_space<smem>>
    %350 = vector.broadcast %349 : f32 to vector<8x128xf32>
    %351 = arith.select %348, %350, %346 : vector<8x128xi1>, vector<8x128xf32>
    %c53_i32 = arith.constant 53 : i32
    %352 = vector.broadcast %c53_i32 : i32 to vector<8x128xi32>
    %353 = arith.cmpi eq, %2, %352 : vector<8x128xi32>
    %c53 = arith.constant 53 : index
    %354 = memref.load %arg1[%c53] : memref<256xf32, #tpu.memory_space<smem>>
    %355 = vector.broadcast %354 : f32 to vector<8x128xf32>
    %356 = arith.select %353, %355, %351 : vector<8x128xi1>, vector<8x128xf32>
    %c54_i32 = arith.constant 54 : i32
    %357 = vector.broadcast %c54_i32 : i32 to vector<8x128xi32>
    %358 = arith.cmpi eq, %2, %357 : vector<8x128xi32>
    %c54 = arith.constant 54 : index
    %359 = memref.load %arg1[%c54] : memref<256xf32, #tpu.memory_space<smem>>
    %360 = vector.broadcast %359 : f32 to vector<8x128xf32>
    %361 = arith.select %358, %360, %356 : vector<8x128xi1>, vector<8x128xf32>
    %c55_i32 = arith.constant 55 : i32
    %362 = vector.broadcast %c55_i32 : i32 to vector<8x128xi32>
    %363 = arith.cmpi eq, %2, %362 : vector<8x128xi32>
    %c55 = arith.constant 55 : index
    %364 = memref.load %arg1[%c55] : memref<256xf32, #tpu.memory_space<smem>>
    %365 = vector.broadcast %364 : f32 to vector<8x128xf32>
    %366 = arith.select %363, %365, %361 : vector<8x128xi1>, vector<8x128xf32>
    %c56_i32 = arith.constant 56 : i32
    %367 = vector.broadcast %c56_i32 : i32 to vector<8x128xi32>
    %368 = arith.cmpi eq, %2, %367 : vector<8x128xi32>
    %c56 = arith.constant 56 : index
    %369 = memref.load %arg1[%c56] : memref<256xf32, #tpu.memory_space<smem>>
    %370 = vector.broadcast %369 : f32 to vector<8x128xf32>
    %371 = arith.select %368, %370, %366 : vector<8x128xi1>, vector<8x128xf32>
    %c57_i32 = arith.constant 57 : i32
    %372 = vector.broadcast %c57_i32 : i32 to vector<8x128xi32>
    %373 = arith.cmpi eq, %2, %372 : vector<8x128xi32>
    %c57 = arith.constant 57 : index
    %374 = memref.load %arg1[%c57] : memref<256xf32, #tpu.memory_space<smem>>
    %375 = vector.broadcast %374 : f32 to vector<8x128xf32>
    %376 = arith.select %373, %375, %371 : vector<8x128xi1>, vector<8x128xf32>
    %c58_i32 = arith.constant 58 : i32
    %377 = vector.broadcast %c58_i32 : i32 to vector<8x128xi32>
    %378 = arith.cmpi eq, %2, %377 : vector<8x128xi32>
    %c58 = arith.constant 58 : index
    %379 = memref.load %arg1[%c58] : memref<256xf32, #tpu.memory_space<smem>>
    %380 = vector.broadcast %379 : f32 to vector<8x128xf32>
    %381 = arith.select %378, %380, %376 : vector<8x128xi1>, vector<8x128xf32>
    %c59_i32 = arith.constant 59 : i32
    %382 = vector.broadcast %c59_i32 : i32 to vector<8x128xi32>
    %383 = arith.cmpi eq, %2, %382 : vector<8x128xi32>
    %c59 = arith.constant 59 : index
    %384 = memref.load %arg1[%c59] : memref<256xf32, #tpu.memory_space<smem>>
    %385 = vector.broadcast %384 : f32 to vector<8x128xf32>
    %386 = arith.select %383, %385, %381 : vector<8x128xi1>, vector<8x128xf32>
    %c60_i32 = arith.constant 60 : i32
    %387 = vector.broadcast %c60_i32 : i32 to vector<8x128xi32>
    %388 = arith.cmpi eq, %2, %387 : vector<8x128xi32>
    %c60 = arith.constant 60 : index
    %389 = memref.load %arg1[%c60] : memref<256xf32, #tpu.memory_space<smem>>
    %390 = vector.broadcast %389 : f32 to vector<8x128xf32>
    %391 = arith.select %388, %390, %386 : vector<8x128xi1>, vector<8x128xf32>
    %c61_i32 = arith.constant 61 : i32
    %392 = vector.broadcast %c61_i32 : i32 to vector<8x128xi32>
    %393 = arith.cmpi eq, %2, %392 : vector<8x128xi32>
    %c61 = arith.constant 61 : index
    %394 = memref.load %arg1[%c61] : memref<256xf32, #tpu.memory_space<smem>>
    %395 = vector.broadcast %394 : f32 to vector<8x128xf32>
    %396 = arith.select %393, %395, %391 : vector<8x128xi1>, vector<8x128xf32>
    %c62_i32 = arith.constant 62 : i32
    %397 = vector.broadcast %c62_i32 : i32 to vector<8x128xi32>
    %398 = arith.cmpi eq, %2, %397 : vector<8x128xi32>
    %c62 = arith.constant 62 : index
    %399 = memref.load %arg1[%c62] : memref<256xf32, #tpu.memory_space<smem>>
    %400 = vector.broadcast %399 : f32 to vector<8x128xf32>
    %401 = arith.select %398, %400, %396 : vector<8x128xi1>, vector<8x128xf32>
    %c63_i32 = arith.constant 63 : i32
    %402 = vector.broadcast %c63_i32 : i32 to vector<8x128xi32>
    %403 = arith.cmpi eq, %2, %402 : vector<8x128xi32>
    %c63 = arith.constant 63 : index
    %404 = memref.load %arg1[%c63] : memref<256xf32, #tpu.memory_space<smem>>
    %405 = vector.broadcast %404 : f32 to vector<8x128xf32>
    %406 = arith.select %403, %405, %401 : vector<8x128xi1>, vector<8x128xf32>
    %c64_i32 = arith.constant 64 : i32
    %407 = vector.broadcast %c64_i32 : i32 to vector<8x128xi32>
    %408 = arith.cmpi eq, %2, %407 : vector<8x128xi32>
    %c64 = arith.constant 64 : index
    %409 = memref.load %arg1[%c64] : memref<256xf32, #tpu.memory_space<smem>>
    %410 = vector.broadcast %409 : f32 to vector<8x128xf32>
    %411 = arith.select %408, %410, %406 : vector<8x128xi1>, vector<8x128xf32>
    %c65_i32 = arith.constant 65 : i32
    %412 = vector.broadcast %c65_i32 : i32 to vector<8x128xi32>
    %413 = arith.cmpi eq, %2, %412 : vector<8x128xi32>
    %c65 = arith.constant 65 : index
    %414 = memref.load %arg1[%c65] : memref<256xf32, #tpu.memory_space<smem>>
    %415 = vector.broadcast %414 : f32 to vector<8x128xf32>
    %416 = arith.select %413, %415, %411 : vector<8x128xi1>, vector<8x128xf32>
    %c66_i32 = arith.constant 66 : i32
    %417 = vector.broadcast %c66_i32 : i32 to vector<8x128xi32>
    %418 = arith.cmpi eq, %2, %417 : vector<8x128xi32>
    %c66 = arith.constant 66 : index
    %419 = memref.load %arg1[%c66] : memref<256xf32, #tpu.memory_space<smem>>
    %420 = vector.broadcast %419 : f32 to vector<8x128xf32>
    %421 = arith.select %418, %420, %416 : vector<8x128xi1>, vector<8x128xf32>
    %c67_i32 = arith.constant 67 : i32
    %422 = vector.broadcast %c67_i32 : i32 to vector<8x128xi32>
    %423 = arith.cmpi eq, %2, %422 : vector<8x128xi32>
    %c67 = arith.constant 67 : index
    %424 = memref.load %arg1[%c67] : memref<256xf32, #tpu.memory_space<smem>>
    %425 = vector.broadcast %424 : f32 to vector<8x128xf32>
    %426 = arith.select %423, %425, %421 : vector<8x128xi1>, vector<8x128xf32>
    %c68_i32 = arith.constant 68 : i32
    %427 = vector.broadcast %c68_i32 : i32 to vector<8x128xi32>
    %428 = arith.cmpi eq, %2, %427 : vector<8x128xi32>
    %c68 = arith.constant 68 : index
    %429 = memref.load %arg1[%c68] : memref<256xf32, #tpu.memory_space<smem>>
    %430 = vector.broadcast %429 : f32 to vector<8x128xf32>
    %431 = arith.select %428, %430, %426 : vector<8x128xi1>, vector<8x128xf32>
    %c69_i32 = arith.constant 69 : i32
    %432 = vector.broadcast %c69_i32 : i32 to vector<8x128xi32>
    %433 = arith.cmpi eq, %2, %432 : vector<8x128xi32>
    %c69 = arith.constant 69 : index
    %434 = memref.load %arg1[%c69] : memref<256xf32, #tpu.memory_space<smem>>
    %435 = vector.broadcast %434 : f32 to vector<8x128xf32>
    %436 = arith.select %433, %435, %431 : vector<8x128xi1>, vector<8x128xf32>
    %c70_i32 = arith.constant 70 : i32
    %437 = vector.broadcast %c70_i32 : i32 to vector<8x128xi32>
    %438 = arith.cmpi eq, %2, %437 : vector<8x128xi32>
    %c70 = arith.constant 70 : index
    %439 = memref.load %arg1[%c70] : memref<256xf32, #tpu.memory_space<smem>>
    %440 = vector.broadcast %439 : f32 to vector<8x128xf32>
    %441 = arith.select %438, %440, %436 : vector<8x128xi1>, vector<8x128xf32>
    %c71_i32 = arith.constant 71 : i32
    %442 = vector.broadcast %c71_i32 : i32 to vector<8x128xi32>
    %443 = arith.cmpi eq, %2, %442 : vector<8x128xi32>
    %c71 = arith.constant 71 : index
    %444 = memref.load %arg1[%c71] : memref<256xf32, #tpu.memory_space<smem>>
    %445 = vector.broadcast %444 : f32 to vector<8x128xf32>
    %446 = arith.select %443, %445, %441 : vector<8x128xi1>, vector<8x128xf32>
    %c72_i32 = arith.constant 72 : i32
    %447 = vector.broadcast %c72_i32 : i32 to vector<8x128xi32>
    %448 = arith.cmpi eq, %2, %447 : vector<8x128xi32>
    %c72 = arith.constant 72 : index
    %449 = memref.load %arg1[%c72] : memref<256xf32, #tpu.memory_space<smem>>
    %450 = vector.broadcast %449 : f32 to vector<8x128xf32>
    %451 = arith.select %448, %450, %446 : vector<8x128xi1>, vector<8x128xf32>
    %c73_i32 = arith.constant 73 : i32
    %452 = vector.broadcast %c73_i32 : i32 to vector<8x128xi32>
    %453 = arith.cmpi eq, %2, %452 : vector<8x128xi32>
    %c73 = arith.constant 73 : index
    %454 = memref.load %arg1[%c73] : memref<256xf32, #tpu.memory_space<smem>>
    %455 = vector.broadcast %454 : f32 to vector<8x128xf32>
    %456 = arith.select %453, %455, %451 : vector<8x128xi1>, vector<8x128xf32>
    %c74_i32 = arith.constant 74 : i32
    %457 = vector.broadcast %c74_i32 : i32 to vector<8x128xi32>
    %458 = arith.cmpi eq, %2, %457 : vector<8x128xi32>
    %c74 = arith.constant 74 : index
    %459 = memref.load %arg1[%c74] : memref<256xf32, #tpu.memory_space<smem>>
    %460 = vector.broadcast %459 : f32 to vector<8x128xf32>
    %461 = arith.select %458, %460, %456 : vector<8x128xi1>, vector<8x128xf32>
    %c75_i32 = arith.constant 75 : i32
    %462 = vector.broadcast %c75_i32 : i32 to vector<8x128xi32>
    %463 = arith.cmpi eq, %2, %462 : vector<8x128xi32>
    %c75 = arith.constant 75 : index
    %464 = memref.load %arg1[%c75] : memref<256xf32, #tpu.memory_space<smem>>
    %465 = vector.broadcast %464 : f32 to vector<8x128xf32>
    %466 = arith.select %463, %465, %461 : vector<8x128xi1>, vector<8x128xf32>
    %c76_i32 = arith.constant 76 : i32
    %467 = vector.broadcast %c76_i32 : i32 to vector<8x128xi32>
    %468 = arith.cmpi eq, %2, %467 : vector<8x128xi32>
    %c76 = arith.constant 76 : index
    %469 = memref.load %arg1[%c76] : memref<256xf32, #tpu.memory_space<smem>>
    %470 = vector.broadcast %469 : f32 to vector<8x128xf32>
    %471 = arith.select %468, %470, %466 : vector<8x128xi1>, vector<8x128xf32>
    %c77_i32 = arith.constant 77 : i32
    %472 = vector.broadcast %c77_i32 : i32 to vector<8x128xi32>
    %473 = arith.cmpi eq, %2, %472 : vector<8x128xi32>
    %c77 = arith.constant 77 : index
    %474 = memref.load %arg1[%c77] : memref<256xf32, #tpu.memory_space<smem>>
    %475 = vector.broadcast %474 : f32 to vector<8x128xf32>
    %476 = arith.select %473, %475, %471 : vector<8x128xi1>, vector<8x128xf32>
    %c78_i32 = arith.constant 78 : i32
    %477 = vector.broadcast %c78_i32 : i32 to vector<8x128xi32>
    %478 = arith.cmpi eq, %2, %477 : vector<8x128xi32>
    %c78 = arith.constant 78 : index
    %479 = memref.load %arg1[%c78] : memref<256xf32, #tpu.memory_space<smem>>
    %480 = vector.broadcast %479 : f32 to vector<8x128xf32>
    %481 = arith.select %478, %480, %476 : vector<8x128xi1>, vector<8x128xf32>
    %c79_i32 = arith.constant 79 : i32
    %482 = vector.broadcast %c79_i32 : i32 to vector<8x128xi32>
    %483 = arith.cmpi eq, %2, %482 : vector<8x128xi32>
    %c79 = arith.constant 79 : index
    %484 = memref.load %arg1[%c79] : memref<256xf32, #tpu.memory_space<smem>>
    %485 = vector.broadcast %484 : f32 to vector<8x128xf32>
    %486 = arith.select %483, %485, %481 : vector<8x128xi1>, vector<8x128xf32>
    %c80_i32 = arith.constant 80 : i32
    %487 = vector.broadcast %c80_i32 : i32 to vector<8x128xi32>
    %488 = arith.cmpi eq, %2, %487 : vector<8x128xi32>
    %c80 = arith.constant 80 : index
    %489 = memref.load %arg1[%c80] : memref<256xf32, #tpu.memory_space<smem>>
    %490 = vector.broadcast %489 : f32 to vector<8x128xf32>
    %491 = arith.select %488, %490, %486 : vector<8x128xi1>, vector<8x128xf32>
    %c81_i32 = arith.constant 81 : i32
    %492 = vector.broadcast %c81_i32 : i32 to vector<8x128xi32>
    %493 = arith.cmpi eq, %2, %492 : vector<8x128xi32>
    %c81 = arith.constant 81 : index
    %494 = memref.load %arg1[%c81] : memref<256xf32, #tpu.memory_space<smem>>
    %495 = vector.broadcast %494 : f32 to vector<8x128xf32>
    %496 = arith.select %493, %495, %491 : vector<8x128xi1>, vector<8x128xf32>
    %c82_i32 = arith.constant 82 : i32
    %497 = vector.broadcast %c82_i32 : i32 to vector<8x128xi32>
    %498 = arith.cmpi eq, %2, %497 : vector<8x128xi32>
    %c82 = arith.constant 82 : index
    %499 = memref.load %arg1[%c82] : memref<256xf32, #tpu.memory_space<smem>>
    %500 = vector.broadcast %499 : f32 to vector<8x128xf32>
    %501 = arith.select %498, %500, %496 : vector<8x128xi1>, vector<8x128xf32>
    %c83_i32 = arith.constant 83 : i32
    %502 = vector.broadcast %c83_i32 : i32 to vector<8x128xi32>
    %503 = arith.cmpi eq, %2, %502 : vector<8x128xi32>
    %c83 = arith.constant 83 : index
    %504 = memref.load %arg1[%c83] : memref<256xf32, #tpu.memory_space<smem>>
    %505 = vector.broadcast %504 : f32 to vector<8x128xf32>
    %506 = arith.select %503, %505, %501 : vector<8x128xi1>, vector<8x128xf32>
    %c84_i32 = arith.constant 84 : i32
    %507 = vector.broadcast %c84_i32 : i32 to vector<8x128xi32>
    %508 = arith.cmpi eq, %2, %507 : vector<8x128xi32>
    %c84 = arith.constant 84 : index
    %509 = memref.load %arg1[%c84] : memref<256xf32, #tpu.memory_space<smem>>
    %510 = vector.broadcast %509 : f32 to vector<8x128xf32>
    %511 = arith.select %508, %510, %506 : vector<8x128xi1>, vector<8x128xf32>
    %c85_i32 = arith.constant 85 : i32
    %512 = vector.broadcast %c85_i32 : i32 to vector<8x128xi32>
    %513 = arith.cmpi eq, %2, %512 : vector<8x128xi32>
    %c85 = arith.constant 85 : index
    %514 = memref.load %arg1[%c85] : memref<256xf32, #tpu.memory_space<smem>>
    %515 = vector.broadcast %514 : f32 to vector<8x128xf32>
    %516 = arith.select %513, %515, %511 : vector<8x128xi1>, vector<8x128xf32>
    %c86_i32 = arith.constant 86 : i32
    %517 = vector.broadcast %c86_i32 : i32 to vector<8x128xi32>
    %518 = arith.cmpi eq, %2, %517 : vector<8x128xi32>
    %c86 = arith.constant 86 : index
    %519 = memref.load %arg1[%c86] : memref<256xf32, #tpu.memory_space<smem>>
    %520 = vector.broadcast %519 : f32 to vector<8x128xf32>
    %521 = arith.select %518, %520, %516 : vector<8x128xi1>, vector<8x128xf32>
    %c87_i32 = arith.constant 87 : i32
    %522 = vector.broadcast %c87_i32 : i32 to vector<8x128xi32>
    %523 = arith.cmpi eq, %2, %522 : vector<8x128xi32>
    %c87 = arith.constant 87 : index
    %524 = memref.load %arg1[%c87] : memref<256xf32, #tpu.memory_space<smem>>
    %525 = vector.broadcast %524 : f32 to vector<8x128xf32>
    %526 = arith.select %523, %525, %521 : vector<8x128xi1>, vector<8x128xf32>
    %c88_i32 = arith.constant 88 : i32
    %527 = vector.broadcast %c88_i32 : i32 to vector<8x128xi32>
    %528 = arith.cmpi eq, %2, %527 : vector<8x128xi32>
    %c88 = arith.constant 88 : index
    %529 = memref.load %arg1[%c88] : memref<256xf32, #tpu.memory_space<smem>>
    %530 = vector.broadcast %529 : f32 to vector<8x128xf32>
    %531 = arith.select %528, %530, %526 : vector<8x128xi1>, vector<8x128xf32>
    %c89_i32 = arith.constant 89 : i32
    %532 = vector.broadcast %c89_i32 : i32 to vector<8x128xi32>
    %533 = arith.cmpi eq, %2, %532 : vector<8x128xi32>
    %c89 = arith.constant 89 : index
    %534 = memref.load %arg1[%c89] : memref<256xf32, #tpu.memory_space<smem>>
    %535 = vector.broadcast %534 : f32 to vector<8x128xf32>
    %536 = arith.select %533, %535, %531 : vector<8x128xi1>, vector<8x128xf32>
    %c90_i32 = arith.constant 90 : i32
    %537 = vector.broadcast %c90_i32 : i32 to vector<8x128xi32>
    %538 = arith.cmpi eq, %2, %537 : vector<8x128xi32>
    %c90 = arith.constant 90 : index
    %539 = memref.load %arg1[%c90] : memref<256xf32, #tpu.memory_space<smem>>
    %540 = vector.broadcast %539 : f32 to vector<8x128xf32>
    %541 = arith.select %538, %540, %536 : vector<8x128xi1>, vector<8x128xf32>
    %c91_i32 = arith.constant 91 : i32
    %542 = vector.broadcast %c91_i32 : i32 to vector<8x128xi32>
    %543 = arith.cmpi eq, %2, %542 : vector<8x128xi32>
    %c91 = arith.constant 91 : index
    %544 = memref.load %arg1[%c91] : memref<256xf32, #tpu.memory_space<smem>>
    %545 = vector.broadcast %544 : f32 to vector<8x128xf32>
    %546 = arith.select %543, %545, %541 : vector<8x128xi1>, vector<8x128xf32>
    %c92_i32 = arith.constant 92 : i32
    %547 = vector.broadcast %c92_i32 : i32 to vector<8x128xi32>
    %548 = arith.cmpi eq, %2, %547 : vector<8x128xi32>
    %c92 = arith.constant 92 : index
    %549 = memref.load %arg1[%c92] : memref<256xf32, #tpu.memory_space<smem>>
    %550 = vector.broadcast %549 : f32 to vector<8x128xf32>
    %551 = arith.select %548, %550, %546 : vector<8x128xi1>, vector<8x128xf32>
    %c93_i32 = arith.constant 93 : i32
    %552 = vector.broadcast %c93_i32 : i32 to vector<8x128xi32>
    %553 = arith.cmpi eq, %2, %552 : vector<8x128xi32>
    %c93 = arith.constant 93 : index
    %554 = memref.load %arg1[%c93] : memref<256xf32, #tpu.memory_space<smem>>
    %555 = vector.broadcast %554 : f32 to vector<8x128xf32>
    %556 = arith.select %553, %555, %551 : vector<8x128xi1>, vector<8x128xf32>
    %c94_i32 = arith.constant 94 : i32
    %557 = vector.broadcast %c94_i32 : i32 to vector<8x128xi32>
    %558 = arith.cmpi eq, %2, %557 : vector<8x128xi32>
    %c94 = arith.constant 94 : index
    %559 = memref.load %arg1[%c94] : memref<256xf32, #tpu.memory_space<smem>>
    %560 = vector.broadcast %559 : f32 to vector<8x128xf32>
    %561 = arith.select %558, %560, %556 : vector<8x128xi1>, vector<8x128xf32>
    %c95_i32 = arith.constant 95 : i32
    %562 = vector.broadcast %c95_i32 : i32 to vector<8x128xi32>
    %563 = arith.cmpi eq, %2, %562 : vector<8x128xi32>
    %c95 = arith.constant 95 : index
    %564 = memref.load %arg1[%c95] : memref<256xf32, #tpu.memory_space<smem>>
    %565 = vector.broadcast %564 : f32 to vector<8x128xf32>
    %566 = arith.select %563, %565, %561 : vector<8x128xi1>, vector<8x128xf32>
    %c96_i32 = arith.constant 96 : i32
    %567 = vector.broadcast %c96_i32 : i32 to vector<8x128xi32>
    %568 = arith.cmpi eq, %2, %567 : vector<8x128xi32>
    %c96 = arith.constant 96 : index
    %569 = memref.load %arg1[%c96] : memref<256xf32, #tpu.memory_space<smem>>
    %570 = vector.broadcast %569 : f32 to vector<8x128xf32>
    %571 = arith.select %568, %570, %566 : vector<8x128xi1>, vector<8x128xf32>
    %c97_i32 = arith.constant 97 : i32
    %572 = vector.broadcast %c97_i32 : i32 to vector<8x128xi32>
    %573 = arith.cmpi eq, %2, %572 : vector<8x128xi32>
    %c97 = arith.constant 97 : index
    %574 = memref.load %arg1[%c97] : memref<256xf32, #tpu.memory_space<smem>>
    %575 = vector.broadcast %574 : f32 to vector<8x128xf32>
    %576 = arith.select %573, %575, %571 : vector<8x128xi1>, vector<8x128xf32>
    %c98_i32 = arith.constant 98 : i32
    %577 = vector.broadcast %c98_i32 : i32 to vector<8x128xi32>
    %578 = arith.cmpi eq, %2, %577 : vector<8x128xi32>
    %c98 = arith.constant 98 : index
    %579 = memref.load %arg1[%c98] : memref<256xf32, #tpu.memory_space<smem>>
    %580 = vector.broadcast %579 : f32 to vector<8x128xf32>
    %581 = arith.select %578, %580, %576 : vector<8x128xi1>, vector<8x128xf32>
    %c99_i32 = arith.constant 99 : i32
    %582 = vector.broadcast %c99_i32 : i32 to vector<8x128xi32>
    %583 = arith.cmpi eq, %2, %582 : vector<8x128xi32>
    %c99 = arith.constant 99 : index
    %584 = memref.load %arg1[%c99] : memref<256xf32, #tpu.memory_space<smem>>
    %585 = vector.broadcast %584 : f32 to vector<8x128xf32>
    %586 = arith.select %583, %585, %581 : vector<8x128xi1>, vector<8x128xf32>
    %c100_i32 = arith.constant 100 : i32
    %587 = vector.broadcast %c100_i32 : i32 to vector<8x128xi32>
    %588 = arith.cmpi eq, %2, %587 : vector<8x128xi32>
    %c100 = arith.constant 100 : index
    %589 = memref.load %arg1[%c100] : memref<256xf32, #tpu.memory_space<smem>>
    %590 = vector.broadcast %589 : f32 to vector<8x128xf32>
    %591 = arith.select %588, %590, %586 : vector<8x128xi1>, vector<8x128xf32>
    %c101_i32 = arith.constant 101 : i32
    %592 = vector.broadcast %c101_i32 : i32 to vector<8x128xi32>
    %593 = arith.cmpi eq, %2, %592 : vector<8x128xi32>
    %c101 = arith.constant 101 : index
    %594 = memref.load %arg1[%c101] : memref<256xf32, #tpu.memory_space<smem>>
    %595 = vector.broadcast %594 : f32 to vector<8x128xf32>
    %596 = arith.select %593, %595, %591 : vector<8x128xi1>, vector<8x128xf32>
    %c102_i32 = arith.constant 102 : i32
    %597 = vector.broadcast %c102_i32 : i32 to vector<8x128xi32>
    %598 = arith.cmpi eq, %2, %597 : vector<8x128xi32>
    %c102 = arith.constant 102 : index
    %599 = memref.load %arg1[%c102] : memref<256xf32, #tpu.memory_space<smem>>
    %600 = vector.broadcast %599 : f32 to vector<8x128xf32>
    %601 = arith.select %598, %600, %596 : vector<8x128xi1>, vector<8x128xf32>
    %c103_i32 = arith.constant 103 : i32
    %602 = vector.broadcast %c103_i32 : i32 to vector<8x128xi32>
    %603 = arith.cmpi eq, %2, %602 : vector<8x128xi32>
    %c103 = arith.constant 103 : index
    %604 = memref.load %arg1[%c103] : memref<256xf32, #tpu.memory_space<smem>>
    %605 = vector.broadcast %604 : f32 to vector<8x128xf32>
    %606 = arith.select %603, %605, %601 : vector<8x128xi1>, vector<8x128xf32>
    %c104_i32 = arith.constant 104 : i32
    %607 = vector.broadcast %c104_i32 : i32 to vector<8x128xi32>
    %608 = arith.cmpi eq, %2, %607 : vector<8x128xi32>
    %c104 = arith.constant 104 : index
    %609 = memref.load %arg1[%c104] : memref<256xf32, #tpu.memory_space<smem>>
    %610 = vector.broadcast %609 : f32 to vector<8x128xf32>
    %611 = arith.select %608, %610, %606 : vector<8x128xi1>, vector<8x128xf32>
    %c105_i32 = arith.constant 105 : i32
    %612 = vector.broadcast %c105_i32 : i32 to vector<8x128xi32>
    %613 = arith.cmpi eq, %2, %612 : vector<8x128xi32>
    %c105 = arith.constant 105 : index
    %614 = memref.load %arg1[%c105] : memref<256xf32, #tpu.memory_space<smem>>
    %615 = vector.broadcast %614 : f32 to vector<8x128xf32>
    %616 = arith.select %613, %615, %611 : vector<8x128xi1>, vector<8x128xf32>
    %c106_i32 = arith.constant 106 : i32
    %617 = vector.broadcast %c106_i32 : i32 to vector<8x128xi32>
    %618 = arith.cmpi eq, %2, %617 : vector<8x128xi32>
    %c106 = arith.constant 106 : index
    %619 = memref.load %arg1[%c106] : memref<256xf32, #tpu.memory_space<smem>>
    %620 = vector.broadcast %619 : f32 to vector<8x128xf32>
    %621 = arith.select %618, %620, %616 : vector<8x128xi1>, vector<8x128xf32>
    %c107_i32 = arith.constant 107 : i32
    %622 = vector.broadcast %c107_i32 : i32 to vector<8x128xi32>
    %623 = arith.cmpi eq, %2, %622 : vector<8x128xi32>
    %c107 = arith.constant 107 : index
    %624 = memref.load %arg1[%c107] : memref<256xf32, #tpu.memory_space<smem>>
    %625 = vector.broadcast %624 : f32 to vector<8x128xf32>
    %626 = arith.select %623, %625, %621 : vector<8x128xi1>, vector<8x128xf32>
    %c108_i32 = arith.constant 108 : i32
    %627 = vector.broadcast %c108_i32 : i32 to vector<8x128xi32>
    %628 = arith.cmpi eq, %2, %627 : vector<8x128xi32>
    %c108 = arith.constant 108 : index
    %629 = memref.load %arg1[%c108] : memref<256xf32, #tpu.memory_space<smem>>
    %630 = vector.broadcast %629 : f32 to vector<8x128xf32>
    %631 = arith.select %628, %630, %626 : vector<8x128xi1>, vector<8x128xf32>
    %c109_i32 = arith.constant 109 : i32
    %632 = vector.broadcast %c109_i32 : i32 to vector<8x128xi32>
    %633 = arith.cmpi eq, %2, %632 : vector<8x128xi32>
    %c109 = arith.constant 109 : index
    %634 = memref.load %arg1[%c109] : memref<256xf32, #tpu.memory_space<smem>>
    %635 = vector.broadcast %634 : f32 to vector<8x128xf32>
    %636 = arith.select %633, %635, %631 : vector<8x128xi1>, vector<8x128xf32>
    %c110_i32 = arith.constant 110 : i32
    %637 = vector.broadcast %c110_i32 : i32 to vector<8x128xi32>
    %638 = arith.cmpi eq, %2, %637 : vector<8x128xi32>
    %c110 = arith.constant 110 : index
    %639 = memref.load %arg1[%c110] : memref<256xf32, #tpu.memory_space<smem>>
    %640 = vector.broadcast %639 : f32 to vector<8x128xf32>
    %641 = arith.select %638, %640, %636 : vector<8x128xi1>, vector<8x128xf32>
    %c111_i32 = arith.constant 111 : i32
    %642 = vector.broadcast %c111_i32 : i32 to vector<8x128xi32>
    %643 = arith.cmpi eq, %2, %642 : vector<8x128xi32>
    %c111 = arith.constant 111 : index
    %644 = memref.load %arg1[%c111] : memref<256xf32, #tpu.memory_space<smem>>
    %645 = vector.broadcast %644 : f32 to vector<8x128xf32>
    %646 = arith.select %643, %645, %641 : vector<8x128xi1>, vector<8x128xf32>
    %c112_i32 = arith.constant 112 : i32
    %647 = vector.broadcast %c112_i32 : i32 to vector<8x128xi32>
    %648 = arith.cmpi eq, %2, %647 : vector<8x128xi32>
    %c112 = arith.constant 112 : index
    %649 = memref.load %arg1[%c112] : memref<256xf32, #tpu.memory_space<smem>>
    %650 = vector.broadcast %649 : f32 to vector<8x128xf32>
    %651 = arith.select %648, %650, %646 : vector<8x128xi1>, vector<8x128xf32>
    %c113_i32 = arith.constant 113 : i32
    %652 = vector.broadcast %c113_i32 : i32 to vector<8x128xi32>
    %653 = arith.cmpi eq, %2, %652 : vector<8x128xi32>
    %c113 = arith.constant 113 : index
    %654 = memref.load %arg1[%c113] : memref<256xf32, #tpu.memory_space<smem>>
    %655 = vector.broadcast %654 : f32 to vector<8x128xf32>
    %656 = arith.select %653, %655, %651 : vector<8x128xi1>, vector<8x128xf32>
    %c114_i32 = arith.constant 114 : i32
    %657 = vector.broadcast %c114_i32 : i32 to vector<8x128xi32>
    %658 = arith.cmpi eq, %2, %657 : vector<8x128xi32>
    %c114 = arith.constant 114 : index
    %659 = memref.load %arg1[%c114] : memref<256xf32, #tpu.memory_space<smem>>
    %660 = vector.broadcast %659 : f32 to vector<8x128xf32>
    %661 = arith.select %658, %660, %656 : vector<8x128xi1>, vector<8x128xf32>
    %c115_i32 = arith.constant 115 : i32
    %662 = vector.broadcast %c115_i32 : i32 to vector<8x128xi32>
    %663 = arith.cmpi eq, %2, %662 : vector<8x128xi32>
    %c115 = arith.constant 115 : index
    %664 = memref.load %arg1[%c115] : memref<256xf32, #tpu.memory_space<smem>>
    %665 = vector.broadcast %664 : f32 to vector<8x128xf32>
    %666 = arith.select %663, %665, %661 : vector<8x128xi1>, vector<8x128xf32>
    %c116_i32 = arith.constant 116 : i32
    %667 = vector.broadcast %c116_i32 : i32 to vector<8x128xi32>
    %668 = arith.cmpi eq, %2, %667 : vector<8x128xi32>
    %c116 = arith.constant 116 : index
    %669 = memref.load %arg1[%c116] : memref<256xf32, #tpu.memory_space<smem>>
    %670 = vector.broadcast %669 : f32 to vector<8x128xf32>
    %671 = arith.select %668, %670, %666 : vector<8x128xi1>, vector<8x128xf32>
    %c117_i32 = arith.constant 117 : i32
    %672 = vector.broadcast %c117_i32 : i32 to vector<8x128xi32>
    %673 = arith.cmpi eq, %2, %672 : vector<8x128xi32>
    %c117 = arith.constant 117 : index
    %674 = memref.load %arg1[%c117] : memref<256xf32, #tpu.memory_space<smem>>
    %675 = vector.broadcast %674 : f32 to vector<8x128xf32>
    %676 = arith.select %673, %675, %671 : vector<8x128xi1>, vector<8x128xf32>
    %c118_i32 = arith.constant 118 : i32
    %677 = vector.broadcast %c118_i32 : i32 to vector<8x128xi32>
    %678 = arith.cmpi eq, %2, %677 : vector<8x128xi32>
    %c118 = arith.constant 118 : index
    %679 = memref.load %arg1[%c118] : memref<256xf32, #tpu.memory_space<smem>>
    %680 = vector.broadcast %679 : f32 to vector<8x128xf32>
    %681 = arith.select %678, %680, %676 : vector<8x128xi1>, vector<8x128xf32>
    %c119_i32 = arith.constant 119 : i32
    %682 = vector.broadcast %c119_i32 : i32 to vector<8x128xi32>
    %683 = arith.cmpi eq, %2, %682 : vector<8x128xi32>
    %c119 = arith.constant 119 : index
    %684 = memref.load %arg1[%c119] : memref<256xf32, #tpu.memory_space<smem>>
    %685 = vector.broadcast %684 : f32 to vector<8x128xf32>
    %686 = arith.select %683, %685, %681 : vector<8x128xi1>, vector<8x128xf32>
    %c120_i32 = arith.constant 120 : i32
    %687 = vector.broadcast %c120_i32 : i32 to vector<8x128xi32>
    %688 = arith.cmpi eq, %2, %687 : vector<8x128xi32>
    %c120 = arith.constant 120 : index
    %689 = memref.load %arg1[%c120] : memref<256xf32, #tpu.memory_space<smem>>
    %690 = vector.broadcast %689 : f32 to vector<8x128xf32>
    %691 = arith.select %688, %690, %686 : vector<8x128xi1>, vector<8x128xf32>
    %c121_i32 = arith.constant 121 : i32
    %692 = vector.broadcast %c121_i32 : i32 to vector<8x128xi32>
    %693 = arith.cmpi eq, %2, %692 : vector<8x128xi32>
    %c121 = arith.constant 121 : index
    %694 = memref.load %arg1[%c121] : memref<256xf32, #tpu.memory_space<smem>>
    %695 = vector.broadcast %694 : f32 to vector<8x128xf32>
    %696 = arith.select %693, %695, %691 : vector<8x128xi1>, vector<8x128xf32>
    %c122_i32 = arith.constant 122 : i32
    %697 = vector.broadcast %c122_i32 : i32 to vector<8x128xi32>
    %698 = arith.cmpi eq, %2, %697 : vector<8x128xi32>
    %c122 = arith.constant 122 : index
    %699 = memref.load %arg1[%c122] : memref<256xf32, #tpu.memory_space<smem>>
    %700 = vector.broadcast %699 : f32 to vector<8x128xf32>
    %701 = arith.select %698, %700, %696 : vector<8x128xi1>, vector<8x128xf32>
    %c123_i32 = arith.constant 123 : i32
    %702 = vector.broadcast %c123_i32 : i32 to vector<8x128xi32>
    %703 = arith.cmpi eq, %2, %702 : vector<8x128xi32>
    %c123 = arith.constant 123 : index
    %704 = memref.load %arg1[%c123] : memref<256xf32, #tpu.memory_space<smem>>
    %705 = vector.broadcast %704 : f32 to vector<8x128xf32>
    %706 = arith.select %703, %705, %701 : vector<8x128xi1>, vector<8x128xf32>
    %c124_i32 = arith.constant 124 : i32
    %707 = vector.broadcast %c124_i32 : i32 to vector<8x128xi32>
    %708 = arith.cmpi eq, %2, %707 : vector<8x128xi32>
    %c124 = arith.constant 124 : index
    %709 = memref.load %arg1[%c124] : memref<256xf32, #tpu.memory_space<smem>>
    %710 = vector.broadcast %709 : f32 to vector<8x128xf32>
    %711 = arith.select %708, %710, %706 : vector<8x128xi1>, vector<8x128xf32>
    %c125_i32 = arith.constant 125 : i32
    %712 = vector.broadcast %c125_i32 : i32 to vector<8x128xi32>
    %713 = arith.cmpi eq, %2, %712 : vector<8x128xi32>
    %c125 = arith.constant 125 : index
    %714 = memref.load %arg1[%c125] : memref<256xf32, #tpu.memory_space<smem>>
    %715 = vector.broadcast %714 : f32 to vector<8x128xf32>
    %716 = arith.select %713, %715, %711 : vector<8x128xi1>, vector<8x128xf32>
    %c126_i32 = arith.constant 126 : i32
    %717 = vector.broadcast %c126_i32 : i32 to vector<8x128xi32>
    %718 = arith.cmpi eq, %2, %717 : vector<8x128xi32>
    %c126 = arith.constant 126 : index
    %719 = memref.load %arg1[%c126] : memref<256xf32, #tpu.memory_space<smem>>
    %720 = vector.broadcast %719 : f32 to vector<8x128xf32>
    %721 = arith.select %718, %720, %716 : vector<8x128xi1>, vector<8x128xf32>
    %c127_i32 = arith.constant 127 : i32
    %722 = vector.broadcast %c127_i32 : i32 to vector<8x128xi32>
    %723 = arith.cmpi eq, %2, %722 : vector<8x128xi32>
    %c127 = arith.constant 127 : index
    %724 = memref.load %arg1[%c127] : memref<256xf32, #tpu.memory_space<smem>>
    %725 = vector.broadcast %724 : f32 to vector<8x128xf32>
    %726 = arith.select %723, %725, %721 : vector<8x128xi1>, vector<8x128xf32>
    %c128_i32 = arith.constant 128 : i32
    %727 = vector.broadcast %c128_i32 : i32 to vector<8x128xi32>
    %728 = arith.cmpi eq, %2, %727 : vector<8x128xi32>
    %c128 = arith.constant 128 : index
    %729 = memref.load %arg1[%c128] : memref<256xf32, #tpu.memory_space<smem>>
    %730 = vector.broadcast %729 : f32 to vector<8x128xf32>
    %731 = arith.select %728, %730, %86 : vector<8x128xi1>, vector<8x128xf32>
    %c129_i32 = arith.constant 129 : i32
    %732 = vector.broadcast %c129_i32 : i32 to vector<8x128xi32>
    %733 = arith.cmpi eq, %2, %732 : vector<8x128xi32>
    %c129 = arith.constant 129 : index
    %734 = memref.load %arg1[%c129] : memref<256xf32, #tpu.memory_space<smem>>
    %735 = vector.broadcast %734 : f32 to vector<8x128xf32>
    %736 = arith.select %733, %735, %731 : vector<8x128xi1>, vector<8x128xf32>
    %c130_i32 = arith.constant 130 : i32
    %737 = vector.broadcast %c130_i32 : i32 to vector<8x128xi32>
    %738 = arith.cmpi eq, %2, %737 : vector<8x128xi32>
    %c130 = arith.constant 130 : index
    %739 = memref.load %arg1[%c130] : memref<256xf32, #tpu.memory_space<smem>>
    %740 = vector.broadcast %739 : f32 to vector<8x128xf32>
    %741 = arith.select %738, %740, %736 : vector<8x128xi1>, vector<8x128xf32>
    %c131_i32 = arith.constant 131 : i32
    %742 = vector.broadcast %c131_i32 : i32 to vector<8x128xi32>
    %743 = arith.cmpi eq, %2, %742 : vector<8x128xi32>
    %c131 = arith.constant 131 : index
    %744 = memref.load %arg1[%c131] : memref<256xf32, #tpu.memory_space<smem>>
    %745 = vector.broadcast %744 : f32 to vector<8x128xf32>
    %746 = arith.select %743, %745, %741 : vector<8x128xi1>, vector<8x128xf32>
    %c132_i32 = arith.constant 132 : i32
    %747 = vector.broadcast %c132_i32 : i32 to vector<8x128xi32>
    %748 = arith.cmpi eq, %2, %747 : vector<8x128xi32>
    %c132 = arith.constant 132 : index
    %749 = memref.load %arg1[%c132] : memref<256xf32, #tpu.memory_space<smem>>
    %750 = vector.broadcast %749 : f32 to vector<8x128xf32>
    %751 = arith.select %748, %750, %746 : vector<8x128xi1>, vector<8x128xf32>
    %c133_i32 = arith.constant 133 : i32
    %752 = vector.broadcast %c133_i32 : i32 to vector<8x128xi32>
    %753 = arith.cmpi eq, %2, %752 : vector<8x128xi32>
    %c133 = arith.constant 133 : index
    %754 = memref.load %arg1[%c133] : memref<256xf32, #tpu.memory_space<smem>>
    %755 = vector.broadcast %754 : f32 to vector<8x128xf32>
    %756 = arith.select %753, %755, %751 : vector<8x128xi1>, vector<8x128xf32>
    %c134_i32 = arith.constant 134 : i32
    %757 = vector.broadcast %c134_i32 : i32 to vector<8x128xi32>
    %758 = arith.cmpi eq, %2, %757 : vector<8x128xi32>
    %c134 = arith.constant 134 : index
    %759 = memref.load %arg1[%c134] : memref<256xf32, #tpu.memory_space<smem>>
    %760 = vector.broadcast %759 : f32 to vector<8x128xf32>
    %761 = arith.select %758, %760, %756 : vector<8x128xi1>, vector<8x128xf32>
    %c135_i32 = arith.constant 135 : i32
    %762 = vector.broadcast %c135_i32 : i32 to vector<8x128xi32>
    %763 = arith.cmpi eq, %2, %762 : vector<8x128xi32>
    %c135 = arith.constant 135 : index
    %764 = memref.load %arg1[%c135] : memref<256xf32, #tpu.memory_space<smem>>
    %765 = vector.broadcast %764 : f32 to vector<8x128xf32>
    %766 = arith.select %763, %765, %761 : vector<8x128xi1>, vector<8x128xf32>
    %c136_i32 = arith.constant 136 : i32
    %767 = vector.broadcast %c136_i32 : i32 to vector<8x128xi32>
    %768 = arith.cmpi eq, %2, %767 : vector<8x128xi32>
    %c136 = arith.constant 136 : index
    %769 = memref.load %arg1[%c136] : memref<256xf32, #tpu.memory_space<smem>>
    %770 = vector.broadcast %769 : f32 to vector<8x128xf32>
    %771 = arith.select %768, %770, %766 : vector<8x128xi1>, vector<8x128xf32>
    %c137_i32 = arith.constant 137 : i32
    %772 = vector.broadcast %c137_i32 : i32 to vector<8x128xi32>
    %773 = arith.cmpi eq, %2, %772 : vector<8x128xi32>
    %c137 = arith.constant 137 : index
    %774 = memref.load %arg1[%c137] : memref<256xf32, #tpu.memory_space<smem>>
    %775 = vector.broadcast %774 : f32 to vector<8x128xf32>
    %776 = arith.select %773, %775, %771 : vector<8x128xi1>, vector<8x128xf32>
    %c138_i32 = arith.constant 138 : i32
    %777 = vector.broadcast %c138_i32 : i32 to vector<8x128xi32>
    %778 = arith.cmpi eq, %2, %777 : vector<8x128xi32>
    %c138 = arith.constant 138 : index
    %779 = memref.load %arg1[%c138] : memref<256xf32, #tpu.memory_space<smem>>
    %780 = vector.broadcast %779 : f32 to vector<8x128xf32>
    %781 = arith.select %778, %780, %776 : vector<8x128xi1>, vector<8x128xf32>
    %c139_i32 = arith.constant 139 : i32
    %782 = vector.broadcast %c139_i32 : i32 to vector<8x128xi32>
    %783 = arith.cmpi eq, %2, %782 : vector<8x128xi32>
    %c139 = arith.constant 139 : index
    %784 = memref.load %arg1[%c139] : memref<256xf32, #tpu.memory_space<smem>>
    %785 = vector.broadcast %784 : f32 to vector<8x128xf32>
    %786 = arith.select %783, %785, %781 : vector<8x128xi1>, vector<8x128xf32>
    %c140_i32 = arith.constant 140 : i32
    %787 = vector.broadcast %c140_i32 : i32 to vector<8x128xi32>
    %788 = arith.cmpi eq, %2, %787 : vector<8x128xi32>
    %c140 = arith.constant 140 : index
    %789 = memref.load %arg1[%c140] : memref<256xf32, #tpu.memory_space<smem>>
    %790 = vector.broadcast %789 : f32 to vector<8x128xf32>
    %791 = arith.select %788, %790, %786 : vector<8x128xi1>, vector<8x128xf32>
    %c141_i32 = arith.constant 141 : i32
    %792 = vector.broadcast %c141_i32 : i32 to vector<8x128xi32>
    %793 = arith.cmpi eq, %2, %792 : vector<8x128xi32>
    %c141 = arith.constant 141 : index
    %794 = memref.load %arg1[%c141] : memref<256xf32, #tpu.memory_space<smem>>
    %795 = vector.broadcast %794 : f32 to vector<8x128xf32>
    %796 = arith.select %793, %795, %791 : vector<8x128xi1>, vector<8x128xf32>
    %c142_i32 = arith.constant 142 : i32
    %797 = vector.broadcast %c142_i32 : i32 to vector<8x128xi32>
    %798 = arith.cmpi eq, %2, %797 : vector<8x128xi32>
    %c142 = arith.constant 142 : index
    %799 = memref.load %arg1[%c142] : memref<256xf32, #tpu.memory_space<smem>>
    %800 = vector.broadcast %799 : f32 to vector<8x128xf32>
    %801 = arith.select %798, %800, %796 : vector<8x128xi1>, vector<8x128xf32>
    %c143_i32 = arith.constant 143 : i32
    %802 = vector.broadcast %c143_i32 : i32 to vector<8x128xi32>
    %803 = arith.cmpi eq, %2, %802 : vector<8x128xi32>
    %c143 = arith.constant 143 : index
    %804 = memref.load %arg1[%c143] : memref<256xf32, #tpu.memory_space<smem>>
    %805 = vector.broadcast %804 : f32 to vector<8x128xf32>
    %806 = arith.select %803, %805, %801 : vector<8x128xi1>, vector<8x128xf32>
    %c144_i32 = arith.constant 144 : i32
    %807 = vector.broadcast %c144_i32 : i32 to vector<8x128xi32>
    %808 = arith.cmpi eq, %2, %807 : vector<8x128xi32>
    %c144 = arith.constant 144 : index
    %809 = memref.load %arg1[%c144] : memref<256xf32, #tpu.memory_space<smem>>
    %810 = vector.broadcast %809 : f32 to vector<8x128xf32>
    %811 = arith.select %808, %810, %806 : vector<8x128xi1>, vector<8x128xf32>
    %c145_i32 = arith.constant 145 : i32
    %812 = vector.broadcast %c145_i32 : i32 to vector<8x128xi32>
    %813 = arith.cmpi eq, %2, %812 : vector<8x128xi32>
    %c145 = arith.constant 145 : index
    %814 = memref.load %arg1[%c145] : memref<256xf32, #tpu.memory_space<smem>>
    %815 = vector.broadcast %814 : f32 to vector<8x128xf32>
    %816 = arith.select %813, %815, %811 : vector<8x128xi1>, vector<8x128xf32>
    %c146_i32 = arith.constant 146 : i32
    %817 = vector.broadcast %c146_i32 : i32 to vector<8x128xi32>
    %818 = arith.cmpi eq, %2, %817 : vector<8x128xi32>
    %c146 = arith.constant 146 : index
    %819 = memref.load %arg1[%c146] : memref<256xf32, #tpu.memory_space<smem>>
    %820 = vector.broadcast %819 : f32 to vector<8x128xf32>
    %821 = arith.select %818, %820, %816 : vector<8x128xi1>, vector<8x128xf32>
    %c147_i32 = arith.constant 147 : i32
    %822 = vector.broadcast %c147_i32 : i32 to vector<8x128xi32>
    %823 = arith.cmpi eq, %2, %822 : vector<8x128xi32>
    %c147 = arith.constant 147 : index
    %824 = memref.load %arg1[%c147] : memref<256xf32, #tpu.memory_space<smem>>
    %825 = vector.broadcast %824 : f32 to vector<8x128xf32>
    %826 = arith.select %823, %825, %821 : vector<8x128xi1>, vector<8x128xf32>
    %c148_i32 = arith.constant 148 : i32
    %827 = vector.broadcast %c148_i32 : i32 to vector<8x128xi32>
    %828 = arith.cmpi eq, %2, %827 : vector<8x128xi32>
    %c148 = arith.constant 148 : index
    %829 = memref.load %arg1[%c148] : memref<256xf32, #tpu.memory_space<smem>>
    %830 = vector.broadcast %829 : f32 to vector<8x128xf32>
    %831 = arith.select %828, %830, %826 : vector<8x128xi1>, vector<8x128xf32>
    %c149_i32 = arith.constant 149 : i32
    %832 = vector.broadcast %c149_i32 : i32 to vector<8x128xi32>
    %833 = arith.cmpi eq, %2, %832 : vector<8x128xi32>
    %c149 = arith.constant 149 : index
    %834 = memref.load %arg1[%c149] : memref<256xf32, #tpu.memory_space<smem>>
    %835 = vector.broadcast %834 : f32 to vector<8x128xf32>
    %836 = arith.select %833, %835, %831 : vector<8x128xi1>, vector<8x128xf32>
    %c150_i32 = arith.constant 150 : i32
    %837 = vector.broadcast %c150_i32 : i32 to vector<8x128xi32>
    %838 = arith.cmpi eq, %2, %837 : vector<8x128xi32>
    %c150 = arith.constant 150 : index
    %839 = memref.load %arg1[%c150] : memref<256xf32, #tpu.memory_space<smem>>
    %840 = vector.broadcast %839 : f32 to vector<8x128xf32>
    %841 = arith.select %838, %840, %836 : vector<8x128xi1>, vector<8x128xf32>
    %c151_i32 = arith.constant 151 : i32
    %842 = vector.broadcast %c151_i32 : i32 to vector<8x128xi32>
    %843 = arith.cmpi eq, %2, %842 : vector<8x128xi32>
    %c151 = arith.constant 151 : index
    %844 = memref.load %arg1[%c151] : memref<256xf32, #tpu.memory_space<smem>>
    %845 = vector.broadcast %844 : f32 to vector<8x128xf32>
    %846 = arith.select %843, %845, %841 : vector<8x128xi1>, vector<8x128xf32>
    %c152_i32 = arith.constant 152 : i32
    %847 = vector.broadcast %c152_i32 : i32 to vector<8x128xi32>
    %848 = arith.cmpi eq, %2, %847 : vector<8x128xi32>
    %c152 = arith.constant 152 : index
    %849 = memref.load %arg1[%c152] : memref<256xf32, #tpu.memory_space<smem>>
    %850 = vector.broadcast %849 : f32 to vector<8x128xf32>
    %851 = arith.select %848, %850, %846 : vector<8x128xi1>, vector<8x128xf32>
    %c153_i32 = arith.constant 153 : i32
    %852 = vector.broadcast %c153_i32 : i32 to vector<8x128xi32>
    %853 = arith.cmpi eq, %2, %852 : vector<8x128xi32>
    %c153 = arith.constant 153 : index
    %854 = memref.load %arg1[%c153] : memref<256xf32, #tpu.memory_space<smem>>
    %855 = vector.broadcast %854 : f32 to vector<8x128xf32>
    %856 = arith.select %853, %855, %851 : vector<8x128xi1>, vector<8x128xf32>
    %c154_i32 = arith.constant 154 : i32
    %857 = vector.broadcast %c154_i32 : i32 to vector<8x128xi32>
    %858 = arith.cmpi eq, %2, %857 : vector<8x128xi32>
    %c154 = arith.constant 154 : index
    %859 = memref.load %arg1[%c154] : memref<256xf32, #tpu.memory_space<smem>>
    %860 = vector.broadcast %859 : f32 to vector<8x128xf32>
    %861 = arith.select %858, %860, %856 : vector<8x128xi1>, vector<8x128xf32>
    %c155_i32 = arith.constant 155 : i32
    %862 = vector.broadcast %c155_i32 : i32 to vector<8x128xi32>
    %863 = arith.cmpi eq, %2, %862 : vector<8x128xi32>
    %c155 = arith.constant 155 : index
    %864 = memref.load %arg1[%c155] : memref<256xf32, #tpu.memory_space<smem>>
    %865 = vector.broadcast %864 : f32 to vector<8x128xf32>
    %866 = arith.select %863, %865, %861 : vector<8x128xi1>, vector<8x128xf32>
    %c156_i32 = arith.constant 156 : i32
    %867 = vector.broadcast %c156_i32 : i32 to vector<8x128xi32>
    %868 = arith.cmpi eq, %2, %867 : vector<8x128xi32>
    %c156 = arith.constant 156 : index
    %869 = memref.load %arg1[%c156] : memref<256xf32, #tpu.memory_space<smem>>
    %870 = vector.broadcast %869 : f32 to vector<8x128xf32>
    %871 = arith.select %868, %870, %866 : vector<8x128xi1>, vector<8x128xf32>
    %c157_i32 = arith.constant 157 : i32
    %872 = vector.broadcast %c157_i32 : i32 to vector<8x128xi32>
    %873 = arith.cmpi eq, %2, %872 : vector<8x128xi32>
    %c157 = arith.constant 157 : index
    %874 = memref.load %arg1[%c157] : memref<256xf32, #tpu.memory_space<smem>>
    %875 = vector.broadcast %874 : f32 to vector<8x128xf32>
    %876 = arith.select %873, %875, %871 : vector<8x128xi1>, vector<8x128xf32>
    %c158_i32 = arith.constant 158 : i32
    %877 = vector.broadcast %c158_i32 : i32 to vector<8x128xi32>
    %878 = arith.cmpi eq, %2, %877 : vector<8x128xi32>
    %c158 = arith.constant 158 : index
    %879 = memref.load %arg1[%c158] : memref<256xf32, #tpu.memory_space<smem>>
    %880 = vector.broadcast %879 : f32 to vector<8x128xf32>
    %881 = arith.select %878, %880, %876 : vector<8x128xi1>, vector<8x128xf32>
    %c159_i32 = arith.constant 159 : i32
    %882 = vector.broadcast %c159_i32 : i32 to vector<8x128xi32>
    %883 = arith.cmpi eq, %2, %882 : vector<8x128xi32>
    %c159 = arith.constant 159 : index
    %884 = memref.load %arg1[%c159] : memref<256xf32, #tpu.memory_space<smem>>
    %885 = vector.broadcast %884 : f32 to vector<8x128xf32>
    %886 = arith.select %883, %885, %881 : vector<8x128xi1>, vector<8x128xf32>
    %c160_i32 = arith.constant 160 : i32
    %887 = vector.broadcast %c160_i32 : i32 to vector<8x128xi32>
    %888 = arith.cmpi eq, %2, %887 : vector<8x128xi32>
    %c160 = arith.constant 160 : index
    %889 = memref.load %arg1[%c160] : memref<256xf32, #tpu.memory_space<smem>>
    %890 = vector.broadcast %889 : f32 to vector<8x128xf32>
    %891 = arith.select %888, %890, %886 : vector<8x128xi1>, vector<8x128xf32>
    %c161_i32 = arith.constant 161 : i32
    %892 = vector.broadcast %c161_i32 : i32 to vector<8x128xi32>
    %893 = arith.cmpi eq, %2, %892 : vector<8x128xi32>
    %c161 = arith.constant 161 : index
    %894 = memref.load %arg1[%c161] : memref<256xf32, #tpu.memory_space<smem>>
    %895 = vector.broadcast %894 : f32 to vector<8x128xf32>
    %896 = arith.select %893, %895, %891 : vector<8x128xi1>, vector<8x128xf32>
    %c162_i32 = arith.constant 162 : i32
    %897 = vector.broadcast %c162_i32 : i32 to vector<8x128xi32>
    %898 = arith.cmpi eq, %2, %897 : vector<8x128xi32>
    %c162 = arith.constant 162 : index
    %899 = memref.load %arg1[%c162] : memref<256xf32, #tpu.memory_space<smem>>
    %900 = vector.broadcast %899 : f32 to vector<8x128xf32>
    %901 = arith.select %898, %900, %896 : vector<8x128xi1>, vector<8x128xf32>
    %c163_i32 = arith.constant 163 : i32
    %902 = vector.broadcast %c163_i32 : i32 to vector<8x128xi32>
    %903 = arith.cmpi eq, %2, %902 : vector<8x128xi32>
    %c163 = arith.constant 163 : index
    %904 = memref.load %arg1[%c163] : memref<256xf32, #tpu.memory_space<smem>>
    %905 = vector.broadcast %904 : f32 to vector<8x128xf32>
    %906 = arith.select %903, %905, %901 : vector<8x128xi1>, vector<8x128xf32>
    %c164_i32 = arith.constant 164 : i32
    %907 = vector.broadcast %c164_i32 : i32 to vector<8x128xi32>
    %908 = arith.cmpi eq, %2, %907 : vector<8x128xi32>
    %c164 = arith.constant 164 : index
    %909 = memref.load %arg1[%c164] : memref<256xf32, #tpu.memory_space<smem>>
    %910 = vector.broadcast %909 : f32 to vector<8x128xf32>
    %911 = arith.select %908, %910, %906 : vector<8x128xi1>, vector<8x128xf32>
    %c165_i32 = arith.constant 165 : i32
    %912 = vector.broadcast %c165_i32 : i32 to vector<8x128xi32>
    %913 = arith.cmpi eq, %2, %912 : vector<8x128xi32>
    %c165 = arith.constant 165 : index
    %914 = memref.load %arg1[%c165] : memref<256xf32, #tpu.memory_space<smem>>
    %915 = vector.broadcast %914 : f32 to vector<8x128xf32>
    %916 = arith.select %913, %915, %911 : vector<8x128xi1>, vector<8x128xf32>
    %c166_i32 = arith.constant 166 : i32
    %917 = vector.broadcast %c166_i32 : i32 to vector<8x128xi32>
    %918 = arith.cmpi eq, %2, %917 : vector<8x128xi32>
    %c166 = arith.constant 166 : index
    %919 = memref.load %arg1[%c166] : memref<256xf32, #tpu.memory_space<smem>>
    %920 = vector.broadcast %919 : f32 to vector<8x128xf32>
    %921 = arith.select %918, %920, %916 : vector<8x128xi1>, vector<8x128xf32>
    %c167_i32 = arith.constant 167 : i32
    %922 = vector.broadcast %c167_i32 : i32 to vector<8x128xi32>
    %923 = arith.cmpi eq, %2, %922 : vector<8x128xi32>
    %c167 = arith.constant 167 : index
    %924 = memref.load %arg1[%c167] : memref<256xf32, #tpu.memory_space<smem>>
    %925 = vector.broadcast %924 : f32 to vector<8x128xf32>
    %926 = arith.select %923, %925, %921 : vector<8x128xi1>, vector<8x128xf32>
    %c168_i32 = arith.constant 168 : i32
    %927 = vector.broadcast %c168_i32 : i32 to vector<8x128xi32>
    %928 = arith.cmpi eq, %2, %927 : vector<8x128xi32>
    %c168 = arith.constant 168 : index
    %929 = memref.load %arg1[%c168] : memref<256xf32, #tpu.memory_space<smem>>
    %930 = vector.broadcast %929 : f32 to vector<8x128xf32>
    %931 = arith.select %928, %930, %926 : vector<8x128xi1>, vector<8x128xf32>
    %c169_i32 = arith.constant 169 : i32
    %932 = vector.broadcast %c169_i32 : i32 to vector<8x128xi32>
    %933 = arith.cmpi eq, %2, %932 : vector<8x128xi32>
    %c169 = arith.constant 169 : index
    %934 = memref.load %arg1[%c169] : memref<256xf32, #tpu.memory_space<smem>>
    %935 = vector.broadcast %934 : f32 to vector<8x128xf32>
    %936 = arith.select %933, %935, %931 : vector<8x128xi1>, vector<8x128xf32>
    %c170_i32 = arith.constant 170 : i32
    %937 = vector.broadcast %c170_i32 : i32 to vector<8x128xi32>
    %938 = arith.cmpi eq, %2, %937 : vector<8x128xi32>
    %c170 = arith.constant 170 : index
    %939 = memref.load %arg1[%c170] : memref<256xf32, #tpu.memory_space<smem>>
    %940 = vector.broadcast %939 : f32 to vector<8x128xf32>
    %941 = arith.select %938, %940, %936 : vector<8x128xi1>, vector<8x128xf32>
    %c171_i32 = arith.constant 171 : i32
    %942 = vector.broadcast %c171_i32 : i32 to vector<8x128xi32>
    %943 = arith.cmpi eq, %2, %942 : vector<8x128xi32>
    %c171 = arith.constant 171 : index
    %944 = memref.load %arg1[%c171] : memref<256xf32, #tpu.memory_space<smem>>
    %945 = vector.broadcast %944 : f32 to vector<8x128xf32>
    %946 = arith.select %943, %945, %941 : vector<8x128xi1>, vector<8x128xf32>
    %c172_i32 = arith.constant 172 : i32
    %947 = vector.broadcast %c172_i32 : i32 to vector<8x128xi32>
    %948 = arith.cmpi eq, %2, %947 : vector<8x128xi32>
    %c172 = arith.constant 172 : index
    %949 = memref.load %arg1[%c172] : memref<256xf32, #tpu.memory_space<smem>>
    %950 = vector.broadcast %949 : f32 to vector<8x128xf32>
    %951 = arith.select %948, %950, %946 : vector<8x128xi1>, vector<8x128xf32>
    %c173_i32 = arith.constant 173 : i32
    %952 = vector.broadcast %c173_i32 : i32 to vector<8x128xi32>
    %953 = arith.cmpi eq, %2, %952 : vector<8x128xi32>
    %c173 = arith.constant 173 : index
    %954 = memref.load %arg1[%c173] : memref<256xf32, #tpu.memory_space<smem>>
    %955 = vector.broadcast %954 : f32 to vector<8x128xf32>
    %956 = arith.select %953, %955, %951 : vector<8x128xi1>, vector<8x128xf32>
    %c174_i32 = arith.constant 174 : i32
    %957 = vector.broadcast %c174_i32 : i32 to vector<8x128xi32>
    %958 = arith.cmpi eq, %2, %957 : vector<8x128xi32>
    %c174 = arith.constant 174 : index
    %959 = memref.load %arg1[%c174] : memref<256xf32, #tpu.memory_space<smem>>
    %960 = vector.broadcast %959 : f32 to vector<8x128xf32>
    %961 = arith.select %958, %960, %956 : vector<8x128xi1>, vector<8x128xf32>
    %c175_i32 = arith.constant 175 : i32
    %962 = vector.broadcast %c175_i32 : i32 to vector<8x128xi32>
    %963 = arith.cmpi eq, %2, %962 : vector<8x128xi32>
    %c175 = arith.constant 175 : index
    %964 = memref.load %arg1[%c175] : memref<256xf32, #tpu.memory_space<smem>>
    %965 = vector.broadcast %964 : f32 to vector<8x128xf32>
    %966 = arith.select %963, %965, %961 : vector<8x128xi1>, vector<8x128xf32>
    %c176_i32 = arith.constant 176 : i32
    %967 = vector.broadcast %c176_i32 : i32 to vector<8x128xi32>
    %968 = arith.cmpi eq, %2, %967 : vector<8x128xi32>
    %c176 = arith.constant 176 : index
    %969 = memref.load %arg1[%c176] : memref<256xf32, #tpu.memory_space<smem>>
    %970 = vector.broadcast %969 : f32 to vector<8x128xf32>
    %971 = arith.select %968, %970, %966 : vector<8x128xi1>, vector<8x128xf32>
    %c177_i32 = arith.constant 177 : i32
    %972 = vector.broadcast %c177_i32 : i32 to vector<8x128xi32>
    %973 = arith.cmpi eq, %2, %972 : vector<8x128xi32>
    %c177 = arith.constant 177 : index
    %974 = memref.load %arg1[%c177] : memref<256xf32, #tpu.memory_space<smem>>
    %975 = vector.broadcast %974 : f32 to vector<8x128xf32>
    %976 = arith.select %973, %975, %971 : vector<8x128xi1>, vector<8x128xf32>
    %c178_i32 = arith.constant 178 : i32
    %977 = vector.broadcast %c178_i32 : i32 to vector<8x128xi32>
    %978 = arith.cmpi eq, %2, %977 : vector<8x128xi32>
    %c178 = arith.constant 178 : index
    %979 = memref.load %arg1[%c178] : memref<256xf32, #tpu.memory_space<smem>>
    %980 = vector.broadcast %979 : f32 to vector<8x128xf32>
    %981 = arith.select %978, %980, %976 : vector<8x128xi1>, vector<8x128xf32>
    %c179_i32 = arith.constant 179 : i32
    %982 = vector.broadcast %c179_i32 : i32 to vector<8x128xi32>
    %983 = arith.cmpi eq, %2, %982 : vector<8x128xi32>
    %c179 = arith.constant 179 : index
    %984 = memref.load %arg1[%c179] : memref<256xf32, #tpu.memory_space<smem>>
    %985 = vector.broadcast %984 : f32 to vector<8x128xf32>
    %986 = arith.select %983, %985, %981 : vector<8x128xi1>, vector<8x128xf32>
    %c180_i32 = arith.constant 180 : i32
    %987 = vector.broadcast %c180_i32 : i32 to vector<8x128xi32>
    %988 = arith.cmpi eq, %2, %987 : vector<8x128xi32>
    %c180 = arith.constant 180 : index
    %989 = memref.load %arg1[%c180] : memref<256xf32, #tpu.memory_space<smem>>
    %990 = vector.broadcast %989 : f32 to vector<8x128xf32>
    %991 = arith.select %988, %990, %986 : vector<8x128xi1>, vector<8x128xf32>
    %c181_i32 = arith.constant 181 : i32
    %992 = vector.broadcast %c181_i32 : i32 to vector<8x128xi32>
    %993 = arith.cmpi eq, %2, %992 : vector<8x128xi32>
    %c181 = arith.constant 181 : index
    %994 = memref.load %arg1[%c181] : memref<256xf32, #tpu.memory_space<smem>>
    %995 = vector.broadcast %994 : f32 to vector<8x128xf32>
    %996 = arith.select %993, %995, %991 : vector<8x128xi1>, vector<8x128xf32>
    %c182_i32 = arith.constant 182 : i32
    %997 = vector.broadcast %c182_i32 : i32 to vector<8x128xi32>
    %998 = arith.cmpi eq, %2, %997 : vector<8x128xi32>
    %c182 = arith.constant 182 : index
    %999 = memref.load %arg1[%c182] : memref<256xf32, #tpu.memory_space<smem>>
    %1000 = vector.broadcast %999 : f32 to vector<8x128xf32>
    %1001 = arith.select %998, %1000, %996 : vector<8x128xi1>, vector<8x128xf32>
    %c183_i32 = arith.constant 183 : i32
    %1002 = vector.broadcast %c183_i32 : i32 to vector<8x128xi32>
    %1003 = arith.cmpi eq, %2, %1002 : vector<8x128xi32>
    %c183 = arith.constant 183 : index
    %1004 = memref.load %arg1[%c183] : memref<256xf32, #tpu.memory_space<smem>>
    %1005 = vector.broadcast %1004 : f32 to vector<8x128xf32>
    %1006 = arith.select %1003, %1005, %1001 : vector<8x128xi1>, vector<8x128xf32>
    %c184_i32 = arith.constant 184 : i32
    %1007 = vector.broadcast %c184_i32 : i32 to vector<8x128xi32>
    %1008 = arith.cmpi eq, %2, %1007 : vector<8x128xi32>
    %c184 = arith.constant 184 : index
    %1009 = memref.load %arg1[%c184] : memref<256xf32, #tpu.memory_space<smem>>
    %1010 = vector.broadcast %1009 : f32 to vector<8x128xf32>
    %1011 = arith.select %1008, %1010, %1006 : vector<8x128xi1>, vector<8x128xf32>
    %c185_i32 = arith.constant 185 : i32
    %1012 = vector.broadcast %c185_i32 : i32 to vector<8x128xi32>
    %1013 = arith.cmpi eq, %2, %1012 : vector<8x128xi32>
    %c185 = arith.constant 185 : index
    %1014 = memref.load %arg1[%c185] : memref<256xf32, #tpu.memory_space<smem>>
    %1015 = vector.broadcast %1014 : f32 to vector<8x128xf32>
    %1016 = arith.select %1013, %1015, %1011 : vector<8x128xi1>, vector<8x128xf32>
    %c186_i32 = arith.constant 186 : i32
    %1017 = vector.broadcast %c186_i32 : i32 to vector<8x128xi32>
    %1018 = arith.cmpi eq, %2, %1017 : vector<8x128xi32>
    %c186 = arith.constant 186 : index
    %1019 = memref.load %arg1[%c186] : memref<256xf32, #tpu.memory_space<smem>>
    %1020 = vector.broadcast %1019 : f32 to vector<8x128xf32>
    %1021 = arith.select %1018, %1020, %1016 : vector<8x128xi1>, vector<8x128xf32>
    %c187_i32 = arith.constant 187 : i32
    %1022 = vector.broadcast %c187_i32 : i32 to vector<8x128xi32>
    %1023 = arith.cmpi eq, %2, %1022 : vector<8x128xi32>
    %c187 = arith.constant 187 : index
    %1024 = memref.load %arg1[%c187] : memref<256xf32, #tpu.memory_space<smem>>
    %1025 = vector.broadcast %1024 : f32 to vector<8x128xf32>
    %1026 = arith.select %1023, %1025, %1021 : vector<8x128xi1>, vector<8x128xf32>
    %c188_i32 = arith.constant 188 : i32
    %1027 = vector.broadcast %c188_i32 : i32 to vector<8x128xi32>
    %1028 = arith.cmpi eq, %2, %1027 : vector<8x128xi32>
    %c188 = arith.constant 188 : index
    %1029 = memref.load %arg1[%c188] : memref<256xf32, #tpu.memory_space<smem>>
    %1030 = vector.broadcast %1029 : f32 to vector<8x128xf32>
    %1031 = arith.select %1028, %1030, %1026 : vector<8x128xi1>, vector<8x128xf32>
    %c189_i32 = arith.constant 189 : i32
    %1032 = vector.broadcast %c189_i32 : i32 to vector<8x128xi32>
    %1033 = arith.cmpi eq, %2, %1032 : vector<8x128xi32>
    %c189 = arith.constant 189 : index
    %1034 = memref.load %arg1[%c189] : memref<256xf32, #tpu.memory_space<smem>>
    %1035 = vector.broadcast %1034 : f32 to vector<8x128xf32>
    %1036 = arith.select %1033, %1035, %1031 : vector<8x128xi1>, vector<8x128xf32>
    %c190_i32 = arith.constant 190 : i32
    %1037 = vector.broadcast %c190_i32 : i32 to vector<8x128xi32>
    %1038 = arith.cmpi eq, %2, %1037 : vector<8x128xi32>
    %c190 = arith.constant 190 : index
    %1039 = memref.load %arg1[%c190] : memref<256xf32, #tpu.memory_space<smem>>
    %1040 = vector.broadcast %1039 : f32 to vector<8x128xf32>
    %1041 = arith.select %1038, %1040, %1036 : vector<8x128xi1>, vector<8x128xf32>
    %c191_i32 = arith.constant 191 : i32
    %1042 = vector.broadcast %c191_i32 : i32 to vector<8x128xi32>
    %1043 = arith.cmpi eq, %2, %1042 : vector<8x128xi32>
    %c191 = arith.constant 191 : index
    %1044 = memref.load %arg1[%c191] : memref<256xf32, #tpu.memory_space<smem>>
    %1045 = vector.broadcast %1044 : f32 to vector<8x128xf32>
    %1046 = arith.select %1043, %1045, %1041 : vector<8x128xi1>, vector<8x128xf32>
    %c192_i32 = arith.constant 192 : i32
    %1047 = vector.broadcast %c192_i32 : i32 to vector<8x128xi32>
    %1048 = arith.cmpi eq, %2, %1047 : vector<8x128xi32>
    %c192 = arith.constant 192 : index
    %1049 = memref.load %arg1[%c192] : memref<256xf32, #tpu.memory_space<smem>>
    %1050 = vector.broadcast %1049 : f32 to vector<8x128xf32>
    %1051 = arith.select %1048, %1050, %1046 : vector<8x128xi1>, vector<8x128xf32>
    %c193_i32 = arith.constant 193 : i32
    %1052 = vector.broadcast %c193_i32 : i32 to vector<8x128xi32>
    %1053 = arith.cmpi eq, %2, %1052 : vector<8x128xi32>
    %c193 = arith.constant 193 : index
    %1054 = memref.load %arg1[%c193] : memref<256xf32, #tpu.memory_space<smem>>
    %1055 = vector.broadcast %1054 : f32 to vector<8x128xf32>
    %1056 = arith.select %1053, %1055, %1051 : vector<8x128xi1>, vector<8x128xf32>
    %c194_i32 = arith.constant 194 : i32
    %1057 = vector.broadcast %c194_i32 : i32 to vector<8x128xi32>
    %1058 = arith.cmpi eq, %2, %1057 : vector<8x128xi32>
    %c194 = arith.constant 194 : index
    %1059 = memref.load %arg1[%c194] : memref<256xf32, #tpu.memory_space<smem>>
    %1060 = vector.broadcast %1059 : f32 to vector<8x128xf32>
    %1061 = arith.select %1058, %1060, %1056 : vector<8x128xi1>, vector<8x128xf32>
    %c195_i32 = arith.constant 195 : i32
    %1062 = vector.broadcast %c195_i32 : i32 to vector<8x128xi32>
    %1063 = arith.cmpi eq, %2, %1062 : vector<8x128xi32>
    %c195 = arith.constant 195 : index
    %1064 = memref.load %arg1[%c195] : memref<256xf32, #tpu.memory_space<smem>>
    %1065 = vector.broadcast %1064 : f32 to vector<8x128xf32>
    %1066 = arith.select %1063, %1065, %1061 : vector<8x128xi1>, vector<8x128xf32>
    %c196_i32 = arith.constant 196 : i32
    %1067 = vector.broadcast %c196_i32 : i32 to vector<8x128xi32>
    %1068 = arith.cmpi eq, %2, %1067 : vector<8x128xi32>
    %c196 = arith.constant 196 : index
    %1069 = memref.load %arg1[%c196] : memref<256xf32, #tpu.memory_space<smem>>
    %1070 = vector.broadcast %1069 : f32 to vector<8x128xf32>
    %1071 = arith.select %1068, %1070, %1066 : vector<8x128xi1>, vector<8x128xf32>
    %c197_i32 = arith.constant 197 : i32
    %1072 = vector.broadcast %c197_i32 : i32 to vector<8x128xi32>
    %1073 = arith.cmpi eq, %2, %1072 : vector<8x128xi32>
    %c197 = arith.constant 197 : index
    %1074 = memref.load %arg1[%c197] : memref<256xf32, #tpu.memory_space<smem>>
    %1075 = vector.broadcast %1074 : f32 to vector<8x128xf32>
    %1076 = arith.select %1073, %1075, %1071 : vector<8x128xi1>, vector<8x128xf32>
    %c198_i32 = arith.constant 198 : i32
    %1077 = vector.broadcast %c198_i32 : i32 to vector<8x128xi32>
    %1078 = arith.cmpi eq, %2, %1077 : vector<8x128xi32>
    %c198 = arith.constant 198 : index
    %1079 = memref.load %arg1[%c198] : memref<256xf32, #tpu.memory_space<smem>>
    %1080 = vector.broadcast %1079 : f32 to vector<8x128xf32>
    %1081 = arith.select %1078, %1080, %1076 : vector<8x128xi1>, vector<8x128xf32>
    %c199_i32 = arith.constant 199 : i32
    %1082 = vector.broadcast %c199_i32 : i32 to vector<8x128xi32>
    %1083 = arith.cmpi eq, %2, %1082 : vector<8x128xi32>
    %c199 = arith.constant 199 : index
    %1084 = memref.load %arg1[%c199] : memref<256xf32, #tpu.memory_space<smem>>
    %1085 = vector.broadcast %1084 : f32 to vector<8x128xf32>
    %1086 = arith.select %1083, %1085, %1081 : vector<8x128xi1>, vector<8x128xf32>
    %c200_i32 = arith.constant 200 : i32
    %1087 = vector.broadcast %c200_i32 : i32 to vector<8x128xi32>
    %1088 = arith.cmpi eq, %2, %1087 : vector<8x128xi32>
    %c200 = arith.constant 200 : index
    %1089 = memref.load %arg1[%c200] : memref<256xf32, #tpu.memory_space<smem>>
    %1090 = vector.broadcast %1089 : f32 to vector<8x128xf32>
    %1091 = arith.select %1088, %1090, %1086 : vector<8x128xi1>, vector<8x128xf32>
    %c201_i32 = arith.constant 201 : i32
    %1092 = vector.broadcast %c201_i32 : i32 to vector<8x128xi32>
    %1093 = arith.cmpi eq, %2, %1092 : vector<8x128xi32>
    %c201 = arith.constant 201 : index
    %1094 = memref.load %arg1[%c201] : memref<256xf32, #tpu.memory_space<smem>>
    %1095 = vector.broadcast %1094 : f32 to vector<8x128xf32>
    %1096 = arith.select %1093, %1095, %1091 : vector<8x128xi1>, vector<8x128xf32>
    %c202_i32 = arith.constant 202 : i32
    %1097 = vector.broadcast %c202_i32 : i32 to vector<8x128xi32>
    %1098 = arith.cmpi eq, %2, %1097 : vector<8x128xi32>
    %c202 = arith.constant 202 : index
    %1099 = memref.load %arg1[%c202] : memref<256xf32, #tpu.memory_space<smem>>
    %1100 = vector.broadcast %1099 : f32 to vector<8x128xf32>
    %1101 = arith.select %1098, %1100, %1096 : vector<8x128xi1>, vector<8x128xf32>
    %c203_i32 = arith.constant 203 : i32
    %1102 = vector.broadcast %c203_i32 : i32 to vector<8x128xi32>
    %1103 = arith.cmpi eq, %2, %1102 : vector<8x128xi32>
    %c203 = arith.constant 203 : index
    %1104 = memref.load %arg1[%c203] : memref<256xf32, #tpu.memory_space<smem>>
    %1105 = vector.broadcast %1104 : f32 to vector<8x128xf32>
    %1106 = arith.select %1103, %1105, %1101 : vector<8x128xi1>, vector<8x128xf32>
    %c204_i32 = arith.constant 204 : i32
    %1107 = vector.broadcast %c204_i32 : i32 to vector<8x128xi32>
    %1108 = arith.cmpi eq, %2, %1107 : vector<8x128xi32>
    %c204 = arith.constant 204 : index
    %1109 = memref.load %arg1[%c204] : memref<256xf32, #tpu.memory_space<smem>>
    %1110 = vector.broadcast %1109 : f32 to vector<8x128xf32>
    %1111 = arith.select %1108, %1110, %1106 : vector<8x128xi1>, vector<8x128xf32>
    %c205_i32 = arith.constant 205 : i32
    %1112 = vector.broadcast %c205_i32 : i32 to vector<8x128xi32>
    %1113 = arith.cmpi eq, %2, %1112 : vector<8x128xi32>
    %c205 = arith.constant 205 : index
    %1114 = memref.load %arg1[%c205] : memref<256xf32, #tpu.memory_space<smem>>
    %1115 = vector.broadcast %1114 : f32 to vector<8x128xf32>
    %1116 = arith.select %1113, %1115, %1111 : vector<8x128xi1>, vector<8x128xf32>
    %c206_i32 = arith.constant 206 : i32
    %1117 = vector.broadcast %c206_i32 : i32 to vector<8x128xi32>
    %1118 = arith.cmpi eq, %2, %1117 : vector<8x128xi32>
    %c206 = arith.constant 206 : index
    %1119 = memref.load %arg1[%c206] : memref<256xf32, #tpu.memory_space<smem>>
    %1120 = vector.broadcast %1119 : f32 to vector<8x128xf32>
    %1121 = arith.select %1118, %1120, %1116 : vector<8x128xi1>, vector<8x128xf32>
    %c207_i32 = arith.constant 207 : i32
    %1122 = vector.broadcast %c207_i32 : i32 to vector<8x128xi32>
    %1123 = arith.cmpi eq, %2, %1122 : vector<8x128xi32>
    %c207 = arith.constant 207 : index
    %1124 = memref.load %arg1[%c207] : memref<256xf32, #tpu.memory_space<smem>>
    %1125 = vector.broadcast %1124 : f32 to vector<8x128xf32>
    %1126 = arith.select %1123, %1125, %1121 : vector<8x128xi1>, vector<8x128xf32>
    %c208_i32 = arith.constant 208 : i32
    %1127 = vector.broadcast %c208_i32 : i32 to vector<8x128xi32>
    %1128 = arith.cmpi eq, %2, %1127 : vector<8x128xi32>
    %c208 = arith.constant 208 : index
    %1129 = memref.load %arg1[%c208] : memref<256xf32, #tpu.memory_space<smem>>
    %1130 = vector.broadcast %1129 : f32 to vector<8x128xf32>
    %1131 = arith.select %1128, %1130, %1126 : vector<8x128xi1>, vector<8x128xf32>
    %c209_i32 = arith.constant 209 : i32
    %1132 = vector.broadcast %c209_i32 : i32 to vector<8x128xi32>
    %1133 = arith.cmpi eq, %2, %1132 : vector<8x128xi32>
    %c209 = arith.constant 209 : index
    %1134 = memref.load %arg1[%c209] : memref<256xf32, #tpu.memory_space<smem>>
    %1135 = vector.broadcast %1134 : f32 to vector<8x128xf32>
    %1136 = arith.select %1133, %1135, %1131 : vector<8x128xi1>, vector<8x128xf32>
    %c210_i32 = arith.constant 210 : i32
    %1137 = vector.broadcast %c210_i32 : i32 to vector<8x128xi32>
    %1138 = arith.cmpi eq, %2, %1137 : vector<8x128xi32>
    %c210 = arith.constant 210 : index
    %1139 = memref.load %arg1[%c210] : memref<256xf32, #tpu.memory_space<smem>>
    %1140 = vector.broadcast %1139 : f32 to vector<8x128xf32>
    %1141 = arith.select %1138, %1140, %1136 : vector<8x128xi1>, vector<8x128xf32>
    %c211_i32 = arith.constant 211 : i32
    %1142 = vector.broadcast %c211_i32 : i32 to vector<8x128xi32>
    %1143 = arith.cmpi eq, %2, %1142 : vector<8x128xi32>
    %c211 = arith.constant 211 : index
    %1144 = memref.load %arg1[%c211] : memref<256xf32, #tpu.memory_space<smem>>
    %1145 = vector.broadcast %1144 : f32 to vector<8x128xf32>
    %1146 = arith.select %1143, %1145, %1141 : vector<8x128xi1>, vector<8x128xf32>
    %c212_i32 = arith.constant 212 : i32
    %1147 = vector.broadcast %c212_i32 : i32 to vector<8x128xi32>
    %1148 = arith.cmpi eq, %2, %1147 : vector<8x128xi32>
    %c212 = arith.constant 212 : index
    %1149 = memref.load %arg1[%c212] : memref<256xf32, #tpu.memory_space<smem>>
    %1150 = vector.broadcast %1149 : f32 to vector<8x128xf32>
    %1151 = arith.select %1148, %1150, %1146 : vector<8x128xi1>, vector<8x128xf32>
    %c213_i32 = arith.constant 213 : i32
    %1152 = vector.broadcast %c213_i32 : i32 to vector<8x128xi32>
    %1153 = arith.cmpi eq, %2, %1152 : vector<8x128xi32>
    %c213 = arith.constant 213 : index
    %1154 = memref.load %arg1[%c213] : memref<256xf32, #tpu.memory_space<smem>>
    %1155 = vector.broadcast %1154 : f32 to vector<8x128xf32>
    %1156 = arith.select %1153, %1155, %1151 : vector<8x128xi1>, vector<8x128xf32>
    %c214_i32 = arith.constant 214 : i32
    %1157 = vector.broadcast %c214_i32 : i32 to vector<8x128xi32>
    %1158 = arith.cmpi eq, %2, %1157 : vector<8x128xi32>
    %c214 = arith.constant 214 : index
    %1159 = memref.load %arg1[%c214] : memref<256xf32, #tpu.memory_space<smem>>
    %1160 = vector.broadcast %1159 : f32 to vector<8x128xf32>
    %1161 = arith.select %1158, %1160, %1156 : vector<8x128xi1>, vector<8x128xf32>
    %c215_i32 = arith.constant 215 : i32
    %1162 = vector.broadcast %c215_i32 : i32 to vector<8x128xi32>
    %1163 = arith.cmpi eq, %2, %1162 : vector<8x128xi32>
    %c215 = arith.constant 215 : index
    %1164 = memref.load %arg1[%c215] : memref<256xf32, #tpu.memory_space<smem>>
    %1165 = vector.broadcast %1164 : f32 to vector<8x128xf32>
    %1166 = arith.select %1163, %1165, %1161 : vector<8x128xi1>, vector<8x128xf32>
    %c216_i32 = arith.constant 216 : i32
    %1167 = vector.broadcast %c216_i32 : i32 to vector<8x128xi32>
    %1168 = arith.cmpi eq, %2, %1167 : vector<8x128xi32>
    %c216 = arith.constant 216 : index
    %1169 = memref.load %arg1[%c216] : memref<256xf32, #tpu.memory_space<smem>>
    %1170 = vector.broadcast %1169 : f32 to vector<8x128xf32>
    %1171 = arith.select %1168, %1170, %1166 : vector<8x128xi1>, vector<8x128xf32>
    %c217_i32 = arith.constant 217 : i32
    %1172 = vector.broadcast %c217_i32 : i32 to vector<8x128xi32>
    %1173 = arith.cmpi eq, %2, %1172 : vector<8x128xi32>
    %c217 = arith.constant 217 : index
    %1174 = memref.load %arg1[%c217] : memref<256xf32, #tpu.memory_space<smem>>
    %1175 = vector.broadcast %1174 : f32 to vector<8x128xf32>
    %1176 = arith.select %1173, %1175, %1171 : vector<8x128xi1>, vector<8x128xf32>
    %c218_i32 = arith.constant 218 : i32
    %1177 = vector.broadcast %c218_i32 : i32 to vector<8x128xi32>
    %1178 = arith.cmpi eq, %2, %1177 : vector<8x128xi32>
    %c218 = arith.constant 218 : index
    %1179 = memref.load %arg1[%c218] : memref<256xf32, #tpu.memory_space<smem>>
    %1180 = vector.broadcast %1179 : f32 to vector<8x128xf32>
    %1181 = arith.select %1178, %1180, %1176 : vector<8x128xi1>, vector<8x128xf32>
    %c219_i32 = arith.constant 219 : i32
    %1182 = vector.broadcast %c219_i32 : i32 to vector<8x128xi32>
    %1183 = arith.cmpi eq, %2, %1182 : vector<8x128xi32>
    %c219 = arith.constant 219 : index
    %1184 = memref.load %arg1[%c219] : memref<256xf32, #tpu.memory_space<smem>>
    %1185 = vector.broadcast %1184 : f32 to vector<8x128xf32>
    %1186 = arith.select %1183, %1185, %1181 : vector<8x128xi1>, vector<8x128xf32>
    %c220_i32 = arith.constant 220 : i32
    %1187 = vector.broadcast %c220_i32 : i32 to vector<8x128xi32>
    %1188 = arith.cmpi eq, %2, %1187 : vector<8x128xi32>
    %c220 = arith.constant 220 : index
    %1189 = memref.load %arg1[%c220] : memref<256xf32, #tpu.memory_space<smem>>
    %1190 = vector.broadcast %1189 : f32 to vector<8x128xf32>
    %1191 = arith.select %1188, %1190, %1186 : vector<8x128xi1>, vector<8x128xf32>
    %c221_i32 = arith.constant 221 : i32
    %1192 = vector.broadcast %c221_i32 : i32 to vector<8x128xi32>
    %1193 = arith.cmpi eq, %2, %1192 : vector<8x128xi32>
    %c221 = arith.constant 221 : index
    %1194 = memref.load %arg1[%c221] : memref<256xf32, #tpu.memory_space<smem>>
    %1195 = vector.broadcast %1194 : f32 to vector<8x128xf32>
    %1196 = arith.select %1193, %1195, %1191 : vector<8x128xi1>, vector<8x128xf32>
    %c222_i32 = arith.constant 222 : i32
    %1197 = vector.broadcast %c222_i32 : i32 to vector<8x128xi32>
    %1198 = arith.cmpi eq, %2, %1197 : vector<8x128xi32>
    %c222 = arith.constant 222 : index
    %1199 = memref.load %arg1[%c222] : memref<256xf32, #tpu.memory_space<smem>>
    %1200 = vector.broadcast %1199 : f32 to vector<8x128xf32>
    %1201 = arith.select %1198, %1200, %1196 : vector<8x128xi1>, vector<8x128xf32>
    %c223_i32 = arith.constant 223 : i32
    %1202 = vector.broadcast %c223_i32 : i32 to vector<8x128xi32>
    %1203 = arith.cmpi eq, %2, %1202 : vector<8x128xi32>
    %c223 = arith.constant 223 : index
    %1204 = memref.load %arg1[%c223] : memref<256xf32, #tpu.memory_space<smem>>
    %1205 = vector.broadcast %1204 : f32 to vector<8x128xf32>
    %1206 = arith.select %1203, %1205, %1201 : vector<8x128xi1>, vector<8x128xf32>
    %c224_i32 = arith.constant 224 : i32
    %1207 = vector.broadcast %c224_i32 : i32 to vector<8x128xi32>
    %1208 = arith.cmpi eq, %2, %1207 : vector<8x128xi32>
    %c224 = arith.constant 224 : index
    %1209 = memref.load %arg1[%c224] : memref<256xf32, #tpu.memory_space<smem>>
    %1210 = vector.broadcast %1209 : f32 to vector<8x128xf32>
    %1211 = arith.select %1208, %1210, %1206 : vector<8x128xi1>, vector<8x128xf32>
    %c225_i32 = arith.constant 225 : i32
    %1212 = vector.broadcast %c225_i32 : i32 to vector<8x128xi32>
    %1213 = arith.cmpi eq, %2, %1212 : vector<8x128xi32>
    %c225 = arith.constant 225 : index
    %1214 = memref.load %arg1[%c225] : memref<256xf32, #tpu.memory_space<smem>>
    %1215 = vector.broadcast %1214 : f32 to vector<8x128xf32>
    %1216 = arith.select %1213, %1215, %1211 : vector<8x128xi1>, vector<8x128xf32>
    %c226_i32 = arith.constant 226 : i32
    %1217 = vector.broadcast %c226_i32 : i32 to vector<8x128xi32>
    %1218 = arith.cmpi eq, %2, %1217 : vector<8x128xi32>
    %c226 = arith.constant 226 : index
    %1219 = memref.load %arg1[%c226] : memref<256xf32, #tpu.memory_space<smem>>
    %1220 = vector.broadcast %1219 : f32 to vector<8x128xf32>
    %1221 = arith.select %1218, %1220, %1216 : vector<8x128xi1>, vector<8x128xf32>
    %c227_i32 = arith.constant 227 : i32
    %1222 = vector.broadcast %c227_i32 : i32 to vector<8x128xi32>
    %1223 = arith.cmpi eq, %2, %1222 : vector<8x128xi32>
    %c227 = arith.constant 227 : index
    %1224 = memref.load %arg1[%c227] : memref<256xf32, #tpu.memory_space<smem>>
    %1225 = vector.broadcast %1224 : f32 to vector<8x128xf32>
    %1226 = arith.select %1223, %1225, %1221 : vector<8x128xi1>, vector<8x128xf32>
    %c228_i32 = arith.constant 228 : i32
    %1227 = vector.broadcast %c228_i32 : i32 to vector<8x128xi32>
    %1228 = arith.cmpi eq, %2, %1227 : vector<8x128xi32>
    %c228 = arith.constant 228 : index
    %1229 = memref.load %arg1[%c228] : memref<256xf32, #tpu.memory_space<smem>>
    %1230 = vector.broadcast %1229 : f32 to vector<8x128xf32>
    %1231 = arith.select %1228, %1230, %1226 : vector<8x128xi1>, vector<8x128xf32>
    %c229_i32 = arith.constant 229 : i32
    %1232 = vector.broadcast %c229_i32 : i32 to vector<8x128xi32>
    %1233 = arith.cmpi eq, %2, %1232 : vector<8x128xi32>
    %c229 = arith.constant 229 : index
    %1234 = memref.load %arg1[%c229] : memref<256xf32, #tpu.memory_space<smem>>
    %1235 = vector.broadcast %1234 : f32 to vector<8x128xf32>
    %1236 = arith.select %1233, %1235, %1231 : vector<8x128xi1>, vector<8x128xf32>
    %c230_i32 = arith.constant 230 : i32
    %1237 = vector.broadcast %c230_i32 : i32 to vector<8x128xi32>
    %1238 = arith.cmpi eq, %2, %1237 : vector<8x128xi32>
    %c230 = arith.constant 230 : index
    %1239 = memref.load %arg1[%c230] : memref<256xf32, #tpu.memory_space<smem>>
    %1240 = vector.broadcast %1239 : f32 to vector<8x128xf32>
    %1241 = arith.select %1238, %1240, %1236 : vector<8x128xi1>, vector<8x128xf32>
    %c231_i32 = arith.constant 231 : i32
    %1242 = vector.broadcast %c231_i32 : i32 to vector<8x128xi32>
    %1243 = arith.cmpi eq, %2, %1242 : vector<8x128xi32>
    %c231 = arith.constant 231 : index
    %1244 = memref.load %arg1[%c231] : memref<256xf32, #tpu.memory_space<smem>>
    %1245 = vector.broadcast %1244 : f32 to vector<8x128xf32>
    %1246 = arith.select %1243, %1245, %1241 : vector<8x128xi1>, vector<8x128xf32>
    %c232_i32 = arith.constant 232 : i32
    %1247 = vector.broadcast %c232_i32 : i32 to vector<8x128xi32>
    %1248 = arith.cmpi eq, %2, %1247 : vector<8x128xi32>
    %c232 = arith.constant 232 : index
    %1249 = memref.load %arg1[%c232] : memref<256xf32, #tpu.memory_space<smem>>
    %1250 = vector.broadcast %1249 : f32 to vector<8x128xf32>
    %1251 = arith.select %1248, %1250, %1246 : vector<8x128xi1>, vector<8x128xf32>
    %c233_i32 = arith.constant 233 : i32
    %1252 = vector.broadcast %c233_i32 : i32 to vector<8x128xi32>
    %1253 = arith.cmpi eq, %2, %1252 : vector<8x128xi32>
    %c233 = arith.constant 233 : index
    %1254 = memref.load %arg1[%c233] : memref<256xf32, #tpu.memory_space<smem>>
    %1255 = vector.broadcast %1254 : f32 to vector<8x128xf32>
    %1256 = arith.select %1253, %1255, %1251 : vector<8x128xi1>, vector<8x128xf32>
    %c234_i32 = arith.constant 234 : i32
    %1257 = vector.broadcast %c234_i32 : i32 to vector<8x128xi32>
    %1258 = arith.cmpi eq, %2, %1257 : vector<8x128xi32>
    %c234 = arith.constant 234 : index
    %1259 = memref.load %arg1[%c234] : memref<256xf32, #tpu.memory_space<smem>>
    %1260 = vector.broadcast %1259 : f32 to vector<8x128xf32>
    %1261 = arith.select %1258, %1260, %1256 : vector<8x128xi1>, vector<8x128xf32>
    %c235_i32 = arith.constant 235 : i32
    %1262 = vector.broadcast %c235_i32 : i32 to vector<8x128xi32>
    %1263 = arith.cmpi eq, %2, %1262 : vector<8x128xi32>
    %c235 = arith.constant 235 : index
    %1264 = memref.load %arg1[%c235] : memref<256xf32, #tpu.memory_space<smem>>
    %1265 = vector.broadcast %1264 : f32 to vector<8x128xf32>
    %1266 = arith.select %1263, %1265, %1261 : vector<8x128xi1>, vector<8x128xf32>
    %c236_i32 = arith.constant 236 : i32
    %1267 = vector.broadcast %c236_i32 : i32 to vector<8x128xi32>
    %1268 = arith.cmpi eq, %2, %1267 : vector<8x128xi32>
    %c236 = arith.constant 236 : index
    %1269 = memref.load %arg1[%c236] : memref<256xf32, #tpu.memory_space<smem>>
    %1270 = vector.broadcast %1269 : f32 to vector<8x128xf32>
    %1271 = arith.select %1268, %1270, %1266 : vector<8x128xi1>, vector<8x128xf32>
    %c237_i32 = arith.constant 237 : i32
    %1272 = vector.broadcast %c237_i32 : i32 to vector<8x128xi32>
    %1273 = arith.cmpi eq, %2, %1272 : vector<8x128xi32>
    %c237 = arith.constant 237 : index
    %1274 = memref.load %arg1[%c237] : memref<256xf32, #tpu.memory_space<smem>>
    %1275 = vector.broadcast %1274 : f32 to vector<8x128xf32>
    %1276 = arith.select %1273, %1275, %1271 : vector<8x128xi1>, vector<8x128xf32>
    %c238_i32 = arith.constant 238 : i32
    %1277 = vector.broadcast %c238_i32 : i32 to vector<8x128xi32>
    %1278 = arith.cmpi eq, %2, %1277 : vector<8x128xi32>
    %c238 = arith.constant 238 : index
    %1279 = memref.load %arg1[%c238] : memref<256xf32, #tpu.memory_space<smem>>
    %1280 = vector.broadcast %1279 : f32 to vector<8x128xf32>
    %1281 = arith.select %1278, %1280, %1276 : vector<8x128xi1>, vector<8x128xf32>
    %c239_i32 = arith.constant 239 : i32
    %1282 = vector.broadcast %c239_i32 : i32 to vector<8x128xi32>
    %1283 = arith.cmpi eq, %2, %1282 : vector<8x128xi32>
    %c239 = arith.constant 239 : index
    %1284 = memref.load %arg1[%c239] : memref<256xf32, #tpu.memory_space<smem>>
    %1285 = vector.broadcast %1284 : f32 to vector<8x128xf32>
    %1286 = arith.select %1283, %1285, %1281 : vector<8x128xi1>, vector<8x128xf32>
    %c240_i32 = arith.constant 240 : i32
    %1287 = vector.broadcast %c240_i32 : i32 to vector<8x128xi32>
    %1288 = arith.cmpi eq, %2, %1287 : vector<8x128xi32>
    %c240 = arith.constant 240 : index
    %1289 = memref.load %arg1[%c240] : memref<256xf32, #tpu.memory_space<smem>>
    %1290 = vector.broadcast %1289 : f32 to vector<8x128xf32>
    %1291 = arith.select %1288, %1290, %1286 : vector<8x128xi1>, vector<8x128xf32>
    %c241_i32 = arith.constant 241 : i32
    %1292 = vector.broadcast %c241_i32 : i32 to vector<8x128xi32>
    %1293 = arith.cmpi eq, %2, %1292 : vector<8x128xi32>
    %c241 = arith.constant 241 : index
    %1294 = memref.load %arg1[%c241] : memref<256xf32, #tpu.memory_space<smem>>
    %1295 = vector.broadcast %1294 : f32 to vector<8x128xf32>
    %1296 = arith.select %1293, %1295, %1291 : vector<8x128xi1>, vector<8x128xf32>
    %c242_i32 = arith.constant 242 : i32
    %1297 = vector.broadcast %c242_i32 : i32 to vector<8x128xi32>
    %1298 = arith.cmpi eq, %2, %1297 : vector<8x128xi32>
    %c242 = arith.constant 242 : index
    %1299 = memref.load %arg1[%c242] : memref<256xf32, #tpu.memory_space<smem>>
    %1300 = vector.broadcast %1299 : f32 to vector<8x128xf32>
    %1301 = arith.select %1298, %1300, %1296 : vector<8x128xi1>, vector<8x128xf32>
    %c243_i32 = arith.constant 243 : i32
    %1302 = vector.broadcast %c243_i32 : i32 to vector<8x128xi32>
    %1303 = arith.cmpi eq, %2, %1302 : vector<8x128xi32>
    %c243 = arith.constant 243 : index
    %1304 = memref.load %arg1[%c243] : memref<256xf32, #tpu.memory_space<smem>>
    %1305 = vector.broadcast %1304 : f32 to vector<8x128xf32>
    %1306 = arith.select %1303, %1305, %1301 : vector<8x128xi1>, vector<8x128xf32>
    %c244_i32 = arith.constant 244 : i32
    %1307 = vector.broadcast %c244_i32 : i32 to vector<8x128xi32>
    %1308 = arith.cmpi eq, %2, %1307 : vector<8x128xi32>
    %c244 = arith.constant 244 : index
    %1309 = memref.load %arg1[%c244] : memref<256xf32, #tpu.memory_space<smem>>
    %1310 = vector.broadcast %1309 : f32 to vector<8x128xf32>
    %1311 = arith.select %1308, %1310, %1306 : vector<8x128xi1>, vector<8x128xf32>
    %c245_i32 = arith.constant 245 : i32
    %1312 = vector.broadcast %c245_i32 : i32 to vector<8x128xi32>
    %1313 = arith.cmpi eq, %2, %1312 : vector<8x128xi32>
    %c245 = arith.constant 245 : index
    %1314 = memref.load %arg1[%c245] : memref<256xf32, #tpu.memory_space<smem>>
    %1315 = vector.broadcast %1314 : f32 to vector<8x128xf32>
    %1316 = arith.select %1313, %1315, %1311 : vector<8x128xi1>, vector<8x128xf32>
    %c246_i32 = arith.constant 246 : i32
    %1317 = vector.broadcast %c246_i32 : i32 to vector<8x128xi32>
    %1318 = arith.cmpi eq, %2, %1317 : vector<8x128xi32>
    %c246 = arith.constant 246 : index
    %1319 = memref.load %arg1[%c246] : memref<256xf32, #tpu.memory_space<smem>>
    %1320 = vector.broadcast %1319 : f32 to vector<8x128xf32>
    %1321 = arith.select %1318, %1320, %1316 : vector<8x128xi1>, vector<8x128xf32>
    %c247_i32 = arith.constant 247 : i32
    %1322 = vector.broadcast %c247_i32 : i32 to vector<8x128xi32>
    %1323 = arith.cmpi eq, %2, %1322 : vector<8x128xi32>
    %c247 = arith.constant 247 : index
    %1324 = memref.load %arg1[%c247] : memref<256xf32, #tpu.memory_space<smem>>
    %1325 = vector.broadcast %1324 : f32 to vector<8x128xf32>
    %1326 = arith.select %1323, %1325, %1321 : vector<8x128xi1>, vector<8x128xf32>
    %c248_i32 = arith.constant 248 : i32
    %1327 = vector.broadcast %c248_i32 : i32 to vector<8x128xi32>
    %1328 = arith.cmpi eq, %2, %1327 : vector<8x128xi32>
    %c248 = arith.constant 248 : index
    %1329 = memref.load %arg1[%c248] : memref<256xf32, #tpu.memory_space<smem>>
    %1330 = vector.broadcast %1329 : f32 to vector<8x128xf32>
    %1331 = arith.select %1328, %1330, %1326 : vector<8x128xi1>, vector<8x128xf32>
    %c249_i32 = arith.constant 249 : i32
    %1332 = vector.broadcast %c249_i32 : i32 to vector<8x128xi32>
    %1333 = arith.cmpi eq, %2, %1332 : vector<8x128xi32>
    %c249 = arith.constant 249 : index
    %1334 = memref.load %arg1[%c249] : memref<256xf32, #tpu.memory_space<smem>>
    %1335 = vector.broadcast %1334 : f32 to vector<8x128xf32>
    %1336 = arith.select %1333, %1335, %1331 : vector<8x128xi1>, vector<8x128xf32>
    %c250_i32 = arith.constant 250 : i32
    %1337 = vector.broadcast %c250_i32 : i32 to vector<8x128xi32>
    %1338 = arith.cmpi eq, %2, %1337 : vector<8x128xi32>
    %c250 = arith.constant 250 : index
    %1339 = memref.load %arg1[%c250] : memref<256xf32, #tpu.memory_space<smem>>
    %1340 = vector.broadcast %1339 : f32 to vector<8x128xf32>
    %1341 = arith.select %1338, %1340, %1336 : vector<8x128xi1>, vector<8x128xf32>
    %c251_i32 = arith.constant 251 : i32
    %1342 = vector.broadcast %c251_i32 : i32 to vector<8x128xi32>
    %1343 = arith.cmpi eq, %2, %1342 : vector<8x128xi32>
    %c251 = arith.constant 251 : index
    %1344 = memref.load %arg1[%c251] : memref<256xf32, #tpu.memory_space<smem>>
    %1345 = vector.broadcast %1344 : f32 to vector<8x128xf32>
    %1346 = arith.select %1343, %1345, %1341 : vector<8x128xi1>, vector<8x128xf32>
    %c252_i32 = arith.constant 252 : i32
    %1347 = vector.broadcast %c252_i32 : i32 to vector<8x128xi32>
    %1348 = arith.cmpi eq, %2, %1347 : vector<8x128xi32>
    %c252 = arith.constant 252 : index
    %1349 = memref.load %arg1[%c252] : memref<256xf32, #tpu.memory_space<smem>>
    %1350 = vector.broadcast %1349 : f32 to vector<8x128xf32>
    %1351 = arith.select %1348, %1350, %1346 : vector<8x128xi1>, vector<8x128xf32>
    %c253_i32 = arith.constant 253 : i32
    %1352 = vector.broadcast %c253_i32 : i32 to vector<8x128xi32>
    %1353 = arith.cmpi eq, %2, %1352 : vector<8x128xi32>
    %c253 = arith.constant 253 : index
    %1354 = memref.load %arg1[%c253] : memref<256xf32, #tpu.memory_space<smem>>
    %1355 = vector.broadcast %1354 : f32 to vector<8x128xf32>
    %1356 = arith.select %1353, %1355, %1351 : vector<8x128xi1>, vector<8x128xf32>
    %c254_i32 = arith.constant 254 : i32
    %1357 = vector.broadcast %c254_i32 : i32 to vector<8x128xi32>
    %1358 = arith.cmpi eq, %2, %1357 : vector<8x128xi32>
    %c254 = arith.constant 254 : index
    %1359 = memref.load %arg1[%c254] : memref<256xf32, #tpu.memory_space<smem>>
    %1360 = vector.broadcast %1359 : f32 to vector<8x128xf32>
    %1361 = arith.select %1358, %1360, %1356 : vector<8x128xi1>, vector<8x128xf32>
    %c255_i32 = arith.constant 255 : i32
    %1362 = vector.broadcast %c255_i32 : i32 to vector<8x128xi32>
    %1363 = arith.cmpi eq, %2, %1362 : vector<8x128xi32>
    %c255 = arith.constant 255 : index
    %1364 = memref.load %arg1[%c255] : memref<256xf32, #tpu.memory_space<smem>>
    %1365 = vector.broadcast %1364 : f32 to vector<8x128xf32>
    %1366 = arith.select %1363, %1365, %1361 : vector<8x128xi1>, vector<8x128xf32>
    %1367 = arith.addf %726, %1366 : vector<8x128xf32>
    %cst_42 = arith.constant 0.000000e+00 : f32
    %1368 = vector.broadcast %cst_42 : f32 to vector<8x128xf32>
    %1369 = arith.cmpf ogt, %0, %1368 : vector<8x128xf32>
    %1370 = arith.subf %0, %1 : vector<8x128xf32>
    %cst_43 = arith.constant 0.000000e+00 : f32
    %1371 = vector.broadcast %cst_43 : f32 to vector<8x128xf32>
    %1372 = arith.select %1369, %1370, %1371 : vector<8x128xi1>, vector<8x128xf32>
    %cst_44 = arith.constant 0.000000e+00 : f32
    %1373 = vector.broadcast %cst_44 : f32 to vector<8x128xf32>
    %1374 = arith.subf %1373, %84 : vector<8x128xf32>
    %1375 = arith.mulf %1374, %1372 : vector<8x128xf32>
    %1376 = math.exp %1375 : vector<8x128xf32>
    %1377 = arith.mulf %1367, %1376 : vector<8x128xf32>
    %cst_45 = arith.constant 0.000000e+00 : f32
    %1378 = vector.broadcast %cst_45 : f32 to vector<8x128xf32>
    %1379 = arith.select %1369, %1377, %1378 : vector<8x128xi1>, vector<8x128xf32>
    %c0_46 = arith.constant 0 : index
    %c0_47 = arith.constant 0 : index
    %1380 = vector.load %arg7[%c0_46, %c0_47] : memref<8x128xf32, #tpu.memory_space<vmem>>, vector<8x128xf32>
    tpu.vector_store %arg7[%c0_46, %c0_47], %1379 {strides = array<i32>} : memref<8x128xf32, #tpu.memory_space<vmem>>, vector<8x128xf32>,
    return
  }
  func.func @transform_0(%arg0: i32, %arg1: memref<256xf32, #tpu.memory_space<smem>>, %arg2: memref<16xf32, #tpu.memory_space<smem>>) -> (i32, i32) {
    %c0_i32 = arith.constant 0 : i32
    %c0_i32_0 = arith.constant 0 : i32
    return %arg0, %c0_i32 : i32, i32
  }
  func.func @transform_1(%arg0: i32, %arg1: memref<256xf32, #tpu.memory_space<smem>>, %arg2: memref<16xf32, #tpu.memory_space<smem>>) -> (i32, i32) {
    %c0_i32 = arith.constant 0 : i32
    %c0_i32_0 = arith.constant 0 : i32
    return %arg0, %c0_i32 : i32, i32
  }
  func.func @transform_2(%arg0: i32, %arg1: memref<256xf32, #tpu.memory_space<smem>>, %arg2: memref<16xf32, #tpu.memory_space<smem>>) -> (i32, i32) {
    %c0_i32 = arith.constant 0 : i32
    %c0_i32_0 = arith.constant 0 : i32
    return %arg0, %c0_i32 : i32, i32
  }
  func.func @transform_3(%arg0: i32, %arg1: memref<256xf32, #tpu.memory_space<smem>>, %arg2: memref<16xf32, #tpu.memory_space<smem>>) -> (i32, i32) {
    %c0_i32 = arith.constant 0 : i32
    %c0_i32_0 = arith.constant 0 : i32
    return %arg0, %c0_i32 : i32, i32
  }
  func.func @transform_4(%arg0: i32, %arg1: memref<256xf32, #tpu.memory_space<smem>>, %arg2: memref<16xf32, #tpu.memory_space<smem>>) -> (i32, i32) {
    %c0_i32 = arith.constant 0 : i32
    %c0_i32_0 = arith.constant 0 : i32
    return %arg0, %c0_i32 : i32, i32
  }
}

</mosaic_0001>

<bundles_post_ra>
// kernel: tpu_custom_call.1
= control target key start
LH: loop header
LB: loop body
LE: loop exit
PB: predicated region body
PF: predicated region fallthrough
CT: control target
= control target key end

     0   :  { %s2150_s21 = smov [#allocation3]   ;;  %s3492_s0 = inlined_call_operand.hbm [shape: f32[256], index: 0, kind: input, shape index: {}]   ;;  %s3493_s2 = inlined_call_operand.hbm [shape: f32[16,128], index: 2, kind: input, shape index: {}]   ;;  %s3494_s3 = inlined_call_operand.hbm [shape: f32[16,128], index: 3, kind: input, shape index: {}]   ;;  %s3495_s4 = inlined_call_operand.hbm [shape: s32[16,128], index: 4, kind: input, shape index: {}]   ;;  %s3496_s5 = inlined_call_operand.hbm [shape: s32[16,128], index: 5, kind: input, shape index: {}]   ;;  %s3497_s6 = inlined_call_operand.hbm [shape: f32[16,128], index: 6, kind: output, shape index: {}]   ;;  %s3498_s1 = inlined_call_operand.vmem [shape: f32[16], index: 1, kind: input, shape index: {}]  }
   0x1   :  { %3517 = sst [smem:[#allocation51_spill]] %s3493_s2  ;;  %s13_s26 = sshll.u32 %s3498_s1, 4  ;;  %s14_s26 = int_to_ptr.vmem [resolvable:$true] %s13_s26 }
   0x2   :  { %3518 = sst [smem:[#allocation52_spill]] %s3494_s3  ;;  %s1950_s27 = scalar_lea.vmem %s14_s26, 16 }
   0x3   :  { %3519 = sst [smem:[#allocation53_spill]] %s3495_s4  ;;  %p1951_p0 = scmp.ne.s32.totalorder %s14_s26, %s1950_s27 }
   0x4   :  { %3520 = sst [smem:[#allocation54_spill]] %s3496_s5  ;;  %p1955_p1 = scmp.lt.s32.totalorder %s14_s26, %s14_s26 }
   0x5   :  { %3521 = sst [smem:[#allocation55_spill]] %s3497_s6  ;;  %p1956_p2 = scmp.lt.s32.totalorder %s1950_s27, %s1950_s27 }
   0x6   :  { %12 = dma.hbm_to_smem %s3492_s0, 32, %s2150_s21, [#allocation2] }
   0x7   :  { %p1957_p3 = por %p1956_p2, %p1955_p1 }
   0x9   :  { %p1958_p4 = pnand %p1957_p3, %p1951_p0 }
   0xb   :  { %1961 = shalt.err (!%p1958_p4)  }
   0xc   :  { %s2151_s28 = smov [#allocation4]  }
   0xd   :  { %16 = dma.vmem_to_smem %s14_s26, 16, %s2151_s28, [#allocation2] }
   0xe   :  { %2116 = dma.done.wait [#allocation2], 48 }
   0xf   :  { %2117 = vsyncadd [#allocation2], 4294967248 }
  0x10   :  { %18 = sfence }
  0x11   :  { %19 = vsyncpa [#allocation6], 0 }
  0x12   :  { %21 = vsyncpa [#allocation6 + $0x1], 0 }
  0x13   :  { %22 = vsyncpa [#allocation9], 0 }
  0x14   :  { %24 = vsyncpa [#allocation9 + $0x1], 0 }
  0x15   :  { %25 = vsyncpa [#allocation12], 0 }
  0x16   :  { %27 = vsyncpa [#allocation12 + $0x1], 0 }
  0x17   :  { %28 = vsyncpa [#allocation7], 0 }
  0x18   :  { %30 = vsyncpa [#allocation7 + $0x1], 0  ;;  %s2198_s0 = smov 0   ;;  %s2200_s1 = smov 0  }
  0x19   :  { %s2202_s29 = smov 0   ;;  %s2204_s30 = smov 0  }
  0x1a LB: > { %3522 = sst [smem:[#allocation19_spill]] %s2136_s0  ;;  %s2219_s7 = sadd.s32 4294967295, %s2148_s30   ;;  %s2148_s30 = sphi %s2204_s30, %s3610_s30   ;;  %s2144_s29 = sphi %s2202_s29, %s3613_s29   ;;  %s2140_s1 = sphi %s2200_s1, %s3612_s1   ;;  %s2136_s0 = sphi %s2198_s0, %s3611_s0  }
  0x1b   : > { %3523 = sst [smem:[#allocation20_spill]] %s2140_s1  ;;  %s1584_s8 = sadd.s32 4294967294, %s2148_s30  }
  0x1c   : > { %3524 = sst [smem:[#allocation21_spill]] %s2144_s29  ;;  %s2223_s9 = sadd.s32 1, %s2148_s30  }
  0x1d   : > { %3525 = sst [smem:[#allocation22_spill]] %s2148_s30  ;;  %s43_s10 = sadd.s32 1, %s2144_s29 }
  0x1e   : > { %3526 = sst [smem:[#allocation23_spill]] %s2219_s7  ;;  %s40_s11 = ssub.s32 %s2148_s30, %s2223_s9 }
  0x1f   : > { %3527 = sst [smem:[#allocation24_spill]] %s2223_s9  ;;  %p50_p5 = scmp.ne.s32.totalorder %s2144_s29, %s2140_s1 }
  0x20   : > { %p41_p6 = scmp.eq.s32.totalorder %s40_s11, 0  ;;  %p51_p7 = scmp.eq.s32.totalorder %s2148_s30, 0 }
  0x21   : > { %p56_p8 = scmp.ne.s32.totalorder %s2140_s1, %s2136_s0  ;;  %p57_p9 = scmp.eq.s32.totalorder %s2219_s7, 0 }
  0x22   : > { %s2235_s12 = scalar_select %p41_p6, %s2144_s29, %s43_s10  }
  0x23   : > { %p52_p10 = por %p51_p7, %p50_p5  ;;  %p2237_p11 = por %p57_p9, %p56_p8 }
  0x24   : > { %3528 = sst [smem:[#allocation25_spill]] %s2235_s12  ;;  %p158_p12 = scmp.eq.s32.totalorder %s2219_s7, 1 }
  0x25   : > { %s3529_s13 = scalar_select %p2237_p11, 1, 0 }
  0x26   : > { %p164_p13 = scmp.eq.s32.totalorder %s1584_s8, 1  ;;  %p1902_p1 = scmp.lt.s32.totalorder %s2148_s30, 2 }
  0x27   : > { %p2244_p2 = por %p158_p12, %p50_p5  ;;  %s2253_s16 = sand.u32 1, %s2144_s29  }
  0x28   : > { %p2248_p3 = por %p164_p13, %p56_p8  ;;  %s2256_s17 = sshll.u32 %s2148_s30, 7 }
  0x29   : > { %s3530_s14 = scalar_select %p2244_p2, 1, 0 }
  0x2a   : > { %s3532_s15 = scalar_select %p2248_p3, 1, 0 }
  0x2b   : > { %3531 = sst [smem:[#allocation26_spill]] %s3530_s14  ;;  %s2259_s18 = sshll.u32 %s2253_s16, 3 }
  0x2c   : > { %3533 = sst [smem:[#allocation27_spill]] %s3532_s15  ;;  %p2261_p4 = pnand %p1902_p1, %p52_p10 }
  0x2d   : > { %s202_s20 = sand.u32 1, %s2148_s30   ;;  %s3535_s3 = sld [smem:[#allocation52_spill]] }
  0x2e   : > { %s206_s24 = scalar_lea.vmem [#allocation8], %s2259_s18  ;;  %s2274_s26 = scalar_lea.sflag [#allocation9], %s202_s20 }
  0x2f   : > { %s213_s25 = sshll.u32 %s206_s24, 4  ;;  %p2280_p7 = pneg %p2261_p4  ;;  %s214_s25 = int_to_ptr.vmem [resolvable:$true] %s213_s25 }
  0x33   : > { %s2270_s23 = scalar_lea.hbm %s3535_s3, %s2256_s17  ;;  %s1967_s11 = scalar_lea.hbm %s3535_s3, 256 }
  0x34   : > { %s1962_s27 = scalar_lea.hbm %s2270_s23, 128  ;;  %p1968_p10 = scmp.lt.s32.totalorder %s2270_s23, %s3535_s3 }
  0x35   : > { %p1963_p6 = scmp.ne.s32.totalorder %s2270_s23, %s1962_s27  ;;  %p1969_p12 = scmp.lt.s32.totalorder %s1967_s11, %s1962_s27 }
  0x37   : > { %p1965_p8 = pnand %p2280_p7, %p1963_p6  ;;  %p1970_p13 = por %p1969_p12, %p1968_p10 }
  0x39   : > { %p1966_p9 = pneg %p1965_p8 }
  0x3b   : > { %p1971_p1 = pnand %p1970_p13, %p1966_p9 }
  0x3d   : > { %1974 = shalt.err (!%p1971_p1)
}
  0x3e   : > { %s1975_s20 = scalar_lea.vmem %s214_s25, 128  ;;  %s2152_s24 = smov [#allocation8]  }
  0x3f   : > { %p1976_p0 = scmp.ne.s32.totalorder %s214_s25, %s1975_s20  ;;  %s1980_s12 = sshll.u32 %s2152_s24, 4  ;;  %s1981_s12 = int_to_ptr.vmem [resolvable:$false] %s1980_s12 }
  0x40   : > { %s1982_s29 = scalar_lea.vmem %s1981_s12, 256  ;;  %p1983_p6 = scmp.lt.s32.totalorder %s214_s25, %s1981_s12 }
  0x41   : > { %p1978_p5 = pnand %p1976_p0, %p2280_p7  ;;  %p1984_p8 = scmp.lt.s32.totalorder %s1982_s29, %s1975_s20 }
  0x43   : > { %p1979_p3 = pneg %p1978_p5  ;;  %p1985_p2 = por %p1984_p8, %p1983_p6 }
  0x45   : > { %p1986_p11 = pnand %p1985_p2, %p1979_p3 }
  0x47   : > { %1989 = shalt.err (!%p1986_p11)
}
  0x48   : > { %1891 = dma.hbm_to_vmem [thread:$0]  (!%p2261_p4), %s2270_s23, 128, %s214_s25, %s2274_s26  }
  0x49   : > { %p254_p0 = scmp.lt.s32.totalorder %s2148_s30, 3  ;;  %s3537_s2 = sld [smem:[#allocation51_spill]] }
  0x4a   : > { %p3538_p5 = scmp.ge.s32.totalorder %s2148_s30, 1  ;;  %s188_s10 = scalar_lea.vmem [#allocation5], %s2259_s18 }
  0x4b   : > { %s195_s11 = sshll.u32 %s188_s10, 4  ;;  %s185_s21 = scalar_lea.sflag [#allocation6], %s2253_s16  ;;  %s196_s11 = int_to_ptr.vmem [resolvable:$true] %s195_s11 }
  0x4c   : > { %p2308_p11 = pnand %p3538_p5, %p254_p0 }
  0x4e   : > { %s3539_s29 = scalar_select %p2308_p11, 1, 0 }
  0x4f   : > { %s2304_s12 = scalar_lea.hbm %s3537_s2, %s2256_s17  ;;  %s1995_s20 = scalar_lea.hbm %s3537_s2, 256 }
  0x50   : > { %s1990_s22 = scalar_lea.hbm %s2304_s12, 128  ;;  %p1996_p10 = scmp.lt.s32.totalorder %s2304_s12, %s3537_s2 }
  0x51   : > { %p1991_p2 = scmp.ne.s32.totalorder %s2304_s12, %s1990_s22  ;;  %p1997_p12 = scmp.lt.s32.totalorder %s1995_s20, %s1990_s22 }
  0x53   : > { %p1993_p3 = pnand %p1991_p2, %p2280_p7  ;;  %p1998_p13 = por %p1997_p12, %p1996_p10 }
  0x55   : > { %p1994_p9 = pneg %p1993_p3 }
  0x57   : > { %p1999_p1 = pnand %p1998_p13, %p1994_p9 }
  0x59   : > { %2002 = shalt.err (!%p1999_p1)
}
  0x5a   : > { %s2003_s8 = scalar_lea.vmem %s196_s11, 128  ;;  %s2153_s10 = smov [#allocation5]  }
  0x5b   : > { %p2004_p6 = scmp.ne.s32.totalorder %s196_s11, %s2003_s8  ;;  %s2008_s3 = sshll.u32 %s2153_s10, 4  ;;  %s2009_s3 = int_to_ptr.vmem [resolvable:$false] %s2008_s3 }
  0x5c   : > { %s2010_s9 = scalar_lea.vmem %s2009_s3, 256  ;;  %p2011_p5 = scmp.lt.s32.totalorder %s196_s11, %s2009_s3 }
  0x5d   : > { %p2006_p8 = pnand %p2004_p6, %p2280_p7  ;;  %p2012_p2 = scmp.lt.s32.totalorder %s2010_s9, %s2003_s8 }
  0x5f   : > { %p2007_p0 = pneg %p2006_p8  ;;  %p2013_p3 = por %p2012_p2, %p2011_p5 }
  0x61   : > { %p2014_p11 = pnand %p2013_p3, %p2007_p0 }
  0x63   : > { %2017 = shalt.err (!%p2014_p11)
}
  0x64   : > { %1888 = dma.hbm_to_vmem [thread:$0]  (!%p2261_p4), %s2304_s12, 128, %s196_s11, %s185_s21  }
  0x65   : > { %s3540_s4 = sld [smem:[#allocation53_spill]]  ;;  %s224_s20 = scalar_lea.vmem [#allocation10], %s2259_s18 }
  0x66   : > { %s231_s24 = sshll.u32 %s224_s20, 4  ;;  %s232_s24 = int_to_ptr.vmem [resolvable:$true] %s231_s24 }
  0x6b   : > { %s229_s25 = scalar_lea.hbm %s3540_s4, %s2256_s17  ;;  %s2023_s8 = scalar_lea.hbm %s3540_s4, 256 }
  0x6c   : > { %s2018_s27 = scalar_lea.hbm %s229_s25, 128  ;;  %p2024_p11 = scmp.lt.s32.totalorder %s229_s25, %s3540_s4 }
  0x6d   : > { %p2019_p9 = scmp.ne.s32.totalorder %s229_s25, %s2018_s27  ;;  %p2025_p13 = scmp.lt.s32.totalorder %s2023_s8, %s2018_s27 }
  0x6f   : > { %p2021_p10 = pnand %p2019_p9, %p2280_p7  ;;  %p2026_p1 = por %p2025_p13, %p2024_p11 }
  0x71   : > { %p2022_p12 = pneg %p2021_p10 }
  0x73   : > { %p2027_p6 = pnand %p2026_p1, %p2022_p12 }
  0x75   : > { %2030 = shalt.err (!%p2027_p6)
}
  0x76   : > { %s2031_s12 = scalar_lea.vmem %s232_s24, 128  ;;  %s2154_s11 = smov [#allocation10]  }
  0x77   : > { %p2032_p8 = scmp.ne.s32.totalorder %s232_s24, %s2031_s12  ;;  %s2036_s21 = sshll.u32 %s2154_s11, 4  ;;  %s2037_s21 = int_to_ptr.vmem [resolvable:$false] %s2036_s21 }
  0x78   : > { %s2038_s22 = scalar_lea.vmem %s2037_s21, 256  ;;  %p2039_p2 = scmp.lt.s32.totalorder %s232_s24, %s2037_s21 }
  0x79   : > { %p2034_p0 = pnand %p2032_p8, %p2280_p7  ;;  %p2040_p3 = scmp.lt.s32.totalorder %s2038_s22, %s2031_s12 }
  0x7b   : > { %p2035_p5 = pneg %p2034_p0  ;;  %p2041_p9 = por %p2040_p3, %p2039_p2 }
  0x7d   : > { %p2042_p10 = pnand %p2041_p9, %p2035_p5 }
  0x7f   : > { %2045 = shalt.err (!%p2042_p10)
}
  0x80   : > { %1894 = dma.hbm_to_vmem [thread:$0]  (!%p2261_p4), %s229_s25, 128, %s232_s24, %s2274_s26  }
  0x81   : > { %s3541_s5 = sld [smem:[#allocation54_spill]]  ;;  %s242_s27 = scalar_lea.vmem [#allocation11], %s2259_s18 }
  0x82   : > { %s249_s3 = sshll.u32 %s242_s27, 4  ;;  %s239_s9 = scalar_lea.sflag [#allocation12], %s2253_s16  ;;  %s250_s3 = int_to_ptr.vmem [resolvable:$true] %s249_s3 }
  0x87   : > { %s2352_s20 = scalar_lea.hbm %s3541_s5, %s2256_s17  ;;  %s2051_s26 = scalar_lea.hbm %s3541_s5, 256 }
  0x88   : > { %s2046_s8 = scalar_lea.hbm %s2352_s20, 128  ;;  %p2052_p1 = scmp.lt.s32.totalorder %s2352_s20, %s3541_s5 }
  0x89   : > { %p2047_p12 = scmp.ne.s32.totalorder %s2352_s20, %s2046_s8  ;;  %p2053_p6 = scmp.lt.s32.totalorder %s2051_s26, %s2046_s8 }
  0x8b   : > { %p2049_p11 = pnand %p2047_p12, %p2280_p7  ;;  %p2054_p8 = por %p2053_p6, %p2052_p1 }
  0x8d   : > { %p2050_p13 = pneg %p2049_p11 }
  0x8f   : > { %p2055_p0 = pnand %p2054_p8, %p2050_p13 }
  0x91   : > { %2058 = shalt.err (!%p2055_p0)
}
  0x92   : > { %s2059_s17 = scalar_lea.vmem %s250_s3, 128  ;;  %s2155_s16 = smov [#allocation11]  }
  0x93   : > { %p2060_p5 = scmp.ne.s32.totalorder %s250_s3, %s2059_s17  ;;  %s2064_s18 = sshll.u32 %s2155_s16, 4  ;;  %s2065_s18 = int_to_ptr.vmem [resolvable:$false] %s2064_s18 }
  0x94   : > { %s2066_s11 = scalar_lea.vmem %s2065_s18, 256  ;;  %p2067_p9 = scmp.lt.s32.totalorder %s250_s3, %s2065_s18 }
  0x95   : > { %p2062_p2 = pnand %p2060_p5, %p2280_p7  ;;  %p2068_p10 = scmp.lt.s32.totalorder %s2066_s11, %s2059_s17 }
  0x97   : > { %p2063_p3 = pneg %p2062_p2  ;;  %p2069_p12 = por %p2068_p10, %p2067_p9 }
  0x99   : > { %p2070_p11 = pnand %p2069_p12, %p2063_p3 }
  0x9b   : > { %2073 = shalt.err (!%p2070_p11)
}
  0x9c   : > { %1897 = dma.hbm_to_vmem [thread:$0]  (!%p2261_p4), %s2352_s20, 128, %s250_s3, %s239_s9  }
  0x9d   : > { %p3542_p13 = scmp.ne.s32.totalorder %s3539_s29, 0 }
  0x9f   : > { %258 = sbr.rel (%p3542_p13) target bundleno = 525 (0x20d), region = 36 }
  0xa4   : > { %s2375_s28 = sand.u32 1, %s2140_s1   ;;  %p3545_p7 = scmp.ne.s32.totalorder %s3529_s13, 0 }
  0xa5   : > { %3543 = sst [smem:[#allocation28_spill]] %s2375_s28  ;;  %s2378_s21 = sshll.u32 %s2375_s28, 3 }
  0xa6   : > { %3544 = sst [smem:[#allocation29_spill]] %s2378_s21  ;;  %s261_s22 = scalar_lea.sflag [#allocation6], %s2375_s28 }
  0xa7   : > { %2119 = dma.done.wait (%p3545_p7), %s261_s22, 128  }
  0xa8   : > { %2121 = vsyncadd (%p3545_p7), %s261_s22, 4294967168  ;;  %s269_s19 = sand.u32 1, %s2219_s7  }
  0xa9   : > { %s270_s29 = scalar_lea.sflag [#allocation9], %s269_s19 }
  0xaa   : > { %2123 = dma.done.wait (%p3545_p7), %s270_s29, 256  }
  0xab   : > { %2125 = vsyncadd (%p3545_p7), %s270_s29, 4294967040  ;;  %s2393_s20 = scalar_lea.vmem [#allocation10], %s2378_s21  ;;  %s288_s27 = scalar_lea.sflag [#allocation12], %s2375_s28 }
  0xac   : > { %3546 = sst [smem:[#allocation30_spill]] %s2393_s20 }
  0xad   : > { %2127 = dma.done.wait (%p3545_p7), %s288_s27, 128  }
  0xae   : > { %2129 = vsyncadd (%p3545_p7), %s288_s27, 4294967168  ;;  %s2401_s9 = sld [smem:[#allocation4]]  ;;  %v2434_v0 = vld [vmem:[%s2393_s20] sm:$0xff] }
  0xaf   : > { %s2403_s8 = sld [smem:[#allocation4 + $0x1]]  ;;  %vm399_vm0 = vcmp.eq.s32.totalorder %v2434_v0, 0  ;;  %vm403_vm1 = vcmp.eq.s32.totalorder %v2434_v0, 1  ;;  %vm407_vm2 = vcmp.eq.s32.totalorder %v2434_v0, 2  ;;  %vm411_vm3 = vcmp.eq.s32.totalorder %v2434_v0, 3 }
  0xb0   : > { %s2405_s10 = sld [smem:[#allocation4 + $0x2]]  ;;  %vm415_vm4 = vcmp.eq.s32.totalorder %v2434_v0, 4  ;;  %vm419_vm5 = vcmp.eq.s32.totalorder %v2434_v0, 5  ;;  %vm423_vm6 = vcmp.eq.s32.totalorder %v2434_v0, 6  ;;  %vm427_vm7 = vcmp.eq.s32.totalorder %v2434_v0, 7 }
  0xb1   : > { %s2407_s12 = sld [smem:[#allocation4 + $0x3]]  ;;  %vm431_vm8 = vcmp.eq.s32.totalorder %v2434_v0, 8  ;;  %vm435_vm9 = vcmp.eq.s32.totalorder %v2434_v0, 9  ;;  %vm439_vm10 = vcmp.eq.s32.totalorder %v2434_v0, 10  ;;  %vm443_vm11 = vcmp.eq.s32.totalorder %v2434_v0, 11 }
  0xb2   : > { %s2409_s26 = sld [smem:[#allocation4 + $0x4]]  ;;  %vm447_vm12 = vcmp.eq.s32.totalorder %v2434_v0, 12  ;;  %vm451_vm13 = vcmp.eq.s32.totalorder %v2434_v0, 13  ;;  %vm455_vm14 = vcmp.eq.s32.totalorder %v2434_v0, 14  ;;  %vm459_vm15 = vcmp.eq.s32.totalorder %v2434_v0, 15 }
  0xb3   : > { %s2411_s25 = sld [smem:[#allocation4 + $0x5]] }
  0xb4   : > { %s2413_s24 = sld [smem:[#allocation4 + $0x6]] }
  0xb5   : > { %s2415_s17 = sld [smem:[#allocation4 + $0x7]] }
  0xb6   : > { %s2417_s16 = sld [smem:[#allocation4 + $0x8]] }
  0xb7   : > { %s2419_s13 = sld [smem:[#allocation4 + $0x9]] }
  0xb8   : > { %s2421_s18 = sld [smem:[#allocation4 + $0xa]] }
  0xb9   : > { %s2423_s11 = sld [smem:[#allocation4 + $0xb]] }
  0xba   : > { %s2425_s22 = sld [smem:[#allocation4 + $0xc]] }
  0xbb   : > { %s2427_s19 = sld [smem:[#allocation4 + $0xd]] }
  0xbc   : > { %s2429_s29 = sld [smem:[#allocation4 + $0xe]] }
  0xbd   : > { %s2431_s27 = sld [smem:[#allocation4 + $0xf]] }
  0xbe   : > { %s400_s23 = sld [smem:[#allocation3]] }
  0xbf   : > { %s1616_s2 = sld [smem:[#allocation3 + $0x1]] }
  0xc0   : > { %s1617_s3 = sld [smem:[#allocation3 + $0x2]] }
  0xc1   : > { %3547 = sst [smem:[#allocation31_spill]] %s2427_s19 }
  0xc2   : > { %3548 = sst [smem:[#allocation32_spill]] %s2429_s29 }
  0xc3   : > { %3549 = sst [smem:[#allocation33_spill]] %s2431_s27  ;;  %s3550_s27 = scalar_lea.vmem [#allocation11], %s2378_s21 }
  0xc4   : > { %s1618_s4 = sld [smem:[#allocation3 + $0x3]]  ;;  %v401_v1 = vstv %s400_s23 }
  0xc5   : > { %s1619_s5 = sld [smem:[#allocation3 + $0x4]]  ;;  %v402_v2 = vsel %vm399_vm0, %v401_v1, 0.0  ;;  %v405_v3 = vstv %s1616_s2  ;;  %vm463_vm0 = vcmp.eq.s32.totalorder %v2434_v0, 16 }
  0xc6   : > { %s1620_s1 = sld [smem:[#allocation3 + $0x5]]  ;;  %v406_v4 = vsel %vm403_vm1, %v405_v3, %v402_v2  ;;  %v409_v5 = vstv %s1617_s3  ;;  %vm467_vm1 = vcmp.eq.s32.totalorder %v2434_v0, 17 }
  0xc7   : > { %s1621_s30 = sld [smem:[#allocation3 + $0x6]]  ;;  %v410_v6 = vsel %vm407_vm2, %v409_v5, %v406_v4  ;;  %vm471_vm2 = vcmp.eq.s32.totalorder %v2434_v0, 18 }
  0xc8   : > { %s1622_s15 = sld [smem:[#allocation3 + $0x7]] }
  0xc9   : > { %s1623_s0 = sld [smem:[#allocation3 + $0x8]] }
  0xca   : > { %v413_v7 = vstv %s1618_s4  ;;  %s1624_s6 = sld [smem:[#allocation3 + $0x9]] }
  0xcb   : > { %v414_v8 = vsel %vm411_vm3, %v413_v7, %v410_v6  ;;  %v417_v9 = vstv %s1619_s5  ;;  %s1625_s23 = sld [smem:[#allocation3 + $0xa]]  ;;  %vm475_vm3 = vcmp.eq.s32.totalorder %v2434_v0, 19 }
  0xcc   : > { %v418_v10 = vsel %vm415_vm4, %v417_v9, %v414_v8  ;;  %v421_v11 = vstv %s1620_s1  ;;  %s1626_s2 = sld [smem:[#allocation3 + $0xb]]  ;;  %vm479_vm4 = vcmp.eq.s32.totalorder %v2434_v0, 20 }
  0xcd   : > { %v422_v12 = vsel %vm419_vm5, %v421_v11, %v418_v10  ;;  %v425_v13 = vstv %s1621_s30  ;;  %s1627_s3 = sld [smem:[#allocation3 + $0xc]]  ;;  %vm483_vm5 = vcmp.eq.s32.totalorder %v2434_v0, 21 }
  0xce   : > { %v426_v14 = vsel %vm423_vm6, %v425_v13, %v422_v12  ;;  %v429_v15 = vstv %s1622_s15  ;;  %s1628_s4 = sld [smem:[#allocation3 + $0xd]]  ;;  %vm487_vm6 = vcmp.eq.s32.totalorder %v2434_v0, 22 }
  0xcf   : > { %v430_v16 = vsel %vm427_vm7, %v429_v15, %v426_v14  ;;  %v433_v17 = vstv %s1623_s0  ;;  %s1629_s5 = sld [smem:[#allocation3 + $0xe]]  ;;  %vm491_vm7 = vcmp.eq.s32.totalorder %v2434_v0, 23 }
  0xd0   : > { %v434_v18 = vsel %vm431_vm8, %v433_v17, %v430_v16  ;;  %v437_v19 = vstv %s1624_s6  ;;  %s1630_s1 = sld [smem:[#allocation3 + $0xf]]  ;;  %vm495_vm8 = vcmp.eq.s32.totalorder %v2434_v0, 24 }
  0xd1   : > { %v438_v20 = vsel %vm435_vm9, %v437_v19, %v434_v18  ;;  %v441_v21 = vstv %s1625_s23  ;;  %s1631_s30 = sld [smem:[#allocation3 + $0x10]]  ;;  %vm499_vm9 = vcmp.eq.s32.totalorder %v2434_v0, 25 }
  0xd2   : > { %v442_v22 = vsel %vm439_vm10, %v441_v21, %v438_v20  ;;  %v445_v23 = vstv %s1626_s2  ;;  %s1632_s15 = sld [smem:[#allocation3 + $0x11]]  ;;  %vm503_vm10 = vcmp.eq.s32.totalorder %v2434_v0, 26 }
  0xd3   : > { %v446_v24 = vsel %vm443_vm11, %v445_v23, %v442_v22  ;;  %v449_v25 = vstv %s1627_s3  ;;  %s1633_s0 = sld [smem:[#allocation3 + $0x12]]  ;;  %vm507_vm11 = vcmp.eq.s32.totalorder %v2434_v0, 27 }
  0xd4   : > { %v450_v26 = vsel %vm447_vm12, %v449_v25, %v446_v24  ;;  %v453_v27 = vstv %s1628_s4  ;;  %s1634_s6 = sld [smem:[#allocation3 + $0x13]]  ;;  %vm511_vm12 = vcmp.eq.s32.totalorder %v2434_v0, 28 }
  0xd5   : > { %v454_v28 = vsel %vm451_vm13, %v453_v27, %v450_v26  ;;  %v457_v29 = vstv %s1629_s5  ;;  %s1635_s23 = sld [smem:[#allocation3 + $0x14]]  ;;  %vm515_vm13 = vcmp.eq.s32.totalorder %v2434_v0, 29 }
  0xd6   : > { %v458_v30 = vsel %vm455_vm14, %v457_v29, %v454_v28  ;;  %v461_v31 = vstv %s1630_s1  ;;  %s1636_s2 = sld [smem:[#allocation3 + $0x15]]  ;;  %vm519_vm14 = vcmp.eq.s32.totalorder %v2434_v0, 30 }
  0xd7   : > { %v462_v32 = vsel %vm459_vm15, %v461_v31, %v458_v30  ;;  %v465_v33 = vstv %s1631_s30  ;;  %s1637_s3 = sld [smem:[#allocation3 + $0x16]]  ;;  %vm523_vm15 = vcmp.eq.s32.totalorder %v2434_v0, 31 }
  0xd8   : > { %v466_v34 = vsel %vm463_vm0, %v465_v33, %v462_v32  ;;  %v469_v35 = vstv %s1632_s15  ;;  %s1638_s4 = sld [smem:[#allocation3 + $0x17]]  ;;  %vm527_vm0 = vcmp.eq.s32.totalorder %v2434_v0, 32 }
  0xd9   : > { %v470_v36 = vsel %vm467_vm1, %v469_v35, %v466_v34  ;;  %v473_v37 = vstv %s1633_s0  ;;  %s1639_s5 = sld [smem:[#allocation3 + $0x18]]  ;;  %vm531_vm1 = vcmp.eq.s32.totalorder %v2434_v0, 33 }
  0xda   : > { %v474_v38 = vsel %vm471_vm2, %v473_v37, %v470_v36  ;;  %v477_v39 = vstv %s1634_s6  ;;  %s1640_s1 = sld [smem:[#allocation3 + $0x19]]  ;;  %vm535_vm2 = vcmp.eq.s32.totalorder %v2434_v0, 34 }
  0xdb   : > { %v478_v40 = vsel %vm475_vm3, %v477_v39, %v474_v38  ;;  %v481_v41 = vstv %s1635_s23  ;;  %s1641_s30 = sld [smem:[#allocation3 + $0x1a]]  ;;  %vm539_vm3 = vcmp.eq.s32.totalorder %v2434_v0, 35 }
  0xdc   : > { %v482_v42 = vsel %vm479_vm4, %v481_v41, %v478_v40  ;;  %v485_v43 = vstv %s1636_s2  ;;  %s1642_s15 = sld [smem:[#allocation3 + $0x1b]]  ;;  %vm543_vm4 = vcmp.eq.s32.totalorder %v2434_v0, 36 }
  0xdd   : > { %v486_v44 = vsel %vm483_vm5, %v485_v43, %v482_v42  ;;  %v489_v45 = vstv %s1637_s3  ;;  %s1643_s0 = sld [smem:[#allocation3 + $0x1c]]  ;;  %vm547_vm5 = vcmp.eq.s32.totalorder %v2434_v0, 37 }
  0xde   : > { %v490_v46 = vsel %vm487_vm6, %v489_v45, %v486_v44  ;;  %v493_v47 = vstv %s1638_s4  ;;  %s1644_s6 = sld [smem:[#allocation3 + $0x1d]]  ;;  %vm551_vm6 = vcmp.eq.s32.totalorder %v2434_v0, 38 }
  0xdf   : > { %v494_v48 = vsel %vm491_vm7, %v493_v47, %v490_v46  ;;  %v497_v49 = vstv %s1639_s5  ;;  %s1645_s23 = sld [smem:[#allocation3 + $0x1e]]  ;;  %vm555_vm7 = vcmp.eq.s32.totalorder %v2434_v0, 39 }
  0xe0   : > { %v498_v50 = vsel %vm495_vm8, %v497_v49, %v494_v48  ;;  %v501_v51 = vstv %s1640_s1  ;;  %s1646_s2 = sld [smem:[#allocation3 + $0x1f]]  ;;  %vm559_vm8 = vcmp.eq.s32.totalorder %v2434_v0, 40 }
  0xe1   : > { %v502_v52 = vsel %vm499_vm9, %v501_v51, %v498_v50  ;;  %v505_v53 = vstv %s1641_s30  ;;  %s1647_s3 = sld [smem:[#allocation3 + $0x20]]  ;;  %vm563_vm9 = vcmp.eq.s32.totalorder %v2434_v0, 41 }
  0xe2   : > { %v506_v54 = vsel %vm503_vm10, %v505_v53, %v502_v52  ;;  %v509_v55 = vstv %s1642_s15  ;;  %s1648_s4 = sld [smem:[#allocation3 + $0x21]]  ;;  %vm567_vm10 = vcmp.eq.s32.totalorder %v2434_v0, 42 }
  0xe3   : > { %v510_v56 = vsel %vm507_vm11, %v509_v55, %v506_v54  ;;  %v513_v57 = vstv %s1643_s0  ;;  %s1649_s5 = sld [smem:[#allocation3 + $0x22]]  ;;  %vm571_vm11 = vcmp.eq.s32.totalorder %v2434_v0, 43 }
  0xe4   : > { %v514_v58 = vsel %vm511_vm12, %v513_v57, %v510_v56  ;;  %v517_v59 = vstv %s1644_s6  ;;  %s1650_s1 = sld [smem:[#allocation3 + $0x23]]  ;;  %vm575_vm12 = vcmp.eq.s32.totalorder %v2434_v0, 44 }
  0xe5   : > { %v518_v60 = vsel %vm515_vm13, %v517_v59, %v514_v58  ;;  %v521_v61 = vstv %s1645_s23  ;;  %s1651_s30 = sld [smem:[#allocation3 + $0x24]]  ;;  %vm579_vm13 = vcmp.eq.s32.totalorder %v2434_v0, 45 }
  0xe6   : > { %v522_v62 = vsel %vm519_vm14, %v521_v61, %v518_v60  ;;  %v525_v63 = vstv %s1646_s2  ;;  %s1652_s15 = sld [smem:[#allocation3 + $0x25]]  ;;  %vm583_vm14 = vcmp.eq.s32.totalorder %v2434_v0, 46 }
  0xe7   : > { %v526_v1 = vsel %vm523_vm15, %v525_v63, %v522_v62  ;;  %v529_v2 = vstv %s1647_s3  ;;  %s1653_s0 = sld [smem:[#allocation3 + $0x26]]  ;;  %vm587_vm15 = vcmp.eq.s32.totalorder %v2434_v0, 47 }
  0xe8   : > { %v530_v3 = vsel %vm527_vm0, %v529_v2, %v526_v1  ;;  %v533_v4 = vstv %s1648_s4  ;;  %s1654_s6 = sld [smem:[#allocation3 + $0x27]]  ;;  %vm591_vm0 = vcmp.eq.s32.totalorder %v2434_v0, 48 }
  0xe9   : > { %v534_v5 = vsel %vm531_vm1, %v533_v4, %v530_v3  ;;  %v537_v6 = vstv %s1649_s5  ;;  %s1655_s23 = sld [smem:[#allocation3 + $0x28]]  ;;  %vm595_vm1 = vcmp.eq.s32.totalorder %v2434_v0, 49 }
  0xea   : > { %v538_v7 = vsel %vm535_vm2, %v537_v6, %v534_v5  ;;  %v541_v8 = vstv %s1650_s1  ;;  %s1656_s2 = sld [smem:[#allocation3 + $0x29]]  ;;  %vm599_vm2 = vcmp.eq.s32.totalorder %v2434_v0, 50 }
  0xeb   : > { %v542_v9 = vsel %vm539_vm3, %v541_v8, %v538_v7  ;;  %v545_v10 = vstv %s1651_s30  ;;  %s1657_s3 = sld [smem:[#allocation3 + $0x2a]]  ;;  %vm603_vm3 = vcmp.eq.s32.totalorder %v2434_v0, 51 }
  0xec   : > { %v546_v11 = vsel %vm543_vm4, %v545_v10, %v542_v9  ;;  %v549_v12 = vstv %s1652_s15  ;;  %s1658_s4 = sld [smem:[#allocation3 + $0x2b]]  ;;  %vm607_vm4 = vcmp.eq.s32.totalorder %v2434_v0, 52 }
  0xed   : > { %v550_v13 = vsel %vm547_vm5, %v549_v12, %v546_v11  ;;  %v553_v14 = vstv %s1653_s0  ;;  %s1659_s5 = sld [smem:[#allocation3 + $0x2c]]  ;;  %vm611_vm5 = vcmp.eq.s32.totalorder %v2434_v0, 53  ;;  %v2534_v12 = vld [vmem:[%s3550_s27] sm:$0xff] }
  0xee   : > { %v554_v15 = vsel %vm551_vm6, %v553_v14, %v550_v13  ;;  %v557_v16 = vstv %s1654_s6  ;;  %s1660_s1 = sld [smem:[#allocation3 + $0x2d]]  ;;  %vm615_vm6 = vcmp.eq.s32.totalorder %v2434_v0, 54 }
  0xef   : > { %v558_v17 = vsel %vm555_vm7, %v557_v16, %v554_v15  ;;  %v561_v18 = vstv %s1655_s23  ;;  %s1661_s30 = sld [smem:[#allocation3 + $0x2e]]  ;;  %vm619_vm7 = vcmp.eq.s32.totalorder %v2434_v0, 55  ;;  %v337_v15 = vstv %s2401_s9 }
  0xf0   : > { %v562_v19 = vsel %vm559_vm8, %v561_v18, %v558_v17  ;;  %v565_v20 = vstv %s1656_s2  ;;  %s1662_s15 = sld [smem:[#allocation3 + $0x2f]]  ;;  %vm623_vm8 = vcmp.eq.s32.totalorder %v2434_v0, 56 }
  0xf1   : > { %v566_v21 = vsel %vm563_vm9, %v565_v20, %v562_v19  ;;  %v569_v22 = vstv %s1657_s3  ;;  %s1663_s0 = sld [smem:[#allocation3 + $0x30]]  ;;  %vm627_vm9 = vcmp.eq.s32.totalorder %v2434_v0, 57  ;;  %v341_v19 = vstv %s2403_s8 }
  0xf2   : > { %v570_v23 = vsel %vm567_vm10, %v569_v22, %v566_v21  ;;  %v573_v24 = vstv %s1658_s4  ;;  %s1664_s6 = sld [smem:[#allocation3 + $0x31]]  ;;  %vm631_vm10 = vcmp.eq.s32.totalorder %v2434_v0, 58 }
  0xf3   : > { %v574_v25 = vsel %vm571_vm11, %v573_v24, %v570_v23  ;;  %v577_v26 = vstv %s1659_s5  ;;  %s1665_s23 = sld [smem:[#allocation3 + $0x32]]  ;;  %vm635_vm11 = vcmp.eq.s32.totalorder %v2434_v0, 59  ;;  %v345_v23 = vstv %s2405_s10 }
  0xf4   : > { %v578_v27 = vsel %vm575_vm12, %v577_v26, %v574_v25  ;;  %v581_v28 = vstv %s1660_s1  ;;  %s1666_s2 = sld [smem:[#allocation3 + $0x33]]  ;;  %vm639_vm12 = vcmp.eq.s32.totalorder %v2434_v0, 60 }
  0xf5   : > { %v582_v29 = vsel %vm579_vm13, %v581_v28, %v578_v27  ;;  %v585_v30 = vstv %s1661_s30  ;;  %s1667_s3 = sld [smem:[#allocation3 + $0x34]]  ;;  %vm643_vm13 = vcmp.eq.s32.totalorder %v2434_v0, 61  ;;  %v349_v27 = vstv %s2407_s12 }
  0xf6   : > { %v586_v31 = vsel %vm583_vm14, %v585_v30, %v582_v29  ;;  %v589_v32 = vstv %s1662_s15  ;;  %s1668_s4 = sld [smem:[#allocation3 + $0x35]]  ;;  %vm647_vm14 = vcmp.eq.s32.totalorder %v2434_v0, 62 }
  0xf7   : > { %v590_v33 = vsel %vm587_vm15, %v589_v32, %v586_v31  ;;  %v593_v34 = vstv %s1663_s0  ;;  %s1669_s5 = sld [smem:[#allocation3 + $0x36]]  ;;  %vm651_vm15 = vcmp.eq.s32.totalorder %v2434_v0, 63  ;;  %v353_v31 = vstv %s2409_s26 }
  0xf8   : > { %v594_v35 = vsel %vm591_vm0, %v593_v34, %v590_v33  ;;  %v597_v36 = vstv %s1664_s6  ;;  %s1670_s1 = sld [smem:[#allocation3 + $0x37]]  ;;  %vm655_vm0 = vcmp.eq.s32.totalorder %v2434_v0, 64 }
  0xf9   : > { %v598_v37 = vsel %vm595_vm1, %v597_v36, %v594_v35  ;;  %v601_v38 = vstv %s1665_s23  ;;  %s1671_s30 = sld [smem:[#allocation3 + $0x38]]  ;;  %vm659_vm1 = vcmp.eq.s32.totalorder %v2434_v0, 65  ;;  %v357_v35 = vstv %s2411_s25 }
  0xfa   : > { %v602_v39 = vsel %vm599_vm2, %v601_v38, %v598_v37  ;;  %v605_v40 = vstv %s1666_s2  ;;  %s1672_s15 = sld [smem:[#allocation3 + $0x39]]  ;;  %vm663_vm2 = vcmp.eq.s32.totalorder %v2434_v0, 66 }
  0xfb   : > { %v606_v41 = vsel %vm603_vm3, %v605_v40, %v602_v39  ;;  %v609_v42 = vstv %s1667_s3  ;;  %s1673_s0 = sld [smem:[#allocation3 + $0x3a]]  ;;  %vm667_vm3 = vcmp.eq.s32.totalorder %v2434_v0, 67  ;;  %v361_v39 = vstv %s2413_s24 }
  0xfc   : > { %v610_v43 = vsel %vm607_vm4, %v609_v42, %v606_v41  ;;  %v613_v44 = vstv %s1668_s4  ;;  %s1674_s6 = sld [smem:[#allocation3 + $0x3b]]  ;;  %vm671_vm4 = vcmp.eq.s32.totalorder %v2434_v0, 68 }
  0xfd   : > { %v614_v45 = vsel %vm611_vm5, %v613_v44, %v610_v43  ;;  %v617_v46 = vstv %s1669_s5  ;;  %s1675_s23 = sld [smem:[#allocation3 + $0x3c]]  ;;  %vm675_vm5 = vcmp.eq.s32.totalorder %v2434_v0, 69  ;;  %v365_v43 = vstv %s2415_s17 }
  0xfe   : > { %v618_v47 = vsel %vm615_vm6, %v617_v46, %v614_v45  ;;  %v621_v48 = vstv %s1670_s1  ;;  %s1676_s2 = sld [smem:[#allocation3 + $0x3d]]  ;;  %vm335_vm6 = vcmp.eq.s32.totalorder %v2534_v12, 0 }
  0xff   : > { %v622_v49 = vsel %vm619_vm7, %v621_v48, %v618_v47  ;;  %v625_v50 = vstv %s1671_s30  ;;  %s1677_s3 = sld [smem:[#allocation3 + $0x3e]]  ;;  %vm679_vm7 = vcmp.eq.s32.totalorder %v2434_v0, 70  ;;  %v338_v18 = vsel %vm335_vm6, %v337_v15, 0.0 }
 0x100   : > { %v626_v51 = vsel %vm623_vm8, %v625_v50, %v622_v49  ;;  %v629_v52 = vstv %s1672_s15  ;;  %s1678_s4 = sld [smem:[#allocation3 + $0x3f]]  ;;  %vm339_vm8 = vcmp.eq.s32.totalorder %v2534_v12, 1  ;;  %vm367_vm6 = vcmp.eq.s32.totalorder %v2534_v12, 8 }
 0x101   : > { %v630_v53 = vsel %vm627_vm9, %v629_v52, %v626_v51  ;;  %v633_v54 = vstv %s1673_s0  ;;  %s1679_s5 = sld [smem:[#allocation3 + $0x40]]  ;;  %vm683_vm9 = vcmp.eq.s32.totalorder %v2434_v0, 71  ;;  %v342_v22 = vsel %vm339_vm8, %v341_v19, %v338_v18 }
 0x102   : > { %v634_v55 = vsel %vm631_vm10, %v633_v54, %v630_v53  ;;  %v637_v56 = vstv %s1674_s6  ;;  %s1680_s1 = sld [smem:[#allocation3 + $0x41]]  ;;  %vm343_vm10 = vcmp.eq.s32.totalorder %v2534_v12, 2  ;;  %v369_v47 = vstv %s2417_s16 }
 0x103   : > { %v638_v57 = vsel %vm635_vm11, %v637_v56, %v634_v55  ;;  %v641_v58 = vstv %s1675_s23  ;;  %s1681_s30 = sld [smem:[#allocation3 + $0x42]]  ;;  %vm687_vm11 = vcmp.eq.s32.totalorder %v2434_v0, 72  ;;  %v346_v26 = vsel %vm343_vm10, %v345_v23, %v342_v22 }
 0x104   : > { %v642_v59 = vsel %vm639_vm12, %v641_v58, %v638_v57  ;;  %v645_v60 = vstv %s1676_s2  ;;  %s1682_s15 = sld [smem:[#allocation3 + $0x43]]  ;;  %vm347_vm12 = vcmp.eq.s32.totalorder %v2534_v12, 3  ;;  %vm371_vm8 = vcmp.eq.s32.totalorder %v2534_v12, 9 }
 0x105   : > { %v646_v61 = vsel %vm643_vm13, %v645_v60, %v642_v59  ;;  %v649_v62 = vstv %s1677_s3  ;;  %s2501_s0 = sld [smem:[#allocation3 + $0x44]]  ;;  %vm691_vm13 = vcmp.eq.s32.totalorder %v2434_v0, 73  ;;  %v350_v30 = vsel %vm347_vm12, %v349_v27, %v346_v26 }
 0x106   : > { %v650_v63 = vsel %vm647_vm14, %v649_v62, %v646_v61  ;;  %v653_v1 = vstv %s1678_s4  ;;  %s2503_s6 = sld [smem:[#allocation3 + $0x45]]  ;;  %vm351_vm14 = vcmp.eq.s32.totalorder %v2534_v12, 4  ;;  %v373_v51 = vstv %s2419_s13 }
 0x107   : > { %v654_v2 = vsel %vm651_vm15, %v653_v1, %v650_v63  ;;  %v657_v3 = vstv %s1679_s5  ;;  %s2505_s23 = sld [smem:[#allocation3 + $0x46]]  ;;  %vm695_vm15 = vcmp.eq.s32.totalorder %v2434_v0, 74  ;;  %v354_v34 = vsel %vm351_vm14, %v353_v31, %v350_v30 }
 0x108   : > { %v658_v4 = vsel %vm655_vm0, %v657_v3, %v654_v2  ;;  %v661_v5 = vstv %s1680_s1  ;;  %s2508_s2 = sld [smem:[#allocation3 + $0x47]]  ;;  %vm355_vm0 = vcmp.eq.s32.totalorder %v2534_v12, 5  ;;  %vm375_vm10 = vcmp.eq.s32.totalorder %v2534_v12, 10 }
 0x109   : > { %s2510_s14 = sld [smem:[#allocation3 + $0x48]]  ;;  %v662_v6 = vsel %vm659_vm1, %v661_v5, %v658_v4  ;;  %v665_v7 = vstv %s1681_s30  ;;  %vm699_vm1 = vcmp.eq.s32.totalorder %v2434_v0, 75  ;;  %v358_v38 = vsel %vm355_vm0, %v357_v35, %v354_v34 }
 0x10a   : > { %s2512_s3 = sld [smem:[#allocation3 + $0x49]]  ;;  %v666_v8 = vsel %vm663_vm2, %v665_v7, %v662_v6  ;;  %v669_v9 = vstv %s1682_s15  ;;  %vm359_vm2 = vcmp.eq.s32.totalorder %v2534_v12, 6  ;;  %v377_v55 = vstv %s2421_s18 }
 0x10b   : > { %s2515_s4 = sld [smem:[#allocation3 + $0x4a]]  ;;  %v670_v10 = vsel %vm667_vm3, %v669_v9, %v666_v8  ;;  %v673_v11 = vstv %s2501_s0  ;;  %vm703_vm3 = vcmp.eq.s32.totalorder %v2434_v0, 76  ;;  %v362_v42 = vsel %vm359_vm2, %v361_v39, %v358_v38 }
 0x10c   : > { %s2517_s5 = sld [smem:[#allocation3 + $0x4b]]  ;;  %v674_v13 = vsel %vm671_vm4, %v673_v11, %v670_v10  ;;  %v677_v14 = vstv %s2503_s6  ;;  %vm363_vm4 = vcmp.eq.s32.totalorder %v2534_v12, 7  ;;  %vm379_vm12 = vcmp.eq.s32.totalorder %v2534_v12, 11 }
 0x10d   : > { %s2519_s28 = sld [smem:[#allocation3 + $0x4c]]  ;;  %v678_v16 = vsel %vm675_vm5, %v677_v14, %v674_v13  ;;  %v681_v17 = vstv %s2505_s23  ;;  %vm707_vm5 = vcmp.eq.s32.totalorder %v2434_v0, 77  ;;  %v366_v46 = vsel %vm363_vm4, %v365_v43, %v362_v42 }
 0x10e   : > { %s2522_s1 = sld [smem:[#allocation3 + $0x4d]]  ;;  %v682_v20 = vsel %vm679_vm7, %v681_v17, %v678_v16  ;;  %v685_v21 = vstv %s2508_s2  ;;  %vm711_vm7 = vcmp.eq.s32.totalorder %v2434_v0, 78  ;;  %v370_v50 = vsel %vm367_vm6, %v369_v47, %v366_v46 }
 0x10f   : > { %s2524_s7 = sld [smem:[#allocation3 + $0x4e]]  ;;  %v686_v24 = vsel %vm683_vm9, %v685_v21, %v682_v20  ;;  %v689_v25 = vstv %s2510_s14  ;;  %vm715_vm9 = vcmp.eq.s32.totalorder %v2434_v0, 79  ;;  %v374_v54 = vsel %vm371_vm8, %v373_v51, %v370_v50 }
 0x110   : > { %s2526_s20 = sld [smem:[#allocation3 + $0x4f]]  ;;  %v690_v28 = vsel %vm687_vm11, %v689_v25, %v686_v24  ;;  %v693_v29 = vstv %s2512_s3  ;;  %vm719_vm11 = vcmp.eq.s32.totalorder %v2434_v0, 80  ;;  %v378_v58 = vsel %vm375_vm10, %v377_v55, %v374_v54 }
 0x111   : > { %s2530_s30 = sld [smem:[#allocation3 + $0x50]]  ;;  %v694_v32 = vsel %vm691_vm13, %v693_v29, %v690_v28  ;;  %v697_v33 = vstv %s2515_s4  ;;  %v381_v59 = vstv %s2423_s11  ;;  %vm723_vm13 = vcmp.eq.s32.totalorder %v2434_v0, 81 }
 0x112   : > { %s2536_s29 = sld [smem:[#allocation3 + $0x51]]  ;;  %v698_v36 = vsel %vm695_vm15, %v697_v33, %v694_v32  ;;  %v701_v37 = vstv %s2517_s5  ;;  %v382_v62 = vsel %vm379_vm12, %v381_v59, %v378_v58  ;;  %vm383_vm14 = vcmp.eq.s32.totalorder %v2534_v12, 12 }
 0x113   : > { %s2538_s15 = sld [smem:[#allocation3 + $0x52]]  ;;  %v702_v40 = vsel %vm699_vm1, %v701_v37, %v698_v36  ;;  %v705_v41 = vstv %s2519_s28  ;;  %v385_v63 = vstv %s2425_s22  ;;  %vm727_vm15 = vcmp.eq.s32.totalorder %v2434_v0, 82 }
 0x114   : > { %s2542_s19 = sld [smem:[#allocation3 + $0x53]]  ;;  %v706_v44 = vsel %vm703_vm3, %v705_v41, %v702_v40  ;;  %v709_v45 = vstv %s2522_s1  ;;  %v386_v3 = vsel %vm383_vm14, %v385_v63, %v382_v62  ;;  %vm387_vm0 = vcmp.eq.s32.totalorder %v2534_v12, 13 }
 0x115   : > { %s2546_s0 = sld [smem:[#allocation3 + $0x54]]  ;;  %v710_v48 = vsel %vm707_vm5, %v709_v45, %v706_v44  ;;  %v713_v49 = vstv %s2524_s7  ;;  %vm731_vm1 = vcmp.eq.s32.totalorder %v2434_v0, 83  ;;  %vm391_vm2 = vcmp.eq.s32.totalorder %v2534_v12, 14 }
 0x116   : > { %s2548_s21 = sld [smem:[#allocation3 + $0x55]]  ;;  %v714_v52 = vsel %vm711_vm7, %v713_v49, %v710_v48  ;;  %v717_v53 = vstv %s2526_s20  ;;  %vm735_vm3 = vcmp.eq.s32.totalorder %v2434_v0, 84  ;;  %vm395_vm4 = vcmp.eq.s32.totalorder %v2534_v12, 15 }
 0x117   : > { %s2552_s27 = sld [smem:[#allocation3 + $0x56]]  ;;  %v718_v56 = vsel %vm715_vm9, %v717_v53, %v714_v52  ;;  %v721_v57 = vstv %s2530_s30  ;;  %vm739_vm5 = vcmp.eq.s32.totalorder %v2434_v0, 85  ;;  %vm911_vm6 = vcmp.eq.s32.totalorder %v2434_v0, 128 }
 0x118   : > { %s2556_s6 = sld [smem:[#allocation3 + $0x57]]  ;;  %v722_v60 = vsel %vm719_vm11, %v721_v57, %v718_v56  ;;  %v725_v61 = vstv %s2536_s29  ;;  %vm743_vm7 = vcmp.eq.s32.totalorder %v2434_v0, 86  ;;  %vm747_vm8 = vcmp.eq.s32.totalorder %v2434_v0, 87 }
 0x119   : > { %s2562_s9 = sld [smem:[#allocation3 + $0x59]]  ;;  %v726_v1 = vsel %vm723_vm13, %v725_v61, %v722_v60  ;;  %v729_v2 = vstv %s2538_s15  ;;  %vm751_vm9 = vcmp.eq.s32.totalorder %v2434_v0, 88  ;;  %vm915_vm10 = vcmp.eq.s32.totalorder %v2434_v0, 129 }
 0x11a   : > { %3551 = sst [smem:[#allocation34_spill]] %s2542_s19  ;;  %v730_v5 = vsel %vm727_vm15, %v729_v2, %v726_v1  ;;  %vm919_vm11 = vcmp.eq.s32.totalorder %v2434_v0, 130  ;;  %vm755_vm12 = vcmp.eq.s32.totalorder %v2434_v0, 89  ;;  %vm923_vm13 = vcmp.eq.s32.totalorder %v2434_v0, 131 }
 0x11b   : > { %s2558_s19 = sld [smem:[#allocation3 + $0x58]]  ;;  %v737_v10 = vstv %s2546_s0  ;;  %vm927_vm14 = vcmp.eq.s32.totalorder %v2434_v0, 132  ;;  %vm931_vm15 = vcmp.eq.s32.totalorder %v2434_v0, 133 }
 0x11c   : > { %s2566_s23 = sld [smem:[#allocation3 + $0x5a]]  ;;  %v741_v15 = vstv %s2548_s21 }
 0x11d   : > { %3552 = sst [smem:[#allocation35_spill]] %s2552_s27 }
 0x11e   : > { %s2568_s27 = sld [smem:[#allocation3 + $0x5b]]  ;;  %v749_v24 = vstv %s2556_s6 }
 0x11f   : > { %3553 = sst [smem:[#allocation36_spill]] %s2562_s9 }
 0x120   : > { %s2572_s8 = sld [smem:[#allocation3 + $0x5c]] }
 0x121   : > { %s2576_s2 = sld [smem:[#allocation3 + $0x5d]]  ;;  %v753_v32 = vstv %s2558_s19 }
 0x122   : > { %s2578_s9 = sld [smem:[#allocation3 + $0x5e]]  ;;  %v761_v48 = vstv %s2566_s23 }
 0x123   : > { %s2582_s10 = sld [smem:[#allocation3 + $0x5f]] }
 0x124   : > { %s2586_s14 = sld [smem:[#allocation3 + $0x60]]  ;;  %v765_v57 = vstv %s2568_s27 }
 0x125   : > { %s2592_s12 = sld [smem:[#allocation3 + $0x62]] }
 0x126   : > { %3554 = sst [smem:[#allocation37_spill]] %s2572_s8 }
 0x127   : > { %s2588_s8 = sld [smem:[#allocation3 + $0x61]] }
 0x128   : > { %s2596_s3 = sld [smem:[#allocation3 + $0x63]] }
 0x129   : > { %3555 = sst [smem:[#allocation38_spill]] %s2582_s10 }
 0x12a   : > { %s2598_s10 = sld [smem:[#allocation3 + $0x64]] }
 0x12b   : > { %3556 = sst [smem:[#allocation39_spill]] %s2592_s12 }
 0x12c   : > { %s2602_s26 = sld [smem:[#allocation3 + $0x65]] }
 0x12d   : > { %s2606_s4 = sld [smem:[#allocation3 + $0x66]] }
 0x12e   : > { %s2608_s12 = sld [smem:[#allocation3 + $0x67]] }
 0x12f   : > { %s2612_s25 = sld [smem:[#allocation3 + $0x68]] }
 0x130   : > { %s2616_s5 = sld [smem:[#allocation3 + $0x69]] }
 0x131   : > { %s2622_s24 = sld [smem:[#allocation3 + $0x6b]] }
 0x132   : > { %3557 = sst [smem:[#allocation40_spill]] %s2602_s26 }
 0x133   : > { %s2618_s26 = sld [smem:[#allocation3 + $0x6a]] }
 0x134   : > { %s2626_s28 = sld [smem:[#allocation3 + $0x6c]] }
 0x135   : > { %3558 = sst [smem:[#allocation41_spill]] %s2612_s25 }
 0x136   : > { %s2628_s25 = sld [smem:[#allocation3 + $0x6d]] }
 0x137   : > { %3559 = sst [smem:[#allocation42_spill]] %s2622_s24 }
 0x138   : > { %s2632_s17 = sld [smem:[#allocation3 + $0x6e]] }
 0x139   : > { %s2636_s1 = sld [smem:[#allocation3 + $0x6f]] }
 0x13a   : > { %s2638_s24 = sld [smem:[#allocation3 + $0x70]] }
 0x13b   : > { %s2642_s16 = sld [smem:[#allocation3 + $0x71]] }
 0x13c   : > { %s2646_s7 = sld [smem:[#allocation3 + $0x72]] }
 0x13d   : > { %s2652_s13 = sld [smem:[#allocation3 + $0x74]] }
 0x13e   : > { %3560 = sst [smem:[#allocation43_spill]] %s2632_s17 }
 0x13f   : > { %s2648_s17 = sld [smem:[#allocation3 + $0x73]] }
 0x140   : > { %s2656_s20 = sld [smem:[#allocation3 + $0x75]] }
 0x141   : > { %3561 = sst [smem:[#allocation44_spill]] %s2642_s16 }
 0x142   : > { %3562 = sst [smem:[#allocation45_spill]] %s2646_s7 }
 0x143   : > { %3564 = sst [smem:[#allocation47_spill]] %s2652_s13 }
 0x144   : > { %s2658_s16 = sld [smem:[#allocation3 + $0x76]] }
 0x145   : > { %3563 = sst [smem:[#allocation46_spill]] %s2648_s17 }
 0x146   : > { %s3566_s18 = sld [smem:[#allocation31_spill]] }
 0x147   : > { %s2662_s17 = sld [smem:[#allocation3 + $0x77]] }
 0x148   : > { %s3568_s30 = sld [smem:[#allocation34_spill]] }
 0x149   : > { %s2666_s13 = sld [smem:[#allocation3 + $0x78]] }
 0x14a   : > { %3565 = sst [smem:[#allocation48_spill]] %s2658_s16 }
 0x14b   : > { %s2668_s7 = sld [smem:[#allocation3 + $0x79]] }
 0x14c   : > { %s3570_s11 = sld [smem:[#allocation32_spill]]  ;;  %v389_v4 = vstv %s3566_s18 }
 0x14d   : > { %3567 = sst [smem:[#allocation31_spill]] %s2662_s17  ;;  %v390_v7 = vsel %vm387_vm0, %v389_v4, %v386_v3  ;;  %vm759_vm0 = vcmp.eq.s32.totalorder %v2434_v0, 90 }
 0x14e   : > { %s2672_s16 = sld [smem:[#allocation3 + $0x7a]]  ;;  %v733_v6 = vstv %s3568_s30 }
 0x14f   : > { %s2676_s29 = sld [smem:[#allocation3 + $0x7b]]  ;;  %v734_v9 = vsel %vm731_vm1, %v733_v6, %v730_v5  ;;  %vm935_vm1 = vcmp.eq.s32.totalorder %v2434_v0, 134 }
 0x150   : > { %s2678_s17 = sld [smem:[#allocation3 + $0x7c]]  ;;  %v738_v14 = vsel %vm735_vm3, %v737_v10, %v734_v9  ;;  %vm943_vm3 = vcmp.eq.s32.totalorder %v2434_v0, 136  ;;  %v773_v10 = vstv %s2576_s2 }
 0x151   : > { %3569 = sst [smem:[#allocation34_spill]] %s2668_s7  ;;  %v742_v12 = vsel %vm739_vm5, %v741_v15, %v738_v14  ;;  %vm947_vm5 = vcmp.eq.s32.totalorder %v2434_v0, 137 }
 0x152   : > { %s3573_s22 = sld [smem:[#allocation33_spill]]  ;;  %v393_v8 = vstv %s3570_s11 }
 0x153   : > { %s2682_s7 = sld [smem:[#allocation3 + $0x7d]]  ;;  %v394_v11 = vsel %vm391_vm2, %v393_v8, %v390_v7  ;;  %vm939_vm2 = vcmp.eq.s32.totalorder %v2434_v0, 135 }
 0x154   : > { %3571 = sst [smem:[#allocation32_spill]] %s2672_s16 }
 0x155   : > { %s2686_s15 = sld [smem:[#allocation3 + $0x7e]] }
 0x156   : > { %3572 = sst [smem:[#allocation49_spill]] %s2678_s17 }
 0x157   : > { %s2688_s16 = sld [smem:[#allocation3 + $0x7f]] }
 0x158   : > { %s1743_s18 = sld [smem:[#allocation3 + $0x80]]  ;;  %v397_v13 = vstv %s3573_s22 }
 0x159   : > { %3574 = sst [smem:[#allocation33_spill]] %s2682_s7  ;;  %v2698_v16 = vsel %vm395_vm4, %v397_v13, %v394_v11  ;;  %vm763_vm4 = vcmp.eq.s32.totalorder %v2434_v0, 91 }
 0x15a   : > { %s3576_s30 = sld [smem:[#allocation35_spill]] }
 0x15b   : > { %s1744_s7 = sld [smem:[#allocation3 + $0x81]] }
 0x15c   : > { %s2694_s17 = sld [smem:[#allocation3 + $0x82]] }
 0x15d   : > { %3575 = sst [smem:[#allocation50_spill]] %s2688_s16 }
 0x15e   : > { %s1746_s11 = sld [smem:[#allocation3 + $0x83]]  ;;  %v913_v18 = vstv %s1743_s18 }
 0x15f   : > { %s2701_s16 = sld [smem:[#allocation3 + $0x84]]  ;;  %v914_v19 = vsel %vm911_vm6, %v913_v18, 0.0  ;;  %vm951_vm6 = vcmp.eq.s32.totalorder %v2434_v0, 138 }
 0x160   : > { %s2707_s0 = sld [smem:[#allocation3 + $0x85]]  ;;  %v745_v17 = vstv %s3576_s30 }
 0x161   : > { %s2711_s21 = sld [smem:[#allocation3 + $0x86]]  ;;  %v917_v20 = vstv %s1744_s7  ;;  %v746_v23 = vsel %vm743_vm7, %v745_v17, %v742_v12  ;;  %vm955_vm7 = vcmp.eq.s32.totalorder %v2434_v0, 139 }
 0x162   : > { %s2715_s22 = sld [smem:[#allocation3 + $0x87]]  ;;  %v918_v21 = vsel %vm915_vm10, %v917_v20, %v914_v19  ;;  %v921_v22 = vstv %s2694_s17  ;;  %v750_v31 = vsel %vm747_vm8, %v749_v24, %v746_v23  ;;  %vm767_vm8 = vcmp.eq.s32.totalorder %v2434_v0, 92 }
 0x163   : > { %s2720_s18 = sld [smem:[#allocation3 + $0x88]]  ;;  %v922_v25 = vsel %vm919_vm11, %v921_v22, %v918_v21  ;;  %v754_v39 = vsel %vm751_vm9, %v753_v32, %v750_v31  ;;  %vm959_vm10 = vcmp.eq.s32.totalorder %v2434_v0, 140  ;;  %vm963_vm9 = vcmp.eq.s32.totalorder %v2434_v0, 141 }
 0x164   : > { %v925_v26 = vstv %s1746_s11  ;;  %s2725_s7 = sld [smem:[#allocation3 + $0x89]]  ;;  %vm967_vm11 = vcmp.eq.s32.totalorder %v2434_v0, 142  ;;  %v777_v19 = vstv %s2578_s9 }
 0x165   : > { %v926_v27 = vsel %vm923_vm13, %v925_v26, %v922_v25  ;;  %v929_v28 = vstv %s2701_s16  ;;  %s2730_s17 = sld [smem:[#allocation3 + $0x8a]]  ;;  %vm771_vm13 = vcmp.eq.s32.totalorder %v2434_v0, 93 }
 0x166   : > { %v930_v29 = vsel %vm927_vm14, %v929_v28, %v926_v27  ;;  %v933_v30 = vstv %s2707_s0  ;;  %s2735_s6 = sld [smem:[#allocation3 + $0x8b]] }
 0x167   : > { %s3577_s30 = sld [smem:[#allocation36_spill]]  ;;  %v934_v33 = vsel %vm931_vm15, %v933_v30, %v930_v29  ;;  %v937_v34 = vstv %s2711_s21 }
 0x168   : > { %s2743_s16 = sld [smem:[#allocation3 + $0x8c]]  ;;  %v938_v35 = vsel %vm935_vm1, %v937_v34, %v934_v33  ;;  %v941_v36 = vstv %s2715_s22  ;;  %v785_v34 = vstv %s2586_s14 }
 0x169   : > { %s2748_s11 = sld [smem:[#allocation3 + $0x8d]]  ;;  %v942_v37 = vsel %vm939_vm2, %v941_v36, %v938_v35  ;;  %v945_v38 = vstv %s2720_s18 }
 0x16a   : > { %s2753_s19 = sld [smem:[#allocation3 + $0x8e]]  ;;  %v946_v41 = vsel %vm943_vm3, %v945_v38, %v942_v37  ;;  %v949_v42 = vstv %s2725_s7 }
 0x16b   : > { %s2761_s0 = sld [smem:[#allocation3 + $0x8f]]  ;;  %v950_v43 = vsel %vm947_vm5, %v949_v42, %v946_v41  ;;  %v953_v44 = vstv %s2730_s17  ;;  %v789_v42 = vstv %s2588_s8 }
 0x16c   : > { %s3578_s21 = sld [smem:[#allocation30_spill]]  ;;  %v954_v45 = vsel %vm951_vm6, %v953_v44, %v950_v43  ;;  %v957_v46 = vstv %s2735_s6 }
 0x16d   : > { %v757_v40 = vstv %s3577_s30  ;;  %s2766_s22 = sld [smem:[#allocation3 + $0x90]]  ;;  %v958_v49 = vsel %vm955_vm7, %v957_v46, %v954_v45 }
 0x16e   : > { %s2771_s18 = sld [smem:[#allocation3 + $0x91]]  ;;  %v758_v47 = vsel %vm755_vm12, %v757_v40, %v754_v39  ;;  %v961_v50 = vstv %s2743_s16 }
 0x16f   : > { %s2779_s7 = sld [smem:[#allocation3 + $0x92]]  ;;  %v962_v51 = vsel %vm959_vm10, %v961_v50, %v958_v49  ;;  %v965_v52 = vstv %s2748_s11  ;;  %v762_v56 = vsel %vm759_vm0, %v761_v48, %v758_v47 }
 0x170   : > { %s2787_s17 = sld [smem:[#allocation3 + $0x93]]  ;;  %v966_v54 = vsel %vm963_vm9, %v965_v52, %v962_v51  ;;  %v969_v55 = vstv %s2753_s19  ;;  %v766_v1 = vsel %vm763_vm4, %v765_v57, %v762_v56 }
 0x171   : > { %s2792_s23 = sld [smem:[#allocation3 + $0x94]]  ;;  %v970_v58 = vsel %vm967_vm11, %v969_v55, %v966_v54  ;;  %v973_v59 = vstv %s2761_s0 }
 0x172   : > { %v2784_v53 = vld [vmem:[%s3578_s21] sm:$0xff]  ;;  %s3579_s6 = sld [smem:[#allocation37_spill]] }
 0x173   : > { %vm971_vm14 = vcmp.eq.s32.totalorder %v2784_v53, 143  ;;  %vm975_vm12 = vcmp.eq.s32.totalorder %v2784_v53, 144  ;;  %vm979_vm15 = vcmp.eq.s32.totalorder %v2784_v53, 145  ;;  %s2800_s30 = sld [smem:[#allocation3 + $0x95]]  ;;  %vm775_vm1 = vcmp.eq.s32.totalorder %v2784_v53, 94 }
 0x174   : > { %v974_v60 = vsel %vm971_vm14, %v973_v59, %v970_v58  ;;  %v977_v61 = vstv %s2766_s22  ;;  %vm983_vm2 = vcmp.eq.s32.totalorder %v2784_v53, 146  ;;  %s2805_s16 = sld [smem:[#allocation3 + $0x96]]  ;;  %v981_v63 = vstv %s2771_s18 }
 0x175   : > { %v978_v62 = vsel %vm975_vm12, %v977_v61, %v974_v60  ;;  %vm987_vm0 = vcmp.eq.s32.totalorder %v2784_v53, 147  ;;  %vm991_vm3 = vcmp.eq.s32.totalorder %v2784_v53, 148  ;;  %s2810_s27 = sld [smem:[#allocation3 + $0x97]]  ;;  %v985_v4 = vstv %s2779_s7 }
 0x176   : > { %v982_v3 = vsel %vm979_vm15, %v981_v63, %v978_v62  ;;  %s2818_s11 = sld [smem:[#allocation3 + $0x98]]  ;;  %vm779_vm5 = vcmp.eq.s32.totalorder %v2784_v53, 95  ;;  %v989_v6 = vstv %s2787_s17  ;;  %vm995_vm6 = vcmp.eq.s32.totalorder %v2784_v53, 149 }
 0x177   : > { %v986_v5 = vsel %vm983_vm2, %v985_v4, %v982_v3  ;;  %s2823_s19 = sld [smem:[#allocation3 + $0x99]]  ;;  %v993_v8 = vstv %s2792_s23  ;;  %vm999_vm4 = vcmp.eq.s32.totalorder %v2784_v53, 150  ;;  %vm1003_vm7 = vcmp.eq.s32.totalorder %v2784_v53, 151 }
 0x178   : > { %v769_v2 = vstv %s3579_s6  ;;  %v990_v7 = vsel %vm987_vm0, %v989_v6, %v986_v5  ;;  %s2828_s0 = sld [smem:[#allocation3 + $0x9a]]  ;;  %vm783_vm10 = vcmp.eq.s32.totalorder %v2784_v53, 96  ;;  %vm1007_vm9 = vcmp.eq.s32.totalorder %v2784_v53, 152 }
 0x179   : > { %v770_v9 = vsel %vm767_vm8, %v769_v2, %v766_v1  ;;  %v994_v11 = vsel %vm991_vm3, %v993_v8, %v990_v7  ;;  %v997_v13 = vstv %s2800_s30  ;;  %s2836_s22 = sld [smem:[#allocation3 + $0x9b]]  ;;  %vm1011_vm8 = vcmp.eq.s32.totalorder %v2784_v53, 153 }
 0x17a   : > { %v998_v14 = vsel %vm995_vm6, %v997_v13, %v994_v11  ;;  %v1001_v15 = vstv %s2805_s16  ;;  %s2841_s18 = sld [smem:[#allocation3 + $0x9c]]  ;;  %vm1015_vm11 = vcmp.eq.s32.totalorder %v2784_v53, 154  ;;  %v774_v18 = vsel %vm771_vm13, %v773_v10, %v770_v9 }
 0x17b   : > { %v1002_v12 = vsel %vm999_vm4, %v1001_v15, %v998_v14  ;;  %v1005_v17 = vstv %s2810_s27  ;;  %s2846_s2 = sld [smem:[#allocation3 + $0x9d]]  ;;  %vm787_vm14 = vcmp.eq.s32.totalorder %v2784_v53, 97  ;;  %vm1019_vm12 = vcmp.eq.s32.totalorder %v2784_v53, 155 }
 0x17c   : > { %s3580_s7 = sld [smem:[#allocation38_spill]]  ;;  %v1006_v20 = vsel %vm1003_vm7, %v1005_v17, %v1002_v12  ;;  %v1009_v21 = vstv %s2818_s11  ;;  %vm1023_vm13 = vcmp.eq.s32.totalorder %v2784_v53, 156  ;;  %vm1027_vm15 = vcmp.eq.s32.totalorder %v2784_v53, 157 }
 0x17d   : > { %s2854_s17 = sld [smem:[#allocation3 + $0x9e]]  ;;  %v1010_v22 = vsel %vm1007_vm9, %v1009_v21, %v1006_v20  ;;  %v1013_v23 = vstv %s2823_s19  ;;  %v778_v25 = vsel %vm775_vm1, %v777_v19, %v774_v18  ;;  %vm791_vm2 = vcmp.eq.s32.totalorder %v2784_v53, 98 }
 0x17e   : > { %s2859_s23 = sld [smem:[#allocation3 + $0x9f]]  ;;  %v1014_v0 = vsel %vm1011_vm8, %v1013_v23, %v1010_v22  ;;  %v1017_v24 = vstv %s2828_s0  ;;  %vm1031_vm0 = vcmp.eq.s32.totalorder %v2784_v53, 158  ;;  %vm1035_vm1 = vcmp.eq.s32.totalorder %v2784_v53, 159 }
 0x17f   : > { %s2864_s9 = sld [smem:[#allocation3 + $0xa0]]  ;;  %v1018_v27 = vsel %vm1015_vm11, %v1017_v24, %v1014_v0  ;;  %v1021_v28 = vstv %s2836_s22  ;;  %vm1039_vm3 = vcmp.eq.s32.totalorder %v2784_v53, 160  ;;  %vm795_vm6 = vcmp.eq.s32.totalorder %v2784_v53, 99 }
 0x180   : > { %s2872_s6 = sld [smem:[#allocation3 + $0xa1]]  ;;  %v1022_v29 = vsel %vm1019_vm12, %v1021_v28, %v1018_v27  ;;  %v1025_v30 = vstv %s2841_s18  ;;  %vm1043_vm4 = vcmp.eq.s32.totalorder %v2784_v53, 161  ;;  %vm1051_vm7 = vcmp.eq.s32.totalorder %v2784_v53, 163 }
 0x181   : > { %s2877_s30 = sld [smem:[#allocation3 + $0xa2]]  ;;  %v1026_v31 = vsel %vm1023_vm13, %v1025_v30, %v1022_v29  ;;  %v1029_v32 = vstv %s2846_s2  ;;  %vm799_vm9 = vcmp.eq.s32.totalorder %v2784_v53, 100  ;;  %vm1055_vm8 = vcmp.eq.s32.totalorder %v2784_v53, 164 }
 0x182   : > { %v781_v26 = vstv %s3580_s7  ;;  %s2882_s16 = sld [smem:[#allocation3 + $0xa3]]  ;;  %v1030_v35 = vsel %vm1027_vm15, %v1029_v32, %v1026_v31  ;;  %vm1063_vm11 = vcmp.eq.s32.totalorder %v2784_v53, 166  ;;  %vm803_vm12 = vcmp.eq.s32.totalorder %v2784_v53, 101 }
 0x183   : > { %v782_v33 = vsel %vm779_vm5, %v781_v26, %v778_v25  ;;  %v1033_v36 = vstv %s2854_s17  ;;  %s2890_s27 = sld [smem:[#allocation3 + $0xa4]]  ;;  %vm1047_vm5 = vcmp.eq.s32.totalorder %v2784_v53, 162  ;;  %vm1067_vm13 = vcmp.eq.s32.totalorder %v2784_v53, 167 }
 0x184   : > { %v1034_v37 = vsel %vm1031_vm0, %v1033_v36, %v1030_v35  ;;  %v1037_v38 = vstv %s2859_s23  ;;  %s2895_s11 = sld [smem:[#allocation3 + $0xa5]]  ;;  %v786_v41 = vsel %vm783_vm10, %v785_v34, %v782_v33  ;;  %vm1059_vm10 = vcmp.eq.s32.totalorder %v2784_v53, 165 }
 0x185   : > { %v1038_v39 = vsel %vm1035_vm1, %v1037_v38, %v1034_v37  ;;  %v1041_v40 = vstv %s2864_s9  ;;  %s2900_s14 = sld [smem:[#allocation3 + $0xa6]]  ;;  %v790_v49 = vsel %vm787_vm14, %v789_v42, %v786_v41  ;;  %vm1071_vm14 = vcmp.eq.s32.totalorder %v2784_v53, 168 }
 0x186   : > { %s3581_s19 = sld [smem:[#allocation39_spill]]  ;;  %v1042_v43 = vsel %vm1039_vm3, %v1041_v40, %v1038_v39  ;;  %v1045_v44 = vstv %s2872_s6  ;;  %vm1075_vm15 = vcmp.eq.s32.totalorder %v2784_v53, 169  ;;  %v797_v59 = vstv %s2596_s3 }
 0x187   : > { %s2908_s0 = sld [smem:[#allocation3 + $0xa7]]  ;;  %v1046_v45 = vsel %vm1043_vm4, %v1045_v44, %v1042_v43  ;;  %v1049_v46 = vstv %s2877_s30  ;;  %vm807_vm0 = vcmp.eq.s32.totalorder %v2784_v53, 102  ;;  %vm1079_vm1 = vcmp.eq.s32.totalorder %v2784_v53, 170 }
 0x188   : > { %s2913_s22 = sld [smem:[#allocation3 + $0xa8]]  ;;  %v1050_v47 = vsel %vm1047_vm5, %v1049_v46, %v1046_v45  ;;  %v1053_v48 = vstv %s2882_s16  ;;  %vm1087_vm3 = vcmp.eq.s32.totalorder %v2784_v53, 172  ;;  %v801_v4 = vstv %s2598_s10 }
 0x189   : > { %s2918_s8 = sld [smem:[#allocation3 + $0xa9]]  ;;  %v1054_v51 = vsel %vm1051_vm7, %v1053_v48, %v1050_v47  ;;  %v1057_v52 = vstv %s2890_s27  ;;  %vm811_vm4 = vcmp.eq.s32.totalorder %v2784_v53, 103  ;;  %vm1091_vm5 = vcmp.eq.s32.totalorder %v2784_v53, 173 }
 0x18a   : > { %s2926_s18 = sld [smem:[#allocation3 + $0xaa]]  ;;  %v1058_v54 = vsel %vm1055_vm8, %v1057_v52, %v1054_v51  ;;  %v1061_v55 = vstv %s2895_s11  ;;  %vm1099_vm7 = vcmp.eq.s32.totalorder %v2784_v53, 175  ;;  %vm815_vm8 = vcmp.eq.s32.totalorder %v2784_v53, 104 }
 0x18b   : > { %s2931_s2 = sld [smem:[#allocation3 + $0xab]]  ;;  %v1062_v56 = vsel %vm1059_vm10, %v1061_v55, %v1058_v54  ;;  %v1065_v57 = vstv %s2900_s14  ;;  %vm1103_vm10 = vcmp.eq.s32.totalorder %v2784_v53, 176  ;;  %v809_v21 = vstv %s2606_s4 }
 0x18c   : > { %v793_v50 = vstv %s3581_s19  ;;  %s2936_s7 = sld [smem:[#allocation3 + $0xac]]  ;;  %v1066_v60 = vsel %vm1063_vm11, %v1065_v57, %v1062_v56  ;;  %vm1111_vm11 = vcmp.eq.s32.totalorder %v2784_v53, 178  ;;  %v813_v28 = vstv %s2608_s12 }
 0x18d   : > { %v794_v58 = vsel %vm791_vm2, %v793_v50, %v790_v49  ;;  %v1069_v61 = vstv %s2908_s0  ;;  %s2944_s17 = sld [smem:[#allocation3 + $0xad]]  ;;  %vm1083_vm2 = vcmp.eq.s32.totalorder %v2784_v53, 171  ;;  %v821_v44 = vstv %s2616_s5 }
 0x18e   : > { %v1070_v62 = vsel %vm1067_vm13, %v1069_v61, %v1066_v60  ;;  %v1073_v63 = vstv %s2913_s22  ;;  %s2949_s23 = sld [smem:[#allocation3 + $0xae]]  ;;  %v798_v3 = vsel %vm795_vm6, %v797_v59, %v794_v58  ;;  %vm1095_vm6 = vcmp.eq.s32.totalorder %v2784_v53, 174 }
 0x18f   : > { %v1074_v1 = vsel %vm1071_vm14, %v1073_v63, %v1070_v62  ;;  %v1077_v2 = vstv %s2918_s8  ;;  %s2954_s3 = sld [smem:[#allocation3 + $0xaf]]  ;;  %v802_v11 = vsel %vm799_vm9, %v801_v4, %v798_v3  ;;  %vm1107_vm9 = vcmp.eq.s32.totalorder %v2784_v53, 177 }
 0x190   : > { %s3582_s9 = sld [smem:[#allocation40_spill]]  ;;  %v1078_v5 = vsel %vm1075_vm15, %v1077_v2, %v1074_v1  ;;  %v1081_v6 = vstv %s2926_s18  ;;  %vm819_vm13 = vcmp.eq.s32.totalorder %v2784_v53, 105  ;;  %vm1115_vm14 = vcmp.eq.s32.totalorder %v2784_v53, 179 }
 0x191   : > { %s2962_s6 = sld [smem:[#allocation3 + $0xb0]]  ;;  %v1082_v7 = vsel %vm1079_vm1, %v1081_v6, %v1078_v5  ;;  %v1085_v8 = vstv %s2931_s2  ;;  %vm1123_vm15 = vcmp.eq.s32.totalorder %v2784_v53, 181  ;;  %vm823_vm1 = vcmp.eq.s32.totalorder %v2784_v53, 106 }
 0x192   : > { %s2967_s30 = sld [smem:[#allocation3 + $0xb1]]  ;;  %v1086_v9 = vsel %vm1083_vm2, %v1085_v8, %v1082_v7  ;;  %v1089_v10 = vstv %s2936_s7  ;;  %vm1127_vm2 = vcmp.eq.s32.totalorder %v2784_v53, 182  ;;  %v825_v52 = vstv %s2618_s26 }
 0x193   : > { %s2972_s10 = sld [smem:[#allocation3 + $0xb2]]  ;;  %v1090_v14 = vsel %vm1087_vm3, %v1089_v10, %v1086_v9  ;;  %v1093_v15 = vstv %s2944_s17  ;;  %vm1135_vm3 = vcmp.eq.s32.totalorder %v2784_v53, 184  ;;  %v833_v6 = vstv %s2626_s28 }
 0x194   : > { %s2980_s16 = sld [smem:[#allocation3 + $0xb3]]  ;;  %v1094_v12 = vsel %vm1091_vm5, %v1093_v15, %v1090_v14  ;;  %v1097_v17 = vstv %s2949_s23  ;;  %vm827_vm5 = vcmp.eq.s32.totalorder %v2784_v53, 107  ;;  %v837_v15 = vstv %s2628_s25 }
 0x195   : > { %s2985_s27 = sld [smem:[#allocation3 + $0xb4]]  ;;  %v1098_v18 = vsel %vm1095_vm6, %v1097_v17, %v1094_v12  ;;  %v1101_v19 = vstv %s2954_s3  ;;  %vm1139_vm6 = vcmp.eq.s32.totalorder %v2784_v53, 185 }
 0x196   : > { %v805_v13 = vstv %s3582_s9  ;;  %s2990_s11 = sld [smem:[#allocation3 + $0xb5]]  ;;  %v1102_v22 = vsel %vm1099_vm7, %v1101_v19, %v1098_v18  ;;  %vm1147_vm7 = vcmp.eq.s32.totalorder %v2784_v53, 187 }
 0x197   : > { %v806_v20 = vsel %vm803_vm12, %v805_v13, %v802_v11  ;;  %v1105_v23 = vstv %s2962_s6  ;;  %s2998_s14 = sld [smem:[#allocation3 + $0xb6]]  ;;  %vm1119_vm12 = vcmp.eq.s32.totalorder %v2784_v53, 180 }
 0x198   : > { %v1106_v0 = vsel %vm1103_vm10, %v1105_v23, %v1102_v22  ;;  %v1109_v24 = vstv %s2967_s30  ;;  %s3003_s19 = sld [smem:[#allocation3 + $0xb7]]  ;;  %v810_v27 = vsel %vm807_vm0, %v809_v21, %v806_v20  ;;  %vm1131_vm0 = vcmp.eq.s32.totalorder %v2784_v53, 183 }
 0x199   : > { %v1110_v25 = vsel %vm1107_vm9, %v1109_v24, %v1106_v0  ;;  %v1113_v26 = vstv %s2972_s10  ;;  %s3008_s4 = sld [smem:[#allocation3 + $0xb8]]  ;;  %v814_v35 = vsel %vm811_vm4, %v813_v28, %v810_v27  ;;  %vm1143_vm4 = vcmp.eq.s32.totalorder %v2784_v53, 186 }
 0x19a   : > { %s3583_s0 = sld [smem:[#allocation41_spill]]  ;;  %v1114_v29 = vsel %vm1111_vm11, %v1113_v26, %v1110_v25  ;;  %v1117_v30 = vstv %s2980_s16  ;;  %vm831_vm10 = vcmp.eq.s32.totalorder %v2784_v53, 108  ;;  %vm1151_vm9 = vcmp.eq.s32.totalorder %v2784_v53, 188 }
 0x19b   : > { %s3016_s22 = sld [smem:[#allocation3 + $0xb9]]  ;;  %v1118_v31 = vsel %vm1115_vm14, %v1117_v30, %v1114_v29  ;;  %v1121_v32 = vstv %s2985_s27  ;;  %vm1159_vm11 = vcmp.eq.s32.totalorder %v2784_v53, 190  ;;  %vm835_vm14 = vcmp.eq.s32.totalorder %v2784_v53, 109 }
 0x19c   : > { %s3021_s8 = sld [smem:[#allocation3 + $0xba]]  ;;  %v1122_v33 = vsel %vm1119_vm12, %v1121_v32, %v1118_v31  ;;  %v1125_v34 = vstv %s2990_s11  ;;  %vm1163_vm12 = vcmp.eq.s32.totalorder %v2784_v53, 191  ;;  %v845_v30 = vstv %s2636_s1 }
 0x19d   : > { %s3026_s12 = sld [smem:[#allocation3 + $0xbb]]  ;;  %v1126_v37 = vsel %vm1123_vm15, %v1125_v34, %v1122_v33  ;;  %v1129_v38 = vstv %s2998_s14  ;;  %vm1171_vm15 = vcmp.eq.s32.totalorder %v2784_v53, 193 }
 0x19e   : > { %s3034_s18 = sld [smem:[#allocation3 + $0xbc]]  ;;  %v1130_v39 = vsel %vm1127_vm2, %v1129_v38, %v1126_v37  ;;  %v1133_v40 = vstv %s3003_s19  ;;  %vm839_vm2 = vcmp.eq.s32.totalorder %v2784_v53, 110  ;;  %v849_v38 = vstv %s2638_s24 }
 0x19f   : > { %s3039_s2 = sld [smem:[#allocation3 + $0xbd]]  ;;  %v1134_v41 = vsel %vm1131_vm0, %v1133_v40, %v1130_v39  ;;  %v1137_v42 = vstv %s3008_s4  ;;  %vm1175_vm0 = vcmp.eq.s32.totalorder %v2784_v53, 194 }
 0x1a0   : > { %v817_v36 = vstv %s3583_s0  ;;  %s3044_s7 = sld [smem:[#allocation3 + $0xbe]]  ;;  %v1138_v45 = vsel %vm1135_vm3, %v1137_v42, %v1134_v41  ;;  %vm1183_vm3 = vcmp.eq.s32.totalorder %v2784_v53, 196 }
 0x1a1   : > { %v818_v43 = vsel %vm815_vm8, %v817_v36, %v814_v35  ;;  %v1141_v46 = vstv %s3016_s22  ;;  %s3052_s17 = sld [smem:[#allocation3 + $0xbf]]  ;;  %vm1155_vm8 = vcmp.eq.s32.totalorder %v2784_v53, 189 }
 0x1a2   : > { %v1142_v47 = vsel %vm1139_vm6, %v1141_v46, %v1138_v45  ;;  %v1145_v48 = vstv %s3021_s8  ;;  %s3057_s23 = sld [smem:[#allocation3 + $0xc0]]  ;;  %v822_v51 = vsel %vm819_vm13, %v821_v44, %v818_v43  ;;  %vm1167_vm13 = vcmp.eq.s32.totalorder %v2784_v53, 192 }
 0x1a3   : > { %v1146_v49 = vsel %vm1143_vm4, %v1145_v48, %v1142_v47  ;;  %v1149_v50 = vstv %s3026_s12  ;;  %s3062_s5 = sld [smem:[#allocation3 + $0xc1]]  ;;  %v826_v60 = vsel %vm823_vm1, %v825_v52, %v822_v51  ;;  %vm1179_vm1 = vcmp.eq.s32.totalorder %v2784_v53, 195 }
 0x1a4   : > { %s3584_s3 = sld [smem:[#allocation42_spill]]  ;;  %v1150_v54 = vsel %vm1147_vm7, %v1149_v50, %v1146_v49  ;;  %v1153_v55 = vstv %s3034_s18  ;;  %vm843_vm6 = vcmp.eq.s32.totalorder %v2784_v53, 111  ;;  %vm1187_vm4 = vcmp.eq.s32.totalorder %v2784_v53, 197 }
 0x1a5   : > { %s3070_s9 = sld [smem:[#allocation3 + $0xc2]]  ;;  %v1154_v56 = vsel %vm1151_vm9, %v1153_v55, %v1150_v54  ;;  %v1157_v57 = vstv %s3039_s2  ;;  %vm1195_vm7 = vcmp.eq.s32.totalorder %v2784_v53, 199  ;;  %vm847_vm9 = vcmp.eq.s32.totalorder %v2784_v53, 112 }
 0x1a6   : > { %s3075_s6 = sld [smem:[#allocation3 + $0xc3]]  ;;  %v1158_v58 = vsel %vm1155_vm8, %v1157_v57, %v1154_v56  ;;  %v1161_v59 = vstv %s3044_s7  ;;  %vm1199_vm8 = vcmp.eq.s32.totalorder %v2784_v53, 200 }
 0x1a7   : > { %s3080_s26 = sld [smem:[#allocation3 + $0xc4]]  ;;  %v1162_v62 = vsel %vm1159_vm11, %v1161_v59, %v1158_v58  ;;  %v1165_v63 = vstv %s3052_s17  ;;  %vm1207_vm11 = vcmp.eq.s32.totalorder %v2784_v53, 202 }
 0x1a8   : > { %s3088_s30 = sld [smem:[#allocation3 + $0xc5]]  ;;  %v1166_v1 = vsel %vm1163_vm12, %v1165_v63, %v1162_v62  ;;  %v1169_v2 = vstv %s3057_s23  ;;  %vm851_vm12 = vcmp.eq.s32.totalorder %v2784_v53, 113 }
 0x1a9   : > { %s3093_s10 = sld [smem:[#allocation3 + $0xc6]]  ;;  %v1170_v3 = vsel %vm1167_vm13, %v1169_v2, %v1166_v1  ;;  %v1173_v4 = vstv %s3062_s5  ;;  %vm1211_vm13 = vcmp.eq.s32.totalorder %v2784_v53, 203 }
 0x1aa   : > { %v829_v61 = vstv %s3584_s3  ;;  %s3098_s16 = sld [smem:[#allocation3 + $0xc7]]  ;;  %v1174_v7 = vsel %vm1171_vm15, %v1173_v4, %v1170_v3  ;;  %vm1219_vm15 = vcmp.eq.s32.totalorder %v2784_v53, 205 }
 0x1ab   : > { %v830_v5 = vsel %vm827_vm5, %v829_v61, %v826_v60  ;;  %v1177_v8 = vstv %s3070_s9  ;;  %s3106_s27 = sld [smem:[#allocation3 + $0xc8]]  ;;  %vm1191_vm5 = vcmp.eq.s32.totalorder %v2784_v53, 198 }
 0x1ac   : > { %v1178_v9 = vsel %vm1175_vm0, %v1177_v8, %v1174_v7  ;;  %v1181_v10 = vstv %s3075_s6  ;;  %s3111_s11 = sld [smem:[#allocation3 + $0xc9]]  ;;  %v834_v14 = vsel %vm831_vm10, %v833_v6, %v830_v5  ;;  %vm1203_vm10 = vcmp.eq.s32.totalorder %v2784_v53, 201 }
 0x1ad   : > { %v1182_v11 = vsel %vm1179_vm1, %v1181_v10, %v1178_v9  ;;  %v1185_v13 = vstv %s3080_s26  ;;  %s3116_s28 = sld [smem:[#allocation3 + $0xca]]  ;;  %v838_v22 = vsel %vm835_vm14, %v837_v15, %v834_v14  ;;  %vm1215_vm14 = vcmp.eq.s32.totalorder %v2784_v53, 204 }
 0x1ae   : > { %s3585_s14 = sld [smem:[#allocation43_spill]]  ;;  %v1186_v12 = vsel %vm1183_vm3, %v1185_v13, %v1182_v11  ;;  %v1189_v17 = vstv %s3088_s30  ;;  %vm855_vm0 = vcmp.eq.s32.totalorder %v2784_v53, 114  ;;  %vm1223_vm1 = vcmp.eq.s32.totalorder %v2784_v53, 206 }
 0x1af   : > { %s3124_s19 = sld [smem:[#allocation3 + $0xcb]]  ;;  %v1190_v18 = vsel %vm1187_vm4, %v1189_v17, %v1186_v12  ;;  %v1193_v19 = vstv %s3093_s10  ;;  %vm1231_vm3 = vcmp.eq.s32.totalorder %v2784_v53, 208  ;;  %vm859_vm4 = vcmp.eq.s32.totalorder %v2784_v53, 115 }
 0x1b0   : > { %s3129_s4 = sld [smem:[#allocation3 + $0xcc]]  ;;  %v1194_v20 = vsel %vm1191_vm5, %v1193_v19, %v1190_v18  ;;  %v1197_v21 = vstv %s3098_s16  ;;  %vm1235_vm5 = vcmp.eq.s32.totalorder %v2784_v53, 209  ;;  %v869_v17 = vstv %s2656_s20 }
 0x1b1   : > { %s3134_s25 = sld [smem:[#allocation3 + $0xcd]]  ;;  %v1198_v0 = vsel %vm1195_vm7, %v1197_v21, %v1194_v20  ;;  %v1201_v24 = vstv %s3106_s27  ;;  %vm1243_vm7 = vcmp.eq.s32.totalorder %v2784_v53, 211 }
 0x1b2   : > { %s3142_s0 = sld [smem:[#allocation3 + $0xce]]  ;;  %v1202_v25 = vsel %vm1199_vm8, %v1201_v24, %v1198_v0  ;;  %v1205_v26 = vstv %s3111_s11  ;;  %vm863_vm8 = vcmp.eq.s32.totalorder %v2784_v53, 116 }
 0x1b3   : > { %s3147_s22 = sld [smem:[#allocation3 + $0xcf]]  ;;  %v1206_v27 = vsel %vm1203_vm10, %v1205_v26, %v1202_v25  ;;  %v1209_v28 = vstv %s3116_s28  ;;  %vm1247_vm10 = vcmp.eq.s32.totalorder %v2784_v53, 212 }
 0x1b4   : > { %v841_v23 = vstv %s3585_s14  ;;  %s3152_s8 = sld [smem:[#allocation3 + $0xd0]]  ;;  %v1210_v31 = vsel %vm1207_vm11, %v1209_v28, %v1206_v27  ;;  %vm1255_vm11 = vcmp.eq.s32.totalorder %v2784_v53, 214 }
 0x1b5   : > { %v842_v29 = vsel %vm839_vm2, %v841_v23, %v838_v22  ;;  %v1213_v32 = vstv %s3124_s19  ;;  %s3160_s12 = sld [smem:[#allocation3 + $0xd1]]  ;;  %vm1227_vm2 = vcmp.eq.s32.totalorder %v2784_v53, 207 }
 0x1b6   : > { %v1214_v33 = vsel %vm1211_vm13, %v1213_v32, %v1210_v31  ;;  %v1217_v34 = vstv %s3129_s4  ;;  %s3165_s18 = sld [smem:[#allocation3 + $0xd2]]  ;;  %v846_v37 = vsel %vm843_vm6, %v845_v30, %v842_v29  ;;  %vm1239_vm6 = vcmp.eq.s32.totalorder %v2784_v53, 210 }
 0x1b7   : > { %v1218_v35 = vsel %vm1215_vm14, %v1217_v34, %v1214_v33  ;;  %v1221_v36 = vstv %s3134_s25  ;;  %s3170_s1 = sld [smem:[#allocation3 + $0xd3]]  ;;  %v850_v45 = vsel %vm847_vm9, %v849_v38, %v846_v37  ;;  %vm1251_vm9 = vcmp.eq.s32.totalorder %v2784_v53, 213 }
 0x1b8   : > { %s3586_s2 = sld [smem:[#allocation44_spill]]  ;;  %v1222_v39 = vsel %vm1219_vm15, %v1221_v36, %v1218_v35  ;;  %v1225_v40 = vstv %s3142_s0  ;;  %vm867_vm13 = vcmp.eq.s32.totalorder %v2784_v53, 117  ;;  %vm1259_vm14 = vcmp.eq.s32.totalorder %v2784_v53, 215 }
 0x1b9   : > { %s3178_s7 = sld [smem:[#allocation3 + $0xd4]]  ;;  %v1226_v41 = vsel %vm1223_vm1, %v1225_v40, %v1222_v39  ;;  %v1229_v42 = vstv %s3147_s22  ;;  %vm1267_vm15 = vcmp.eq.s32.totalorder %v2784_v53, 217  ;;  %vm871_vm1 = vcmp.eq.s32.totalorder %v2784_v53, 118 }
 0x1ba   : > { %s3183_s17 = sld [smem:[#allocation3 + $0xd5]]  ;;  %v1230_v43 = vsel %vm1227_vm2, %v1229_v42, %v1226_v41  ;;  %v1233_v44 = vstv %s3152_s8  ;;  %vm1271_vm2 = vcmp.eq.s32.totalorder %v2784_v53, 218  ;;  %v1427_v42 = vsub.f32 0.0, %v2698_v16 }
 0x1bb   : > { %s3188_s24 = sld [smem:[#allocation3 + $0xd6]]  ;;  %v1234_v47 = vsel %vm1231_vm3, %v1233_v44, %v1230_v43  ;;  %v1237_v48 = vstv %s3160_s12  ;;  %vm1279_vm3 = vcmp.eq.s32.totalorder %v2784_v53, 220  ;;  %v881_v44 = vstv %s2666_s13 }
 0x1bc   : > { %s3587_s23 = sld [smem:[#allocation45_spill]]  ;;  %v1238_v49 = vsel %vm1235_vm5, %v1237_v48, %v1234_v47  ;;  %v1241_v50 = vstv %s3165_s18  ;;  %vm875_vm5 = vcmp.eq.s32.totalorder %v2784_v53, 119 }
 0x1bd   : > { %s3196_s5 = sld [smem:[#allocation3 + $0xd7]]  ;;  %v1242_v51 = vsel %vm1239_vm6, %v1241_v50, %v1238_v49  ;;  %v1245_v52 = vstv %s3170_s1  ;;  %vm1283_vm6 = vcmp.eq.s32.totalorder %v2784_v53, 221 }
 0x1be   : > { %v853_v46 = vstv %s3586_s2  ;;  %s3201_s3 = sld [smem:[#allocation3 + $0xd8]]  ;;  %v1246_v56 = vsel %vm1243_vm7, %v1245_v52, %v1242_v51  ;;  %vm1291_vm7 = vcmp.eq.s32.totalorder %v2784_v53, 223 }
 0x1bf   : > { %s3206_s9 = sld [smem:[#allocation3 + $0xd9]]  ;;  %v854_v54 = vsel %vm851_vm12, %v853_v46, %v850_v45  ;;  %v1249_v57 = vstv %s3178_s7  ;;  %vm1263_vm12 = vcmp.eq.s32.totalorder %v2784_v53, 216 }
 0x1c0   : > { %s3588_s6 = sld [smem:[#allocation46_spill]]  ;;  %v1250_v58 = vsel %vm1247_vm10, %v1249_v57, %v1246_v56  ;;  %v1253_v59 = vstv %s3183_s17  ;;  %vm879_vm10 = vcmp.eq.s32.totalorder %v2784_v53, 120 }
 0x1c1   : > { %s3214_s26 = sld [smem:[#allocation3 + $0xda]]  ;;  %v1254_v60 = vsel %vm1251_vm9, %v1253_v59, %v1250_v58  ;;  %v1257_v61 = vstv %s3188_s24  ;;  %vm1295_vm9 = vcmp.eq.s32.totalorder %v2784_v53, 224 }
 0x1c2   : > { %v857_v55 = vstv %s3587_s23  ;;  %s3219_s30 = sld [smem:[#allocation3 + $0xdb]]  ;;  %v1258_v1 = vsel %vm1255_vm11, %v1257_v61, %v1254_v60  ;;  %vm1299_vm11 = vcmp.eq.s32.totalorder %v2784_v53, 225 }
 0x1c3   : > { %s3224_s10 = sld [smem:[#allocation3 + $0xdc]]  ;;  %v858_v62 = vsel %vm855_vm0, %v857_v55, %v854_v54  ;;  %v1261_v2 = vstv %s3196_s5  ;;  %vm1275_vm0 = vcmp.eq.s32.totalorder %v2784_v53, 219 }
 0x1c4   : > { %s3589_s16 = sld [smem:[#allocation47_spill]]  ;;  %v1262_v3 = vsel %vm1259_vm14, %v1261_v2, %v1258_v1  ;;  %v1265_v4 = vstv %s3201_s3  ;;  %vm1307_vm14 = vcmp.eq.s32.totalorder %v2784_v53, 227 }
 0x1c5   : > { %s3232_s27 = sld [smem:[#allocation3 + $0xdd]]  ;;  %v1266_v5 = vsel %vm1263_vm12, %v1265_v4, %v1262_v3  ;;  %v1269_v6 = vstv %s3206_s9  ;;  %vm883_vm12 = vcmp.eq.s32.totalorder %v2784_v53, 121 }
 0x1c6   : > { %v861_v63 = vstv %s3588_s6  ;;  %s3237_s11 = sld [smem:[#allocation3 + $0xde]]  ;;  %v1270_v9 = vsel %vm1267_vm15, %v1269_v6, %v1266_v5  ;;  %vm1311_vm15 = vcmp.eq.s32.totalorder %v2784_v53, 228 }
 0x1c7   : > { %s3242_s28 = sld [smem:[#allocation3 + $0xdf]]  ;;  %v862_v7 = vsel %vm859_vm4, %v861_v63, %v858_v62  ;;  %v1273_v10 = vstv %s3214_s26  ;;  %vm1287_vm4 = vcmp.eq.s32.totalorder %v2784_v53, 222 }
 0x1c8   : > { %s3250_s14 = sld [smem:[#allocation3 + $0xe0]]  ;;  %v1274_v11 = vsel %vm1271_vm2, %v1273_v10, %v1270_v9  ;;  %v1277_v13 = vstv %s3219_s30  ;;  %vm1319_vm2 = vcmp.eq.s32.totalorder %v2784_v53, 230 }
 0x1c9   : > { %s3255_s19 = sld [smem:[#allocation3 + $0xe1]]  ;;  %v1278_v14 = vsel %vm1275_vm0, %v1277_v13, %v1274_v11  ;;  %v1281_v15 = vstv %s3224_s10  ;;  %vm887_vm0 = vcmp.eq.s32.totalorder %v2784_v53, 122 }
 0x1ca   : > { %v865_v8 = vstv %s3589_s16  ;;  %s3590_s4 = sld [smem:[#allocation29_spill]]  ;;  %v1282_v18 = vsel %vm1279_vm3, %v1281_v15, %v1278_v14  ;;  %vm1323_vm3 = vcmp.eq.s32.totalorder %v2784_v53, 231 }
 0x1cb   : > { %s3260_s25 = sld [smem:[#allocation3 + $0xe2]]  ;;  %v866_v12 = vsel %vm863_vm8, %v865_v8, %v862_v7  ;;  %v1285_v19 = vstv %s3232_s27  ;;  %vm1303_vm8 = vcmp.eq.s32.totalorder %v2784_v53, 226  ;;  %v893_v8 = vstv %s2676_s29 }
 0x1cc   : > { %s3591_s0 = sld [smem:[#allocation48_spill]]  ;;  %v1286_v20 = vsel %vm1283_vm6, %v1285_v19, %v1282_v18  ;;  %v1289_v21 = vstv %s3237_s11  ;;  %v870_v25 = vsel %vm867_vm13, %v869_v17, %v866_v12  ;;  %vm1315_vm13 = vcmp.eq.s32.totalorder %v2784_v53, 229 }
 0x1cd   : > { %s3268_s22 = sld [smem:[#allocation3 + $0xe3]]  ;;  %v1290_v0 = vsel %vm1287_vm4, %v1289_v21, %v1286_v20  ;;  %v1293_v24 = vstv %s3242_s28  ;;  %vm1327_vm6 = vcmp.eq.s32.totalorder %v2784_v53, 232  ;;  %vm891_vm4 = vcmp.eq.s32.totalorder %v2784_v53, 123 }
 0x1ce   : > { %s3274_s8 = sld [smem:[#allocation3 + $0xe4]]  ;;  %v1294_v27 = vsel %vm1291_vm7, %v1293_v24, %v1290_v0  ;;  %v1297_v28 = vstv %s3250_s14  ;;  %vm1331_vm7 = vcmp.eq.s32.totalorder %v2784_v53, 233 }
 0x1cf   : > { %s3287_s18 = sld [smem:[#allocation3 + $0xe5]]  ;;  %v1298_v29 = vsel %vm1295_vm9, %v1297_v28, %v1294_v27  ;;  %v1301_v30 = vstv %s3255_s19  ;;  %vm1339_vm9 = vcmp.eq.s32.totalorder %v2784_v53, 235 }
 0x1d0   : > { %s3592_s20 = scalar_lea.vmem [#allocation5], %s3590_s4  ;;  %s3593_s12 = scalar_lea.vmem [#allocation8], %s3590_s4  ;;  %v1302_v31 = vsel %vm1299_vm11, %v1301_v30, %v1298_v29  ;;  %vm895_vm11 = vcmp.eq.s32.totalorder %v2784_v53, 124 }
 0x1d1   : > { %v3278_v22 = vld [vmem:[%s3592_s20] sm:$0xff]  ;;  %s3594_s1 = sld [smem:[#allocation31_spill]]  ;;  %v1305_v32 = vstv %s3260_s25 }
 0x1d2   : > { %v332_v23 = vld [vmem:[%s3593_s12] sm:$0xff]  ;;  %v873_v26 = vstv %s3591_s0  ;;  %s3295_s2 = sld [smem:[#allocation3 + $0xe6]]  ;;  %v1306_v36 = vsel %vm1303_vm8, %v1305_v32, %v1302_v31  ;;  %vm1343_vm8 = vcmp.eq.s32.totalorder %v2784_v53, 236 }
 0x1d3   : > { %s3303_s7 = sld [smem:[#allocation3 + $0xe7]]  ;;  %v1425_v33 = vsub.f32 %v3278_v22, %v332_v23  ;;  %v874_v34 = vsel %vm871_vm1, %v873_v26, %v870_v25  ;;  %v1309_v37 = vstv %s3268_s22  ;;  %vm1424_vm1 = vcmp.gt.f32.partialorder %v3278_v22, 0.0  ;;  %v1941_v23 = vld [vmem:[%s3578_s21] sm:$0xff] }
 0x1d4   : > { %s3309_s17 = sld [smem:[#allocation3 + $0xe8]]  ;;  %v1310_v38 = vsel %vm1307_vm14, %v1309_v37, %v1306_v36  ;;  %v1313_v39 = vstv %s3274_s8  ;;  %vm1351_vm14 = vcmp.eq.s32.totalorder %v2784_v53, 238 }
 0x1d5   : > { %s3318_s24 = sld [smem:[#allocation3 + $0xe9]]  ;;  %v1314_v40 = vsel %vm1311_vm15, %v1313_v39, %v1310_v38  ;;  %v1317_v41 = vstv %s3287_s18  ;;  %v1426_v16 = vsel %vm1424_vm1, %v1425_v33, 0.0  ;;  %vm1355_vm15 = vcmp.eq.s32.totalorder %v2784_v53, 239 }
 0x1d6   : > { %s3325_s23 = sld [smem:[#allocation3 + $0xea]]  ;;  %v1318_v45 = vsel %vm1315_vm13, %v1317_v41, %v1314_v40  ;;  %v1428_v58 = vmul.f32 %v1427_v42, %v1426_v16  ;;  %vm1359_vm13 = vcmp.eq.s32.totalorder %v2784_v53, 240 }
 0x1d7   : > { %v877_v35 = vstv %s3594_s1  ;;  %s3332_s5 = sld [smem:[#allocation3 + $0xeb]] }
 0x1d8   : > { %v878_v43 = vsel %vm875_vm5, %v877_v35, %v874_v34  ;;  %s3595_s3 = sld [smem:[#allocation34_spill]]  ;;  %v1321_v46 = vstv %s3295_s2  ;;  %vm1335_vm5 = vcmp.eq.s32.totalorder %v2784_v53, 234  ;;  %v1429_v6 = vmul.f32 1.442695, %v1428_v58 }
 0x1d9   : > { %s3341_s9 = sld [smem:[#allocation3 + $0xec]]  ;;  %v1322_v47 = vsel %vm1319_vm2, %v1321_v46, %v1318_v45  ;;  %v1325_v48 = vstv %s3303_s7  ;;  %v882_v51 = vsel %vm879_vm10, %v881_v44, %v878_v43  ;;  %vm1347_vm10 = vcmp.eq.s32.totalorder %v2784_v53, 237 }
 0x1da   : > { %s3348_s6 = sld [smem:[#allocation3 + $0xed]]  ;;  %v1326_v49 = vsel %vm1323_vm3, %v1325_v48, %v1322_v47  ;;  %v1329_v50 = vstv %s3309_s17  ;;  %vm899_vm2 = vcmp.eq.s32.totalorder %v2784_v53, 125  ;;  %vm1367_vm3 = vcmp.eq.s32.totalorder %v2784_v53, 242 }
 0x1db   : > { %s3357_s13 = sld [smem:[#allocation3 + $0xee]]  ;;  %v1330_v54 = vsel %vm1327_vm6, %v1329_v50, %v1326_v49  ;;  %v1333_v55 = vstv %s3318_s24  ;;  %vm1375_vm6 = vcmp.eq.s32.totalorder %v2784_v53, 244  ;;  %1938 = vpow2.f32 %v1429_v6 }
 0x1dc   : > { %s3596_s26 = sld [smem:[#allocation32_spill]]  ;;  %v1334_v56 = vsel %vm1331_vm7, %v1333_v55, %v1330_v54  ;;  %v1337_v57 = vstv %s3325_s23  ;;  %vm1379_vm7 = vcmp.eq.s32.totalorder %v1941_v23, 245  ;;  %v905_v34 = vstv %s2686_s15 }
 0x1dd   : > { %s3365_s30 = sld [smem:[#allocation3 + $0xef]]  ;;  %v1338_v59 = vsel %vm1335_vm5, %v1337_v57, %v1334_v56  ;;  %v1341_v60 = vstv %s3332_s5  ;;  %vm1387_vm5 = vcmp.eq.s32.totalorder %v1941_v23, 247  ;;  %s330_s5 = scalar_lea.vmem [#allocation13], %s3590_s4 }
 0x1de   : > { %v885_v52 = vstv %s3595_s3  ;;  %s3370_s10 = sld [smem:[#allocation3 + $0xf0]]  ;;  %v1342_v63 = vsel %vm1339_vm9, %v1341_v60, %v1338_v59  ;;  %vm903_vm9 = vcmp.eq.s32.totalorder %v1941_v23, 126  ;;  %s1448_s3 = sshll.u32 %s330_s5, 4  ;;  %s1449_s3 = int_to_ptr.vmem [resolvable:$true] %s1448_s3 }
 0x1df   : > { %s3375_s16 = sld [smem:[#allocation3 + $0xf1]]  ;;  %v886_v61 = vsel %vm883_vm12, %v885_v52, %v882_v51  ;;  %v1345_v1 = vstv %s3341_s9  ;;  %vm1363_vm12 = vcmp.eq.s32.totalorder %v2784_v53, 241 }
 0x1e0   : > { %s3383_s27 = sld [smem:[#allocation3 + $0xf2]]  ;;  %v1346_v2 = vsel %vm1343_vm8, %v1345_v1, %v1342_v63  ;;  %v1349_v3 = vstv %s3348_s6  ;;  %vm1391_vm8 = vcmp.eq.s32.totalorder %v1941_v23, 248 }
 0x1e1   : > { %s3388_s11 = sld [smem:[#allocation3 + $0xf3]]  ;;  %v1350_v4 = vsel %vm1347_vm10, %v1349_v3, %v1346_v2  ;;  %v1353_v5 = vstv %s3357_s13  ;;  %vm1395_vm10 = vcmp.eq.s32.totalorder %v1941_v23, 249 }
 0x1e2   : > { %v889_v62 = vstv %s3596_s26  ;;  %s3392_s28 = sld [smem:[#allocation3 + $0xf4]]  ;;  %v1354_v9 = vsel %vm1351_vm14, %v1353_v5, %v1350_v4  ;;  %vm1399_vm14 = vcmp.eq.s32.totalorder %v1941_v23, 250 }
 0x1e3   : > { %v890_v7 = vsel %vm887_vm0, %v889_v62, %v886_v61  ;;  %s3597_s14 = sld [smem:[#allocation49_spill]]  ;;  %v1357_v10 = vstv %s3365_s30  ;;  %vm1371_vm0 = vcmp.eq.s32.totalorder %v2784_v53, 243 }
 0x1e4   : > { %s3400_s19 = sld [smem:[#allocation3 + $0xf5]]  ;;  %v1358_v11 = vsel %vm1355_vm15, %v1357_v10, %v1354_v9  ;;  %v1361_v13 = vstv %s3370_s10  ;;  %v894_v12 = vsel %vm891_vm4, %v893_v8, %v890_v7  ;;  %vm1383_vm4 = vcmp.eq.s32.totalorder %v1941_v23, 246  ;;  %s2074_s10 = scalar_lea.vmem %s1449_s3, 128 }
 0x1e5   : > { %s3405_s25 = sld [smem:[#allocation3 + $0xf6]]  ;;  %v1362_v14 = vsel %vm1359_vm13, %v1361_v13, %v1358_v11  ;;  %v1365_v15 = vstv %s3375_s16  ;;  %vm1403_vm15 = vcmp.eq.s32.totalorder %v1941_v23, 251  ;;  %vm1407_vm13 = vcmp.eq.s32.totalorder %v1941_v23, 252  ;;  %p2075_p4 = scmp.ne.s32.totalorder %s1449_s3, %s2074_s10 }
 0x1e6   : > { %s3412_s29 = sld [smem:[#allocation3 + $0xf7]]  ;;  %v1366_v18 = vsel %vm1363_vm12, %v1365_v15, %v1362_v14  ;;  %v1369_v19 = vstv %s3383_s27  ;;  %vm1411_vm12 = vcmp.eq.s32.totalorder %v1941_v23, 253  ;;  %s2156_s16 = smov [#allocation13]  }
 0x1e7   : > { %s3598_s0 = sld [smem:[#allocation33_spill]]  ;;  %v1370_v20 = vsel %vm1367_vm3, %v1369_v19, %v1366_v18  ;;  %v1373_v21 = vstv %s3388_s11  ;;  %vm1419_vm3 = vcmp.eq.s32.totalorder %v1941_v23, 255  ;;  %s2078_s4 = sshll.u32 %s2156_s16, 4  ;;  %s2079_s4 = int_to_ptr.vmem [resolvable:$false] %s2078_s4 }
 0x1e8   : > { %s3420_s22 = sld [smem:[#allocation3 + $0xf8]]  ;;  %v1374_v0 = vsel %vm1371_vm0, %v1373_v21, %v1370_v20  ;;  %v1377_v24 = vstv %s3392_s28  ;;  %v1939_v52 = vpop.eup %1938  ;;  %s2080_s27 = scalar_lea.vmem %s2079_s4, 256 }
 0x1e9   : > { %v897_v17 = vstv %s3597_s14  ;;  %s3424_s8 = sld [smem:[#allocation3 + $0xf9]]  ;;  %v1378_v27 = vsel %vm1375_vm6, %v1377_v24, %v1374_v0  ;;  %p2081_p0 = scmp.lt.s32.totalorder %s1449_s3, %s2079_s4 }
 0x1ea   : > { %s3427_s20 = sld [smem:[#allocation3 + $0xfa]]  ;;  %v898_v25 = vsel %vm895_vm11, %v897_v17, %v894_v12  ;;  %v1381_v28 = vstv %s3400_s19  ;;  %vm907_vm11 = vcmp.eq.s32.totalorder %v1941_v23, 127  ;;  %p2082_p5 = scmp.lt.s32.totalorder %s2080_s27, %s2074_s10 }
 0x1eb   : > { %s1866_s21 = sld [smem:[#allocation3 + $0xfb]]  ;;  %v1382_v29 = vsel %vm1379_vm7, %v1381_v28, %v1378_v27  ;;  %v1385_v30 = vstv %s3405_s25 }
 0x1ec   : > { %s1867_s12 = sld [smem:[#allocation3 + $0xfc]]  ;;  %v1386_v31 = vsel %vm1383_vm4, %v1385_v30, %v1382_v29  ;;  %v1389_v32 = vstv %s3412_s29  ;;  %p2083_p2 = por %p2082_p5, %p2081_p0 }
 0x1ed   : > { %v901_v26 = vstv %s3598_s0  ;;  %s1868_s18 = sld [smem:[#allocation3 + $0xfd]]  ;;  %v1390_v35 = vsel %vm1387_vm5, %v1389_v32, %v1386_v31 }
 0x1ee   : > { %s3599_s1 = sld [smem:[#allocation50_spill]]  ;;  %v902_v33 = vsel %vm899_vm2, %v901_v26, %v898_v25  ;;  %v1393_v36 = vstv %s3420_s22  ;;  %vm1415_vm2 = vcmp.eq.s32.totalorder %v1941_v23, 254 }
 0x1ef   : > { %s1869_s2 = sld [smem:[#allocation3 + $0xfe]]  ;;  %v1394_v37 = vsel %vm1391_vm8, %v1393_v36, %v1390_v35  ;;  %v1397_v38 = vstv %s3424_s8  ;;  %v906_v41 = vsel %vm903_vm9, %v905_v34, %v902_v33 }
 0x1f0   : > { %s1870_s7 = sld [smem:[#allocation3 + $0xff]]  ;;  %v1398_v39 = vsel %vm1395_vm10, %v1397_v38, %v1394_v37  ;;  %v1401_v40 = vstv %s3427_s20 }
 0x1f1   : > { %v1402_v53 = vsel %vm1399_vm14, %v1401_v40, %v1398_v39  ;;  %s3600_s17 = sld [smem:[#allocation23_spill]]  ;;  %v1405_v43 = vstv %s1866_s21 }
 0x1f2   : > { %v1406_v44 = vsel %vm1403_vm15, %v1405_v43, %v1402_v53  ;;  %v1409_v45 = vstv %s1867_s12  ;;  %s3601_s15 = sld [smem:[#allocation28_spill]] }
 0x1f3   : > { %v1410_v46 = vsel %vm1407_vm13, %v1409_v45, %v1406_v44  ;;  %v1413_v47 = vstv %s1868_s18  ;;  %s3602_s24 = sld [smem:[#allocation26_spill]] }
 0x1f4   : > { %v909_v42 = vstv %s3599_s1  ;;  %v1414_v16 = vsel %vm1411_vm12, %v1413_v47, %v1410_v46  ;;  %s3603_s13 = sld [smem:[#allocation55_spill]] }
 0x1f5   : > { %v910_v48 = vsel %vm907_vm11, %v909_v42, %v906_v41  ;;  %v1417_v49 = vstv %s1869_s2 }
 0x1f6   : > { %v1418_v50 = vsel %vm1415_vm2, %v1417_v49, %v1414_v16  ;;  %v1421_v51 = vstv %s1870_s7 }
 0x1f7   : > { %v1422_v54 = vsel %vm1419_vm3, %v1421_v51, %v1418_v50  ;;  %s1872_s23 = sshll.u32 %s3600_s17, 7 }
 0x1f8   : > { %v1423_v55 = vadd.f32 %v1422_v54, %v910_v48  ;;  %s1435_s30 = scalar_lea.sflag [#allocation7], %s3601_s15 }
 0x1f9   : > { %p3604_p1 = scmp.ne.s32.totalorder %s3602_s24, 0 }
 0x1fa   : > { %v1431_v56 = vmul.f32 %v1939_v52, %v1423_v55  ;;  %s3453_s26 = scalar_lea.hbm %s3603_s13, %s1872_s23 }
 0x1fb   : > { %p2076_p6 = pnand %p2075_p4, %p3604_p1 }
 0x1fc   : > { %v1432_v57 = vsel %vm1424_vm1, %v1431_v56, 0.0 }
 0x1fd   : > { %1433 = vst [vmem:[%s330_s5] sm:$0xff] %v1432_v57  ;;  %p2077_p8 = pneg %p2076_p6 }
 0x1ff   : > { %p2084_p3 = pnand %p2083_p2, %p2077_p8 }
 0x201   : > { %2087 = shalt.err (!%p2084_p3)
}
 0x202   : > { %s2088_s11 = scalar_lea.hbm %s3453_s26, 128  ;;  %s2092_s19 = scalar_lea.hbm %s3603_s13, 256 }
 0x203   : > { %p2089_p9 = scmp.ne.s32.totalorder %s3453_s26, %s2088_s11  ;;  %p2093_p11 = scmp.lt.s32.totalorder %s3453_s26, %s3603_s13 }
 0x204   : > { %p2094_p13 = scmp.lt.s32.totalorder %s2092_s19, %s2088_s11 }
 0x205   : > { %p2090_p10 = pnand %p2089_p9, %p3604_p1 }
 0x206   : > { %p2095_p7 = por %p2094_p13, %p2093_p11 }
 0x207   : > { %p2091_p12 = pneg %p2090_p10 }
 0x209   : > { %p2096_p4 = pnand %p2095_p7, %p2091_p12 }
 0x20b   : > { %2099 = shalt.err (!%p2096_p4)
}
 0x20c   : > { %1883 = dma.vmem_to_hbm [thread:$0]  (%p3604_p1), %s1449_s3, 128, %s3453_s26, %s1435_s30  }
 0x20d PF: > { %s3605_s0 = sld [smem:[#allocation19_spill]] }
 0x20e   : > { %s3606_s22 = sld [smem:[#allocation27_spill]] }
 0x20f   : > { %s3607_s8 = sld [smem:[#allocation22_spill]] }
 0x213   : > { %s1460_s20 = sand.u32 1, %s3605_s0  }
 0x214   : > { %p3608_p6 = scmp.ne.s32.totalorder %s3606_s22, 0  ;;  %s1461_s21 = scalar_lea.sflag [#allocation7], %s1460_s20 }
 0x215   : > { %p3609_p8 = scmp.ge.s32.totalorder %s3607_s8, 2 }
 0x217   : > { %p1899_p0 = pnand %p3609_p8, %p3608_p6 }
 0x219   : > { %p1900_p5 = pneg %p1899_p0 }
 0x21b   : > { %2131 = dma.done.wait (%p1900_p5), %s1461_s21, 128  }
 0x21c   : > { %2133 = vsyncadd (%p1900_p5), %s1461_s21, 4294967168  ;;  %s3610_s30 = sld [smem:[#allocation24_spill]] }
 0x21d   : > { %s3611_s0 = sld [smem:[#allocation20_spill]] }
 0x21e   : > { %s3612_s1 = sld [smem:[#allocation21_spill]] }
 0x21f   : > { %s3613_s29 = sld [smem:[#allocation25_spill]] }
 0x222   : > { %p33_p2 = scmp.ge.s32.totalorder %s3610_s30, 4  }
 0x224   :  { %35 = sbr.rel (!%p33_p2) target bundleno = 26 (0x1a), region = 118 }
 0x229   :  { %1466 = vsyncpa [#allocation6], 1 }
 0x22a   :  { %1468 = vsyncpa [#allocation6 + $0x1], 1 }
 0x22b   :  { %1469 = vsyncpa [#allocation9], 1 }
 0x22c   :  { %1471 = vsyncpa [#allocation9 + $0x1], 1 }
 0x22d   :  { %1472 = vsyncpa [#allocation12], 1 }
 0x22e   :  { %1474 = vsyncpa [#allocation12 + $0x1], 1 }
 0x22f   :  { %1475 = vsyncpa [#allocation7], 1 }
 0x230   :  { %1477 = vsyncpa [#allocation7 + $0x1], 1 }

</bundles_post_ra>
